<compile_context>
chip_gen: v7x
topology: tpu7x:2x2x1
jax: 0.10.0
libtpu: 0.0.40
codegen_flags: <defaults>
</compile_context>

<pallas_src>
import functools

import jax
import jax.numpy as jnp
from jax.experimental import pallas as pl
from jax.experimental.pallas import tpu as pltpu

NEG_SLOPE = 0.01   # nn.LeakyReLU default negative_slope


# -----------------------------------------------------------------------------
# Pallas kernel: multi-tap fused matmul
#   out[g, r, :] = act( sum_t  x[g, r + off_t, :] @ w[t]  + b )
# x block: (1, R, C) bf16 ; w: (T, C, Nout) bf16 ; b: (1, Nout) f32
# -----------------------------------------------------------------------------
def _tap_matmul_kernel(x_ref, w_ref, b_ref, o_ref, *, offsets, activation):
    m = o_ref.shape[1]
    acc = None
    for t, off in enumerate(offsets):
        a = x_ref[0, off:off + m, :]                      # static shifted window
        p = jnp.dot(a, w_ref[t], preferred_element_type=jnp.float32)
        acc = p if acc is None else acc + p
    acc = acc + b_ref[...]
    if activation == "leaky_relu":
        acc = jnp.where(acc >= 0, acc, NEG_SLOPE * acc)
    elif activation == "tanh":
        acc = jnp.tanh(acc)
    o_ref[0] = acc.astype(o_ref.dtype)


def tap_matmul(x, layer, offsets, m_rows, activation, out_dtype=jnp.bfloat16):
    """x: (G, R, C) bf16.  layer: {'w': (T, C, Nout) bf16, 'b': (1, Nout) f32}."""
    G, R, C = x.shape
    w, b = layer["w"], layer["b"]
    T, Cw, Nout = w.shape
    assert Cw == C and T == len(offsets)
    assert R >= m_rows + max(offsets)

    kernel = functools.partial(
        _tap_matmul_kernel, offsets=tuple(int(o) for o in offsets), activation=activation)

    out_bytes = jnp.dtype(out_dtype).itemsize
    # Weight/bias index maps are constant so they are fetched once; tiles are tiny,
    # so a modest explicit limit is safe on every generation (v7x has 64 MiB VMEM).
    vmem_need = 2 * (R * C * 2 + m_rows * Nout * out_bytes) + T * C * Nout * 2 + Nout * 4
    vmem_limit = int(min(max(2 * vmem_need, 8 << 20), 64 << 20))

    return pl.pallas_call(
        kernel,
        out_shape=jax.ShapeDtypeStruct((G, m_rows, Nout), out_dtype),
        grid=(G,),
        in_specs=[
            pl.BlockSpec((1, R, C), lambda g: (g, 0, 0)),
            pl.BlockSpec((T, C, Nout), lambda g: (0, 0, 0)),   # constant -> fetched once
            pl.BlockSpec((1, Nout), lambda g: (0, 0)),
        ],
        out_specs=pl.BlockSpec((1, m_rows, Nout), lambda g: (g, 0, 0)),
        compiler_params=pltpu.CompilerParams(
            dimension_semantics=("parallel",),   # batch images -> both v7x TCs busy
            vmem_limit_bytes=vmem_limit,
        ),
        cost_estimate=pl.CostEstimate(
            flops=2 * G * m_rows * T * C * Nout,
            transcendentals=G * m_rows * Nout if activation == "tanh" else 0,
            bytes_accessed=G * (R * C * 2 + m_rows * Nout * out_bytes)
            + T * C * Nout * 2 + Nout * 4,
        ),
    )(x, w, b)


# -----------------------------------------------------------------------------
# Layer wrappers (XLA glue = a small halo pad + free reshapes; no im2col)
# -----------------------------------------------------------------------------
def conv2d_s1(x, layer, activation, out_dtype=jnp.bfloat16, keep_junk=False):
    """3x3 / stride 1 / pad 1 conv.  x: (N,H,W,C) NHWC -> (N,H,W,n_out).
    Rows are computed Wp=W+2 wide (2 junk columns per row) so every tap is a
    contiguous row window of the flat padded image; junk cols are sliced off
    (or kept and zero-weighted by the following fc, see keep_junk)."""
    N, H, W, C = x.shape
    Wp = W + 2
    m_rows = H * Wp
    offsets = tuple(kh * Wp + kw for kh in range(3) for kw in range(3))
    rows_needed = m_rows + offsets[-1]
    hp = -(-rows_needed // Wp)                              # ceil
    xp = jnp.pad(x.astype(jnp.bfloat16), ((0, 0), (1, hp - H - 1), (1, 1), (0, 0)))
    flat = xp.reshape(N, hp * Wp, C)
    out = tap_matmul(flat, layer, offsets, m_rows, activation, out_dtype)
    if keep_junk:
        return out                                          # (N, H*Wp, n_out)
    return out.reshape(N, H, Wp, layer["n_out"])[:, :, :W, :]


def conv2d_s2(x, layer, activation, out_dtype=jnp.bfloat16):
    """3x3 / stride 2 / pad 1 conv via space-to-depth: becomes a 4-tap stride-1
    conv over (N, Hy, Wy, 4C), so taps stay contiguous row windows."""
    N, H, W, C = x.shape
    Ho, Wo = H // 2, W // 2
    Wy = Wo + 1
    m_rows = Ho * Wy
    offsets = tuple(dh * Wy + dw for dh in (0, 1) for dw in (0, 1))
    rows_needed = m_rows + offsets[-1]
    hy = -(-rows_needed // Wy)
    xp = jnp.pad(x.astype(jnp.bfloat16), ((0, 0), (1, 2 * hy - H - 1), (1, 1), (0, 0)))
    y = xp.reshape(N, hy, 2, Wy, 2, C)
    y = jnp.transpose(y, (0, 1, 3, 2, 4, 5)).reshape(N, hy * Wy, 4 * C)
    out = tap_matmul(y, layer, offsets, m_rows, activation, out_dtype)
    return out.reshape(N, Ho, Wy, layer["n_out"])[:, :, :Wo, :]


def conv_transpose2d_s2(x, layer, activation, out_dtype=jnp.bfloat16):
    """3x3 / stride 2 / pad 1 / output_pad 1 ConvTranspose via sub-pixel taps
    (4 taps, no zero insertion)."""
    N, H, W, C = x.shape
    Wp = W + 1
    m_rows = H * Wp
    offsets = tuple(dh * Wp + dw for dh in (0, 1) for dw in (0, 1))
    rows_needed = m_rows + offsets[-1]
    hp = -(-rows_needed // Wp)
    xp = jnp.pad(x.astype(jnp.bfloat16), ((0, 0), (0, hp - H), (0, 1), (0, 0)))
    flat = xp.reshape(N, hp * Wp, C)
    out = tap_matmul(flat, layer, offsets, m_rows, activation, out_dtype)
    c_out = layer["n_out"] // 4
    out = out.reshape(N, H, Wp, 2, 2, c_out)[:, :, :W]      # (N,H,W,ph,pw,c)
    out = jnp.transpose(out, (0, 1, 3, 2, 4, 5))            # (N,H,ph,W,pw,c)
    return out.reshape(N, 2 * H, 2 * W, c_out)


def linear(x2d, layer, activation, out_dtype=jnp.bfloat16):
    """x2d: (B, K) -> (B, n_out)."""
    B, K = x2d.shape
    x3 = x2d.astype(jnp.bfloat16).reshape(1, B, K)
    out = tap_matmul(x3, layer, (0,), B, activation, out_dtype)
    return out.reshape(B, layer["n_out"])


# -----------------------------------------------------------------------------
# Parameter packing (done ONCE at init: per-tap matmul layout, bf16, exact widths)
# -----------------------------------------------------------------------------
def _pack(w_taps, bias):
    w = jnp.stack([t.astype(jnp.float32) for t in w_taps], axis=0).astype(jnp.bfloat16)
    n_out = int(w.shape[-1])
    return {"w": w,
            "b": jnp.asarray(bias, jnp.float32).reshape(1, n_out),
            "n_out": n_out}


def _conv_s1_layer(w, b):
    """w: PyTorch Conv2d weight (C_out, C_in, 3, 3) -> 9 taps of (C_in, C_out)."""
    taps = [jnp.transpose(w[:, :, kh, kw]) for kh in range(3) for kw in range(3)]
    return _pack(taps, b)


def _conv_s2_layer(w, b):
    """Stride-2 conv consumed after space-to-depth-2: 4 taps of (4*C_in, C_out),
    rows ordered (a, b, c_in) to match the s2d channel packing."""
    c_out, c_in, _, _ = w.shape
    taps = []
    for dh in (0, 1):
        for dw in (0, 1):
            rows = []
            for a in (0, 1):
                for bb in (0, 1):
                    kh, kw = 2 * dh + a, 2 * dw + bb
                    if kh < 3 and kw < 3:
                        rows.append(jnp.transpose(w[:, :, kh, kw]))
                    else:
                        rows.append(jnp.zeros((c_in, c_out), w.dtype))
            taps.append(jnp.concatenate(rows, axis=0))
    return _pack(taps, b)


def _tconv_s2_layer(w, b):
    """w: PyTorch ConvTranspose2d weight (C_in, C_out, 3, 3); stride 2, pad 1,
    output_pad 1.  4 sub-pixel taps of (C_in, 4*C_out), cols ordered (ph,pw,co):
    out[2m+ph, 2n+pw] = sum_{dh,dw} x[m+dh, n+dw] * w[:, :, ph-2dh+1, pw-2dw+1]."""
    c_in, c_out, k, _ = w.shape
    taps = []
    for dh in (0, 1):
        for dw in (0, 1):
            cols = []
            for ph in (0, 1):
                for pw in (0, 1):
                    kh, kw = ph - 2 * dh + 1, pw - 2 * dw + 1
                    if 0 <= kh < k and 0 <= kw < k:
                        cols.append(w[:, :, kh, kw])
                    else:
                        cols.append(jnp.zeros((c_in, c_out), w.dtype))
            taps.append(jnp.concatenate(cols, axis=1))
    return _pack(taps, jnp.tile(jnp.asarray(b), 4))


def _fc_muvar_layer(w_mu, w_var, latent_size, c_last):
    """fc_mu / fc_var fused.  Rows permuted to consume the kernel's raw
    (h, w-incl-junk, c) NHWC flat feature; junk columns get zero rows (so the
    encoder's last conv needs no output slice / transpose)."""
    wrow = latent_size + 2
    def repack(w):
        ld = w.shape[0]
        w4 = w.reshape(ld, c_last, latent_size, latent_size)       # (ld, c, h, w) NCHW-flat
        w4 = jnp.transpose(w4, (2, 3, 1, 0))                       # (h, w, c, ld)
        full = jnp.zeros((latent_size, wrow, c_last, ld), w.dtype)
        full = full.at[:, :latent_size].set(w4)
        return full.reshape(latent_size * wrow * c_last, ld)
    wm = jnp.concatenate([repack(w_mu), repack(w_var)], axis=1)
    return _pack([wm], jnp.zeros((wm.shape[1],)))


def _dec_in_layer(w, latent_size, c_last):
    """decoder_input Linear, output columns permuted so the result reshapes
    straight to NHWC (no unflatten transpose).  w: (flat, latent_dim)."""
    flat, ld = w.shape
    wt = jnp.transpose(w).reshape(ld, c_last, latent_size, latent_size)
    wt = jnp.transpose(wt, (0, 2, 3, 1)).reshape(ld, flat)          # cols -> (h, w, c)
    return _pack([wt], jnp.zeros((flat,)))


def init_params(key, input_channels, hidden_dims, latent_dim, latent_size):
    def nrm(k, shape, fan_in):
        return jax.random.normal(k, shape, jnp.float32) / jnp.sqrt(fan_in)

    keys = iter(jax.random.split(key, 64))
    params = {}

    enc = []
    in_ch = input_channels
    for h in hidden_dims:
        w1 = nrm(next(keys), (h, in_ch, 3, 3), 9 * in_ch)
        w2 = nrm(next(keys), (h, h, 3, 3), 9 * h)
        enc.append((_conv_s2_layer(w1, jnp.zeros((h,))),
                    _conv_s1_layer(w2, jnp.zeros((h,)))))
        in_ch = h
    params["encoder"] = enc

    c_last = hidden_dims[-1]
    flat = c_last * latent_size * latent_size
    fc_mu_w = nrm(next(keys), (latent_dim, flat), flat)      # PyTorch (out, in)
    fc_var_w = nrm(next(keys), (latent_dim, flat), flat)
    params["fc_muvar"] = _fc_muvar_layer(fc_mu_w, fc_var_w, latent_size, c_last)
    dec_in_w = nrm(next(keys), (flat, latent_dim), latent_dim)
    params["dec_in"] = _dec_in_layer(dec_in_w, latent_size, c_last)

    rdims = list(reversed(hidden_dims))
    dec = []
    for i in range(len(rdims) - 1):
        wt = nrm(next(keys), (rdims[i], rdims[i + 1], 3, 3), 9 * rdims[i])
        wc = nrm(next(keys), (rdims[i + 1], rdims[i + 1], 3, 3), 9 * rdims[i + 1])
        dec.append((_tconv_s2_layer(wt, jnp.zeros((rdims[i + 1],))),
                    _conv_s1_layer(wc, jnp.zeros((rdims[i + 1],)))))
    params["decoder"] = dec

    h_last = rdims[-1]
    tw = nrm(next(keys), (h_last, h_last, 3, 3), 9 * h_last)
    cw = nrm(next(keys), (input_channels, h_last, 3, 3), 9 * h_last)
    params["final_t"] = _tconv_s2_layer(tw, jnp.zeros((h_last,)))
    params["final_c"] = _conv_s1_layer(cw, jnp.zeros((input_channels,)))
    return params


# -----------------------------------------------------------------------------
# BetaVAE forward
# -----------------------------------------------------------------------------
def beta_vae_forward(params, x_nchw, eps, latent_dim, last_dim, latent_size):
    """Returns [recons, x0, mu, log_var] (recons/x0 in NCHW, like PyTorch)."""
    # ------------------ encode ------------------
    x = jnp.transpose(x_nchw, (0, 2, 3, 1)).astype(jnp.bfloat16)   # NHWC, bf16
    enc = params["encoder"]
    for si, (l1, l2) in enumerate(enc):
        x = conv2d_s2(x, l1, "leaky_relu")
        # last stage: keep the raw flat output (junk cols zero-weighted in fc)
        x = conv2d_s1(x, l2, "leaky_relu", keep_junk=(si == len(enc) - 1))
    feat = x.reshape(x.shape[0], -1)                # NHWC-flat, consumed directly by fc
    muvar = linear(feat, params["fc_muvar"], "linear", jnp.float32)
    mu, log_var = muvar[:, :latent_dim], muvar[:, latent_dim:]

    # --------------- reparameterize (tiny; plain jnp) --------------
    z = eps * jnp.exp(0.5 * log_var) + mu

    # ------------------ decode ------------------
    h = linear(z, params["dec_in"], "linear", jnp.bfloat16)
    h = h.reshape(-1, latent_size, latent_size, last_dim)          # already NHWC
    for (lt, lc) in params["decoder"]:
        h = conv_transpose2d_s2(h, lt, "leaky_relu")
        h = conv2d_s1(h, lc, "leaky_relu")
    h = conv_transpose2d_s2(h, params["final_t"], "leaky_relu")
    h = conv2d_s1(h, params["final_c"], "tanh", out_dtype=jnp.float32)  # exact 4-ch f32
    recons = jnp.transpose(h, (0, 3, 1, 2))                         # back to NCHW
    return [recons, x_nchw, mu, log_var]


# -----------------------------------------------------------------------------
if __name__ == "__main__":
    # Small config consistent with the module:
    #   16x16 input -> two stride-2 encoder stages -> latent_size = 4
    batch = 2
    input_channels = 4
    spatial = 16
    hidden_dims = [8, 16]
    latent_dim = 8
    latent_size = 4
    last_dim = hidden_dims[-1]

    root = jax.random.PRNGKey(0)
    k_x, k_eps, k_params = jax.random.split(root, 3)

    x = jax.random.normal(k_x, (batch, input_channels, spatial, spatial), jnp.float32)
    eps = jax.random.normal(k_eps, (batch, latent_dim), jnp.float32)
    params = init_params(k_params, input_channels, hidden_dims, latent_dim, latent_size)

    fwd = jax.jit(functools.partial(beta_vae_forward, params,
                                    latent_dim=latent_dim, last_dim=last_dim,
                                    latent_size=latent_size))
    recons, x0, mu, log_var = fwd(x, eps)
    jax.block_until_ready(recons)
    jax.block_until_ready(mu)
    jax.block_until_ready(log_var)

    assert recons.shape == x.shape, (recons.shape, x.shape)
    assert mu.shape == (batch, latent_dim)
    assert log_var.shape == (batch, latent_dim)
    assert bool(jnp.isfinite(recons).all())
    assert bool(jnp.isfinite(mu).all()) and bool(jnp.isfinite(log_var).all())
    print("KERNEL_OK")
</pallas_src>

<mosaic_0001>
module attributes {stable_mosaic.version = 11 : i64} {
  func.func @_tap_matmul_kernel(%arg0: i32, %arg1: memref<1x90x16xbf16, #tpu.memory_space<vmem>>, %arg2: memref<4x16x8xbf16, #tpu.memory_space<vmem>>, %arg3: memref<1x8xf32, #tpu.memory_space<vmem>>, %arg4: memref<1x72x8xbf16, #tpu.memory_space<vmem>>) attributes {dimension_semantics = [#tpu.dimension_semantics<parallel>], iteration_bounds = array<i64: 2>, scalar_prefetch = 0 : i64, scratch_operands = 0 : i64, tpu.core_type = #tpu.core_type<tc>, window_params = [{transform_indices = @transform_0, window_bounds = array<i64: 1, 90, 16>}, {pipeline_mode = #tpu.pipeline_mode<synchronous>, transform_indices = @transform_1, window_bounds = array<i64: 4, 16, 8>}, {pipeline_mode = #tpu.pipeline_mode<synchronous>, transform_indices = @transform_2, window_bounds = array<i64: 1, 8>}, {transform_indices = @transform_3, window_bounds = array<i64: 1, 72, 8>}]} {
    %c0 = arith.constant 0 : index
    %c0_0 = arith.constant 0 : index
    %c0_1 = arith.constant 0 : index
    %0 = vector.load %arg1[%c0, %c0_0, %c0_1] : memref<1x90x16xbf16, #tpu.memory_space<vmem>>, vector<1x72x16xbf16>
    %1 = vector.shape_cast %0 : vector<1x72x16xbf16> to vector<72x16xbf16>
    %c0_2 = arith.constant 0 : index
    %c0_3 = arith.constant 0 : index
    %c0_4 = arith.constant 0 : index
    %2 = vector.load %arg2[%c0_2, %c0_3, %c0_4] : memref<4x16x8xbf16, #tpu.memory_space<vmem>>, vector<1x16x8xbf16>
    %3 = vector.shape_cast %2 : vector<1x16x8xbf16> to vector<16x8xbf16>
    %cst = arith.constant dense<0.000000e+00> : vector<72x8xf32>
    %4 = tpu.matmul %1, %3, %cst {dimension_numbers = #tpu.dot_dimension_numbers<[1], [0], [0], [1], [0, 0, 1, 1], [], []>} : vector<72x16xbf16>, vector<16x8xbf16>, vector<72x8xf32> -> vector<72x8xf32>
    %c0_5 = arith.constant 0 : index
    %c1 = arith.constant 1 : index
    %c0_6 = arith.constant 0 : index
    %5 = vector.load %arg1[%c0_5, %c1, %c0_6] : memref<1x90x16xbf16, #tpu.memory_space<vmem>>, vector<1x72x16xbf16>
    %6 = vector.shape_cast %5 : vector<1x72x16xbf16> to vector<72x16xbf16>
    %c1_7 = arith.constant 1 : index
    %c0_8 = arith.constant 0 : index
    %c0_9 = arith.constant 0 : index
    %7 = vector.load %arg2[%c1_7, %c0_8, %c0_9] : memref<4x16x8xbf16, #tpu.memory_space<vmem>>, vector<1x16x8xbf16>
    %8 = vector.shape_cast %7 : vector<1x16x8xbf16> to vector<16x8xbf16>
    %cst_10 = arith.constant dense<0.000000e+00> : vector<72x8xf32>
    %9 = tpu.matmul %6, %8, %cst_10 {dimension_numbers = #tpu.dot_dimension_numbers<[1], [0], [0], [1], [0, 0, 1, 1], [], []>} : vector<72x16xbf16>, vector<16x8xbf16>, vector<72x8xf32> -> vector<72x8xf32>
    %10 = arith.addf %4, %9 : vector<72x8xf32>
    %c0_11 = arith.constant 0 : index
    %c9 = arith.constant 9 : index
    %c0_12 = arith.constant 0 : index
    %11 = vector.load %arg1[%c0_11, %c9, %c0_12] : memref<1x90x16xbf16, #tpu.memory_space<vmem>>, vector<1x72x16xbf16>
    %12 = vector.shape_cast %11 : vector<1x72x16xbf16> to vector<72x16xbf16>
    %c2 = arith.constant 2 : index
    %c0_13 = arith.constant 0 : index
    %c0_14 = arith.constant 0 : index
    %13 = vector.load %arg2[%c2, %c0_13, %c0_14] : memref<4x16x8xbf16, #tpu.memory_space<vmem>>, vector<1x16x8xbf16>
    %14 = vector.shape_cast %13 : vector<1x16x8xbf16> to vector<16x8xbf16>
    %cst_15 = arith.constant dense<0.000000e+00> : vector<72x8xf32>
    %15 = tpu.matmul %12, %14, %cst_15 {dimension_numbers = #tpu.dot_dimension_numbers<[1], [0], [0], [1], [0, 0, 1, 1], [], []>} : vector<72x16xbf16>, vector<16x8xbf16>, vector<72x8xf32> -> vector<72x8xf32>
    %16 = arith.addf %10, %15 : vector<72x8xf32>
    %c0_16 = arith.constant 0 : index
    %c10 = arith.constant 10 : index
    %c0_17 = arith.constant 0 : index
    %17 = vector.load %arg1[%c0_16, %c10, %c0_17] : memref<1x90x16xbf16, #tpu.memory_space<vmem>>, vector<1x72x16xbf16>
    %18 = vector.shape_cast %17 : vector<1x72x16xbf16> to vector<72x16xbf16>
    %c3 = arith.constant 3 : index
    %c0_18 = arith.constant 0 : index
    %c0_19 = arith.constant 0 : index
    %19 = vector.load %arg2[%c3, %c0_18, %c0_19] : memref<4x16x8xbf16, #tpu.memory_space<vmem>>, vector<1x16x8xbf16>
    %20 = vector.shape_cast %19 : vector<1x16x8xbf16> to vector<16x8xbf16>
    %cst_20 = arith.constant dense<0.000000e+00> : vector<72x8xf32>
    %21 = tpu.matmul %18, %20, %cst_20 {dimension_numbers = #tpu.dot_dimension_numbers<[1], [0], [0], [1], [0, 0, 1, 1], [], []>} : vector<72x16xbf16>, vector<16x8xbf16>, vector<72x8xf32> -> vector<72x8xf32>
    %22 = arith.addf %16, %21 : vector<72x8xf32>
    %c0_21 = arith.constant 0 : index
    %c0_22 = arith.constant 0 : index
    %23 = vector.load %arg3[%c0_21, %c0_22] : memref<1x8xf32, #tpu.memory_space<vmem>>, vector<1x8xf32>
    %24 = vector.broadcast %23 : vector<1x8xf32> to vector<72x8xf32>
    %25 = arith.addf %22, %24 : vector<72x8xf32>
    %cst_23 = arith.constant 0.000000e+00 : f32
    %26 = vector.broadcast %cst_23 : f32 to vector<72x8xf32>
    %27 = arith.cmpf oge, %25, %26 : vector<72x8xf32>
    %cst_24 = arith.constant 0.00999999977 : f32
    %28 = vector.broadcast %cst_24 : f32 to vector<72x8xf32>
    %29 = arith.mulf %28, %25 : vector<72x8xf32>
    %30 = arith.select %27, %25, %29 : vector<72x8xi1>, vector<72x8xf32>
    %31 = arith.truncf %30 : vector<72x8xf32> to vector<72x8xbf16>
    %c0_25 = arith.constant 0 : index
    %c0_26 = arith.constant 0 : index
    %c0_27 = arith.constant 0 : index
    %32 = vector.load %arg4[%c0_25, %c0_26, %c0_27] : memref<1x72x8xbf16, #tpu.memory_space<vmem>>, vector<1x72x8xbf16>
    %33 = vector.shape_cast %32 : vector<1x72x8xbf16> to vector<72x8xbf16>
    %34 = vector.shape_cast %31 : vector<72x8xbf16> to vector<1x72x8xbf16>
    tpu.vector_store %arg4[%c0_25, %c0_26, %c0_27], %34 {strides = array<i32>} : memref<1x72x8xbf16, #tpu.memory_space<vmem>>, vector<1x72x8xbf16>,
    return
  }
  func.func @transform_0(%arg0: i32) -> (i32, i32, i32) {
    %c0_i32 = arith.constant 0 : i32
    %c0_i32_0 = arith.constant 0 : i32
    %c0_i32_1 = arith.constant 0 : i32
    return %arg0, %c0_i32, %c0_i32_0 : i32, i32, i32
  }
  func.func @transform_1(%arg0: i32) -> (i32, i32, i32) {
    %c0_i32 = arith.constant 0 : i32
    %c0_i32_0 = arith.constant 0 : i32
    %c0_i32_1 = arith.constant 0 : i32
    %c0_i32_2 = arith.constant 0 : i32
    return %c0_i32, %c0_i32_0, %c0_i32_1 : i32, i32, i32
  }
  func.func @transform_2(%arg0: i32) -> (i32, i32) {
    %c0_i32 = arith.constant 0 : i32
    %c0_i32_0 = arith.constant 0 : i32
    %c0_i32_1 = arith.constant 0 : i32
    return %c0_i32, %c0_i32_0 : i32, i32
  }
  func.func @transform_3(%arg0: i32) -> (i32, i32, i32) {
    %c0_i32 = arith.constant 0 : i32
    %c0_i32_0 = arith.constant 0 : i32
    %c0_i32_1 = arith.constant 0 : i32
    return %arg0, %c0_i32, %c0_i32_0 : i32, i32, i32
  }
}

module attributes {stable_mosaic.version = 11 : i64} {
  func.func @_tap_matmul_kernel(%arg0: i32, %arg1: memref<1x110x8xbf16, #tpu.memory_space<vmem>>, %arg2: memref<9x8x8xbf16, #tpu.memory_space<vmem>>, %arg3: memref<1x8xf32, #tpu.memory_space<vmem>>, %arg4: memref<1x80x8xbf16, #tpu.memory_space<vmem>>) attributes {dimension_semantics = [#tpu.dimension_semantics<parallel>], iteration_bounds = array<i64: 2>, scalar_prefetch = 0 : i64, scratch_operands = 0 : i64, tpu.core_type = #tpu.core_type<tc>, window_params = [{transform_indices = @transform_0, window_bounds = array<i64: 1, 110, 8>}, {pipeline_mode = #tpu.pipeline_mode<synchronous>, transform_indices = @transform_1, window_bounds = array<i64: 9, 8, 8>}, {pipeline_mode = #tpu.pipeline_mode<synchronous>, transform_indices = @transform_2, window_bounds = array<i64: 1, 8>}, {transform_indices = @transform_3, window_bounds = array<i64: 1, 80, 8>}]} {
    %c0 = arith.constant 0 : index
    %c0_0 = arith.constant 0 : index
    %c0_1 = arith.constant 0 : index
    %0 = vector.load %arg1[%c0, %c0_0, %c0_1] : memref<1x110x8xbf16, #tpu.memory_space<vmem>>, vector<1x80x8xbf16>
    %1 = vector.shape_cast %0 : vector<1x80x8xbf16> to vector<80x8xbf16>
    %c0_2 = arith.constant 0 : index
    %c0_3 = arith.constant 0 : index
    %c0_4 = arith.constant 0 : index
    %2 = vector.load %arg2[%c0_2, %c0_3, %c0_4] : memref<9x8x8xbf16, #tpu.memory_space<vmem>>, vector<1x8x8xbf16>
    %3 = vector.shape_cast %2 : vector<1x8x8xbf16> to vector<8x8xbf16>
    %cst = arith.constant dense<0.000000e+00> : vector<80x8xf32>
    %4 = tpu.matmul %1, %3, %cst {dimension_numbers = #tpu.dot_dimension_numbers<[1], [0], [0], [1], [0, 0, 1, 1], [], []>} : vector<80x8xbf16>, vector<8x8xbf16>, vector<80x8xf32> -> vector<80x8xf32>
    %c0_5 = arith.constant 0 : index
    %c1 = arith.constant 1 : index
    %c0_6 = arith.constant 0 : index
    %5 = vector.load %arg1[%c0_5, %c1, %c0_6] : memref<1x110x8xbf16, #tpu.memory_space<vmem>>, vector<1x80x8xbf16>
    %6 = vector.shape_cast %5 : vector<1x80x8xbf16> to vector<80x8xbf16>
    %c1_7 = arith.constant 1 : index
    %c0_8 = arith.constant 0 : index
    %c0_9 = arith.constant 0 : index
    %7 = vector.load %arg2[%c1_7, %c0_8, %c0_9] : memref<9x8x8xbf16, #tpu.memory_space<vmem>>, vector<1x8x8xbf16>
    %8 = vector.shape_cast %7 : vector<1x8x8xbf16> to vector<8x8xbf16>
    %cst_10 = arith.constant dense<0.000000e+00> : vector<80x8xf32>
    %9 = tpu.matmul %6, %8, %cst_10 {dimension_numbers = #tpu.dot_dimension_numbers<[1], [0], [0], [1], [0, 0, 1, 1], [], []>} : vector<80x8xbf16>, vector<8x8xbf16>, vector<80x8xf32> -> vector<80x8xf32>
    %10 = arith.addf %4, %9 : vector<80x8xf32>
    %c0_11 = arith.constant 0 : index
    %c2 = arith.constant 2 : index
    %c0_12 = arith.constant 0 : index
    %11 = vector.load %arg1[%c0_11, %c2, %c0_12] : memref<1x110x8xbf16, #tpu.memory_space<vmem>>, vector<1x80x8xbf16>
    %12 = vector.shape_cast %11 : vector<1x80x8xbf16> to vector<80x8xbf16>
    %c2_13 = arith.constant 2 : index
    %c0_14 = arith.constant 0 : index
    %c0_15 = arith.constant 0 : index
    %13 = vector.load %arg2[%c2_13, %c0_14, %c0_15] : memref<9x8x8xbf16, #tpu.memory_space<vmem>>, vector<1x8x8xbf16>
    %14 = vector.shape_cast %13 : vector<1x8x8xbf16> to vector<8x8xbf16>
    %cst_16 = arith.constant dense<0.000000e+00> : vector<80x8xf32>
    %15 = tpu.matmul %12, %14, %cst_16 {dimension_numbers = #tpu.dot_dimension_numbers<[1], [0], [0], [1], [0, 0, 1, 1], [], []>} : vector<80x8xbf16>, vector<8x8xbf16>, vector<80x8xf32> -> vector<80x8xf32>
    %16 = arith.addf %10, %15 : vector<80x8xf32>
    %c0_17 = arith.constant 0 : index
    %c10 = arith.constant 10 : index
    %c0_18 = arith.constant 0 : index
    %17 = vector.load %arg1[%c0_17, %c10, %c0_18] : memref<1x110x8xbf16, #tpu.memory_space<vmem>>, vector<1x80x8xbf16>
    %18 = vector.shape_cast %17 : vector<1x80x8xbf16> to vector<80x8xbf16>
    %c3 = arith.constant 3 : index
    %c0_19 = arith.constant 0 : index
    %c0_20 = arith.constant 0 : index
    %19 = vector.load %arg2[%c3, %c0_19, %c0_20] : memref<9x8x8xbf16, #tpu.memory_space<vmem>>, vector<1x8x8xbf16>
    %20 = vector.shape_cast %19 : vector<1x8x8xbf16> to vector<8x8xbf16>
    %cst_21 = arith.constant dense<0.000000e+00> : vector<80x8xf32>
    %21 = tpu.matmul %18, %20, %cst_21 {dimension_numbers = #tpu.dot_dimension_numbers<[1], [0], [0], [1], [0, 0, 1, 1], [], []>} : vector<80x8xbf16>, vector<8x8xbf16>, vector<80x8xf32> -> vector<80x8xf32>
    %22 = arith.addf %16, %21 : vector<80x8xf32>
    %c0_22 = arith.constant 0 : index
    %c11 = arith.constant 11 : index
    %c0_23 = arith.constant 0 : index
    %23 = vector.load %arg1[%c0_22, %c11, %c0_23] : memref<1x110x8xbf16, #tpu.memory_space<vmem>>, vector<1x80x8xbf16>
    %24 = vector.shape_cast %23 : vector<1x80x8xbf16> to vector<80x8xbf16>
    %c4 = arith.constant 4 : index
    %c0_24 = arith.constant 0 : index
    %c0_25 = arith.constant 0 : index
    %25 = vector.load %arg2[%c4, %c0_24, %c0_25] : memref<9x8x8xbf16, #tpu.memory_space<vmem>>, vector<1x8x8xbf16>
    %26 = vector.shape_cast %25 : vector<1x8x8xbf16> to vector<8x8xbf16>
    %cst_26 = arith.constant dense<0.000000e+00> : vector<80x8xf32>
    %27 = tpu.matmul %24, %26, %cst_26 {dimension_numbers = #tpu.dot_dimension_numbers<[1], [0], [0], [1], [0, 0, 1, 1], [], []>} : vector<80x8xbf16>, vector<8x8xbf16>, vector<80x8xf32> -> vector<80x8xf32>
    %28 = arith.addf %22, %27 : vector<80x8xf32>
    %c0_27 = arith.constant 0 : index
    %c12 = arith.constant 12 : index
    %c0_28 = arith.constant 0 : index
    %29 = vector.load %arg1[%c0_27, %c12, %c0_28] : memref<1x110x8xbf16, #tpu.memory_space<vmem>>, vector<1x80x8xbf16>
    %30 = vector.shape_cast %29 : vector<1x80x8xbf16> to vector<80x8xbf16>
    %c5 = arith.constant 5 : index
    %c0_29 = arith.constant 0 : index
    %c0_30 = arith.constant 0 : index
    %31 = vector.load %arg2[%c5, %c0_29, %c0_30] : memref<9x8x8xbf16, #tpu.memory_space<vmem>>, vector<1x8x8xbf16>
    %32 = vector.shape_cast %31 : vector<1x8x8xbf16> to vector<8x8xbf16>
    %cst_31 = arith.constant dense<0.000000e+00> : vector<80x8xf32>
    %33 = tpu.matmul %30, %32, %cst_31 {dimension_numbers = #tpu.dot_dimension_numbers<[1], [0], [0], [1], [0, 0, 1, 1], [], []>} : vector<80x8xbf16>, vector<8x8xbf16>, vector<80x8xf32> -> vector<80x8xf32>
    %34 = arith.addf %28, %33 : vector<80x8xf32>
    %c0_32 = arith.constant 0 : index
    %c20 = arith.constant 20 : index
    %c0_33 = arith.constant 0 : index
    %35 = vector.load %arg1[%c0_32, %c20, %c0_33] : memref<1x110x8xbf16, #tpu.memory_space<vmem>>, vector<1x80x8xbf16>
    %36 = vector.shape_cast %35 : vector<1x80x8xbf16> to vector<80x8xbf16>
    %c6 = arith.constant 6 : index
    %c0_34 = arith.constant 0 : index
    %c0_35 = arith.constant 0 : index
    %37 = vector.load %arg2[%c6, %c0_34, %c0_35] : memref<9x8x8xbf16, #tpu.memory_space<vmem>>, vector<1x8x8xbf16>
    %38 = vector.shape_cast %37 : vector<1x8x8xbf16> to vector<8x8xbf16>
    %cst_36 = arith.constant dense<0.000000e+00> : vector<80x8xf32>
    %39 = tpu.matmul %36, %38, %cst_36 {dimension_numbers = #tpu.dot_dimension_numbers<[1], [0], [0], [1], [0, 0, 1, 1], [], []>} : vector<80x8xbf16>, vector<8x8xbf16>, vector<80x8xf32> -> vector<80x8xf32>
    %40 = arith.addf %34, %39 : vector<80x8xf32>
    %c0_37 = arith.constant 0 : index
    %c21 = arith.constant 21 : index
    %c0_38 = arith.constant 0 : index
    %41 = vector.load %arg1[%c0_37, %c21, %c0_38] : memref<1x110x8xbf16, #tpu.memory_space<vmem>>, vector<1x80x8xbf16>
    %42 = vector.shape_cast %41 : vector<1x80x8xbf16> to vector<80x8xbf16>
    %c7 = arith.constant 7 : index
    %c0_39 = arith.constant 0 : index
    %c0_40 = arith.constant 0 : index
    %43 = vector.load %arg2[%c7, %c0_39, %c0_40] : memref<9x8x8xbf16, #tpu.memory_space<vmem>>, vector<1x8x8xbf16>
    %44 = vector.shape_cast %43 : vector<1x8x8xbf16> to vector<8x8xbf16>
    %cst_41 = arith.constant dense<0.000000e+00> : vector<80x8xf32>
    %45 = tpu.matmul %42, %44, %cst_41 {dimension_numbers = #tpu.dot_dimension_numbers<[1], [0], [0], [1], [0, 0, 1, 1], [], []>} : vector<80x8xbf16>, vector<8x8xbf16>, vector<80x8xf32> -> vector<80x8xf32>
    %46 = arith.addf %40, %45 : vector<80x8xf32>
    %c0_42 = arith.constant 0 : index
    %c22 = arith.constant 22 : index
    %c0_43 = arith.constant 0 : index
    %47 = vector.load %arg1[%c0_42, %c22, %c0_43] : memref<1x110x8xbf16, #tpu.memory_space<vmem>>, vector<1x80x8xbf16>
    %48 = vector.shape_cast %47 : vector<1x80x8xbf16> to vector<80x8xbf16>
    %c8 = arith.constant 8 : index
    %c0_44 = arith.constant 0 : index
    %c0_45 = arith.constant 0 : index
    %49 = vector.load %arg2[%c8, %c0_44, %c0_45] : memref<9x8x8xbf16, #tpu.memory_space<vmem>>, vector<1x8x8xbf16>
    %50 = vector.shape_cast %49 : vector<1x8x8xbf16> to vector<8x8xbf16>
    %cst_46 = arith.constant dense<0.000000e+00> : vector<80x8xf32>
    %51 = tpu.matmul %48, %50, %cst_46 {dimension_numbers = #tpu.dot_dimension_numbers<[1], [0], [0], [1], [0, 0, 1, 1], [], []>} : vector<80x8xbf16>, vector<8x8xbf16>, vector<80x8xf32> -> vector<80x8xf32>
    %52 = arith.addf %46, %51 : vector<80x8xf32>
    %c0_47 = arith.constant 0 : index
    %c0_48 = arith.constant 0 : index
    %53 = vector.load %arg3[%c0_47, %c0_48] : memref<1x8xf32, #tpu.memory_space<vmem>>, vector<1x8xf32>
    %54 = vector.broadcast %53 : vector<1x8xf32> to vector<80x8xf32>
    %55 = arith.addf %52, %54 : vector<80x8xf32>
    %cst_49 = arith.constant 0.000000e+00 : f32
    %56 = vector.broadcast %cst_49 : f32 to vector<80x8xf32>
    %57 = arith.cmpf oge, %55, %56 : vector<80x8xf32>
    %cst_50 = arith.constant 0.00999999977 : f32
    %58 = vector.broadcast %cst_50 : f32 to vector<80x8xf32>
    %59 = arith.mulf %58, %55 : vector<80x8xf32>
    %60 = arith.select %57, %55, %59 : vector<80x8xi1>, vector<80x8xf32>
    %61 = arith.truncf %60 : vector<80x8xf32> to vector<80x8xbf16>
    %c0_51 = arith.constant 0 : index
    %c0_52 = arith.constant 0 : index
    %c0_53 = arith.constant 0 : index
    %62 = vector.load %arg4[%c0_51, %c0_52, %c0_53] : memref<1x80x8xbf16, #tpu.memory_space<vmem>>, vector<1x80x8xbf16>
    %63 = vector.shape_cast %62 : vector<1x80x8xbf16> to vector<80x8xbf16>
    %64 = vector.shape_cast %61 : vector<80x8xbf16> to vector<1x80x8xbf16>
    tpu.vector_store %arg4[%c0_51, %c0_52, %c0_53], %64 {strides = array<i32>} : memref<1x80x8xbf16, #tpu.memory_space<vmem>>, vector<1x80x8xbf16>,
    return
  }
  func.func @transform_0(%arg0: i32) -> (i32, i32, i32) {
    %c0_i32 = arith.constant 0 : i32
    %c0_i32_0 = arith.constant 0 : i32
    %c0_i32_1 = arith.constant 0 : i32
    return %arg0, %c0_i32, %c0_i32_0 : i32, i32, i32
  }
  func.func @transform_1(%arg0: i32) -> (i32, i32, i32) {
    %c0_i32 = arith.constant 0 : i32
    %c0_i32_0 = arith.constant 0 : i32
    %c0_i32_1 = arith.constant 0 : i32
    %c0_i32_2 = arith.constant 0 : i32
    return %c0_i32, %c0_i32_0, %c0_i32_1 : i32, i32, i32
  }
  func.func @transform_2(%arg0: i32) -> (i32, i32) {
    %c0_i32 = arith.constant 0 : i32
    %c0_i32_0 = arith.constant 0 : i32
    %c0_i32_1 = arith.constant 0 : i32
    return %c0_i32, %c0_i32_0 : i32, i32
  }
  func.func @transform_3(%arg0: i32) -> (i32, i32, i32) {
    %c0_i32 = arith.constant 0 : i32
    %c0_i32_0 = arith.constant 0 : i32
    %c0_i32_1 = arith.constant 0 : i32
    return %arg0, %c0_i32, %c0_i32_0 : i32, i32, i32
  }
}

module attributes {stable_mosaic.version = 11 : i64} {
  func.func @_tap_matmul_kernel(%arg0: i32, %arg1: memref<1x30x32xbf16, #tpu.memory_space<vmem>>, %arg2: memref<4x32x16xbf16, #tpu.memory_space<vmem>>, %arg3: memref<1x16xf32, #tpu.memory_space<vmem>>, %arg4: memref<1x20x16xbf16, #tpu.memory_space<vmem>>) attributes {dimension_semantics = [#tpu.dimension_semantics<parallel>], iteration_bounds = array<i64: 2>, scalar_prefetch = 0 : i64, scratch_operands = 0 : i64, tpu.core_type = #tpu.core_type<tc>, window_params = [{transform_indices = @transform_0, window_bounds = array<i64: 1, 30, 32>}, {pipeline_mode = #tpu.pipeline_mode<synchronous>, transform_indices = @transform_1, window_bounds = array<i64: 4, 32, 16>}, {pipeline_mode = #tpu.pipeline_mode<synchronous>, transform_indices = @transform_2, window_bounds = array<i64: 1, 16>}, {transform_indices = @transform_3, window_bounds = array<i64: 1, 20, 16>}]} {
    %c0 = arith.constant 0 : index
    %c0_0 = arith.constant 0 : index
    %c0_1 = arith.constant 0 : index
    %0 = vector.load %arg1[%c0, %c0_0, %c0_1] : memref<1x30x32xbf16, #tpu.memory_space<vmem>>, vector<1x20x32xbf16>
    %1 = vector.shape_cast %0 : vector<1x20x32xbf16> to vector<20x32xbf16>
    %c0_2 = arith.constant 0 : index
    %c0_3 = arith.constant 0 : index
    %c0_4 = arith.constant 0 : index
    %2 = vector.load %arg2[%c0_2, %c0_3, %c0_4] : memref<4x32x16xbf16, #tpu.memory_space<vmem>>, vector<1x32x16xbf16>
    %3 = vector.shape_cast %2 : vector<1x32x16xbf16> to vector<32x16xbf16>
    %cst = arith.constant dense<0.000000e+00> : vector<20x16xf32>
    %4 = tpu.matmul %1, %3, %cst {dimension_numbers = #tpu.dot_dimension_numbers<[1], [0], [0], [1], [0, 0, 1, 1], [], []>} : vector<20x32xbf16>, vector<32x16xbf16>, vector<20x16xf32> -> vector<20x16xf32>
    %c0_5 = arith.constant 0 : index
    %c1 = arith.constant 1 : index
    %c0_6 = arith.constant 0 : index
    %5 = vector.load %arg1[%c0_5, %c1, %c0_6] : memref<1x30x32xbf16, #tpu.memory_space<vmem>>, vector<1x20x32xbf16>
    %6 = vector.shape_cast %5 : vector<1x20x32xbf16> to vector<20x32xbf16>
    %c1_7 = arith.constant 1 : index
    %c0_8 = arith.constant 0 : index
    %c0_9 = arith.constant 0 : index
    %7 = vector.load %arg2[%c1_7, %c0_8, %c0_9] : memref<4x32x16xbf16, #tpu.memory_space<vmem>>, vector<1x32x16xbf16>
    %8 = vector.shape_cast %7 : vector<1x32x16xbf16> to vector<32x16xbf16>
    %cst_10 = arith.constant dense<0.000000e+00> : vector<20x16xf32>
    %9 = tpu.matmul %6, %8, %cst_10 {dimension_numbers = #tpu.dot_dimension_numbers<[1], [0], [0], [1], [0, 0, 1, 1], [], []>} : vector<20x32xbf16>, vector<32x16xbf16>, vector<20x16xf32> -> vector<20x16xf32>
    %10 = arith.addf %4, %9 : vector<20x16xf32>
    %c0_11 = arith.constant 0 : index
    %c5 = arith.constant 5 : index
    %c0_12 = arith.constant 0 : index
    %11 = vector.load %arg1[%c0_11, %c5, %c0_12] : memref<1x30x32xbf16, #tpu.memory_space<vmem>>, vector<1x20x32xbf16>
    %12 = vector.shape_cast %11 : vector<1x20x32xbf16> to vector<20x32xbf16>
    %c2 = arith.constant 2 : index
    %c0_13 = arith.constant 0 : index
    %c0_14 = arith.constant 0 : index
    %13 = vector.load %arg2[%c2, %c0_13, %c0_14] : memref<4x32x16xbf16, #tpu.memory_space<vmem>>, vector<1x32x16xbf16>
    %14 = vector.shape_cast %13 : vector<1x32x16xbf16> to vector<32x16xbf16>
    %cst_15 = arith.constant dense<0.000000e+00> : vector<20x16xf32>
    %15 = tpu.matmul %12, %14, %cst_15 {dimension_numbers = #tpu.dot_dimension_numbers<[1], [0], [0], [1], [0, 0, 1, 1], [], []>} : vector<20x32xbf16>, vector<32x16xbf16>, vector<20x16xf32> -> vector<20x16xf32>
    %16 = arith.addf %10, %15 : vector<20x16xf32>
    %c0_16 = arith.constant 0 : index
    %c6 = arith.constant 6 : index
    %c0_17 = arith.constant 0 : index
    %17 = vector.load %arg1[%c0_16, %c6, %c0_17] : memref<1x30x32xbf16, #tpu.memory_space<vmem>>, vector<1x20x32xbf16>
    %18 = vector.shape_cast %17 : vector<1x20x32xbf16> to vector<20x32xbf16>
    %c3 = arith.constant 3 : index
    %c0_18 = arith.constant 0 : index
    %c0_19 = arith.constant 0 : index
    %19 = vector.load %arg2[%c3, %c0_18, %c0_19] : memref<4x32x16xbf16, #tpu.memory_space<vmem>>, vector<1x32x16xbf16>
    %20 = vector.shape_cast %19 : vector<1x32x16xbf16> to vector<32x16xbf16>
    %cst_20 = arith.constant dense<0.000000e+00> : vector<20x16xf32>
    %21 = tpu.matmul %18, %20, %cst_20 {dimension_numbers = #tpu.dot_dimension_numbers<[1], [0], [0], [1], [0, 0, 1, 1], [], []>} : vector<20x32xbf16>, vector<32x16xbf16>, vector<20x16xf32> -> vector<20x16xf32>
    %22 = arith.addf %16, %21 : vector<20x16xf32>
    %c0_21 = arith.constant 0 : index
    %c0_22 = arith.constant 0 : index
    %23 = vector.load %arg3[%c0_21, %c0_22] : memref<1x16xf32, #tpu.memory_space<vmem>>, vector<1x16xf32>
    %24 = vector.broadcast %23 : vector<1x16xf32> to vector<20x16xf32>
    %25 = arith.addf %22, %24 : vector<20x16xf32>
    %cst_23 = arith.constant 0.000000e+00 : f32
    %26 = vector.broadcast %cst_23 : f32 to vector<20x16xf32>
    %27 = arith.cmpf oge, %25, %26 : vector<20x16xf32>
    %cst_24 = arith.constant 0.00999999977 : f32
    %28 = vector.broadcast %cst_24 : f32 to vector<20x16xf32>
    %29 = arith.mulf %28, %25 : vector<20x16xf32>
    %30 = arith.select %27, %25, %29 : vector<20x16xi1>, vector<20x16xf32>
    %31 = arith.truncf %30 : vector<20x16xf32> to vector<20x16xbf16>
    %c0_25 = arith.constant 0 : index
    %c0_26 = arith.constant 0 : index
    %c0_27 = arith.constant 0 : index
    %32 = vector.load %arg4[%c0_25, %c0_26, %c0_27] : memref<1x20x16xbf16, #tpu.memory_space<vmem>>, vector<1x20x16xbf16>
    %33 = vector.shape_cast %32 : vector<1x20x16xbf16> to vector<20x16xbf16>
    %34 = vector.shape_cast %31 : vector<20x16xbf16> to vector<1x20x16xbf16>
    tpu.vector_store %arg4[%c0_25, %c0_26, %c0_27], %34 {strides = array<i32>} : memref<1x20x16xbf16, #tpu.memory_space<vmem>>, vector<1x20x16xbf16>,
    return
  }
  func.func @transform_0(%arg0: i32) -> (i32, i32, i32) {
    %c0_i32 = arith.constant 0 : i32
    %c0_i32_0 = arith.constant 0 : i32
    %c0_i32_1 = arith.constant 0 : i32
    return %arg0, %c0_i32, %c0_i32_0 : i32, i32, i32
  }
  func.func @transform_1(%arg0: i32) -> (i32, i32, i32) {
    %c0_i32 = arith.constant 0 : i32
    %c0_i32_0 = arith.constant 0 : i32
    %c0_i32_1 = arith.constant 0 : i32
    %c0_i32_2 = arith.constant 0 : i32
    return %c0_i32, %c0_i32_0, %c0_i32_1 : i32, i32, i32
  }
  func.func @transform_2(%arg0: i32) -> (i32, i32) {
    %c0_i32 = arith.constant 0 : i32
    %c0_i32_0 = arith.constant 0 : i32
    %c0_i32_1 = arith.constant 0 : i32
    return %c0_i32, %c0_i32_0 : i32, i32
  }
  func.func @transform_3(%arg0: i32) -> (i32, i32, i32) {
    %c0_i32 = arith.constant 0 : i32
    %c0_i32_0 = arith.constant 0 : i32
    %c0_i32_1 = arith.constant 0 : i32
    return %arg0, %c0_i32, %c0_i32_0 : i32, i32, i32
  }
}

module attributes {stable_mosaic.version = 11 : i64} {
  func.func @_tap_matmul_kernel(%arg0: i32, %arg1: memref<1x2x384xbf16, #tpu.memory_space<vmem>>, %arg2: memref<1x384x16xbf16, #tpu.memory_space<vmem>>, %arg3: memref<1x16xf32, #tpu.memory_space<vmem>>, %arg4: memref<1x2x16xf32, #tpu.memory_space<vmem>>) attributes {dimension_semantics = [#tpu.dimension_semantics<parallel>], iteration_bounds = array<i64: 1>, scalar_prefetch = 0 : i64, scratch_operands = 0 : i64, tpu.core_type = #tpu.core_type<tc>, window_params = [{transform_indices = @transform_0, window_bounds = array<i64: 1, 2, 384>}, {pipeline_mode = #tpu.pipeline_mode<synchronous>, transform_indices = @transform_1, window_bounds = array<i64: 1, 384, 16>}, {pipeline_mode = #tpu.pipeline_mode<synchronous>, transform_indices = @transform_2, window_bounds = array<i64: 1, 16>}, {transform_indices = @transform_3, window_bounds = array<i64: 1, 2, 16>}]} {
    %c0 = arith.constant 0 : index
    %c0_0 = arith.constant 0 : index
    %c0_1 = arith.constant 0 : index
    %0 = vector.load %arg1[%c0, %c0_0, %c0_1] : memref<1x2x384xbf16, #tpu.memory_space<vmem>>, vector<1x2x384xbf16>
    %1 = vector.shape_cast %0 : vector<1x2x384xbf16> to vector<2x384xbf16>
    %c0_2 = arith.constant 0 : index
    %c0_3 = arith.constant 0 : index
    %c0_4 = arith.constant 0 : index
    %2 = vector.load %arg2[%c0_2, %c0_3, %c0_4] : memref<1x384x16xbf16, #tpu.memory_space<vmem>>, vector<1x384x16xbf16>
    %3 = vector.shape_cast %2 : vector<1x384x16xbf16> to vector<384x16xbf16>
    %cst = arith.constant dense<0.000000e+00> : vector<2x16xf32>
    %4 = tpu.matmul %1, %3, %cst {dimension_numbers = #tpu.dot_dimension_numbers<[1], [0], [0], [1], [0, 0, 1, 1], [], []>} : vector<2x384xbf16>, vector<384x16xbf16>, vector<2x16xf32> -> vector<2x16xf32>
    %c0_5 = arith.constant 0 : index
    %c0_6 = arith.constant 0 : index
    %5 = vector.load %arg3[%c0_5, %c0_6] : memref<1x16xf32, #tpu.memory_space<vmem>>, vector<1x16xf32>
    %6 = vector.broadcast %5 : vector<1x16xf32> to vector<2x16xf32>
    %7 = arith.addf %4, %6 : vector<2x16xf32>
    %c0_7 = arith.constant 0 : index
    %c0_8 = arith.constant 0 : index
    %c0_9 = arith.constant 0 : index
    %8 = vector.load %arg4[%c0_7, %c0_8, %c0_9] : memref<1x2x16xf32, #tpu.memory_space<vmem>>, vector<1x2x16xf32>
    %9 = vector.shape_cast %8 : vector<1x2x16xf32> to vector<2x16xf32>
    %10 = vector.shape_cast %7 : vector<2x16xf32> to vector<1x2x16xf32>
    tpu.vector_store %arg4[%c0_7, %c0_8, %c0_9], %10 {strides = array<i32>} : memref<1x2x16xf32, #tpu.memory_space<vmem>>, vector<1x2x16xf32>,
    return
  }
  func.func @transform_0(%arg0: i32) -> (i32, i32, i32) {
    %c0_i32 = arith.constant 0 : i32
    %c0_i32_0 = arith.constant 0 : i32
    %c0_i32_1 = arith.constant 0 : i32
    return %arg0, %c0_i32, %c0_i32_0 : i32, i32, i32
  }
  func.func @transform_1(%arg0: i32) -> (i32, i32, i32) {
    %c0_i32 = arith.constant 0 : i32
    %c0_i32_0 = arith.constant 0 : i32
    %c0_i32_1 = arith.constant 0 : i32
    %c0_i32_2 = arith.constant 0 : i32
    return %c0_i32, %c0_i32_0, %c0_i32_1 : i32, i32, i32
  }
  func.func @transform_2(%arg0: i32) -> (i32, i32) {
    %c0_i32 = arith.constant 0 : i32
    %c0_i32_0 = arith.constant 0 : i32
    %c0_i32_1 = arith.constant 0 : i32
    return %c0_i32, %c0_i32_0 : i32, i32
  }
  func.func @transform_3(%arg0: i32) -> (i32, i32, i32) {
    %c0_i32 = arith.constant 0 : i32
    %c0_i32_0 = arith.constant 0 : i32
    %c0_i32_1 = arith.constant 0 : i32
    return %arg0, %c0_i32, %c0_i32_0 : i32, i32, i32
  }
}

module attributes {stable_mosaic.version = 11 : i64} {
  func.func @_tap_matmul_kernel(%arg0: i32, %arg1: memref<1x42x16xbf16, #tpu.memory_space<vmem>>, %arg2: memref<9x16x16xbf16, #tpu.memory_space<vmem>>, %arg3: memref<1x16xf32, #tpu.memory_space<vmem>>, %arg4: memref<1x24x16xbf16, #tpu.memory_space<vmem>>) attributes {dimension_semantics = [#tpu.dimension_semantics<parallel>], iteration_bounds = array<i64: 2>, scalar_prefetch = 0 : i64, scratch_operands = 0 : i64, tpu.core_type = #tpu.core_type<tc>, window_params = [{transform_indices = @transform_0, window_bounds = array<i64: 1, 42, 16>}, {pipeline_mode = #tpu.pipeline_mode<synchronous>, transform_indices = @transform_1, window_bounds = array<i64: 9, 16, 16>}, {pipeline_mode = #tpu.pipeline_mode<synchronous>, transform_indices = @transform_2, window_bounds = array<i64: 1, 16>}, {transform_indices = @transform_3, window_bounds = array<i64: 1, 24, 16>}]} {
    %c0 = arith.constant 0 : index
    %c0_0 = arith.constant 0 : index
    %c0_1 = arith.constant 0 : index
    %0 = vector.load %arg1[%c0, %c0_0, %c0_1] : memref<1x42x16xbf16, #tpu.memory_space<vmem>>, vector<1x24x16xbf16>
    %1 = vector.shape_cast %0 : vector<1x24x16xbf16> to vector<24x16xbf16>
    %c0_2 = arith.constant 0 : index
    %c0_3 = arith.constant 0 : index
    %c0_4 = arith.constant 0 : index
    %2 = vector.load %arg2[%c0_2, %c0_3, %c0_4] : memref<9x16x16xbf16, #tpu.memory_space<vmem>>, vector<1x16x16xbf16>
    %3 = vector.shape_cast %2 : vector<1x16x16xbf16> to vector<16x16xbf16>
    %cst = arith.constant dense<0.000000e+00> : vector<24x16xf32>
    %4 = tpu.matmul %1, %3, %cst {dimension_numbers = #tpu.dot_dimension_numbers<[1], [0], [0], [1], [0, 0, 1, 1], [], []>} : vector<24x16xbf16>, vector<16x16xbf16>, vector<24x16xf32> -> vector<24x16xf32>
    %c0_5 = arith.constant 0 : index
    %c1 = arith.constant 1 : index
    %c0_6 = arith.constant 0 : index
    %5 = vector.load %arg1[%c0_5, %c1, %c0_6] : memref<1x42x16xbf16, #tpu.memory_space<vmem>>, vector<1x24x16xbf16>
    %6 = vector.shape_cast %5 : vector<1x24x16xbf16> to vector<24x16xbf16>
    %c1_7 = arith.constant 1 : index
    %c0_8 = arith.constant 0 : index
    %c0_9 = arith.constant 0 : index
    %7 = vector.load %arg2[%c1_7, %c0_8, %c0_9] : memref<9x16x16xbf16, #tpu.memory_space<vmem>>, vector<1x16x16xbf16>
    %8 = vector.shape_cast %7 : vector<1x16x16xbf16> to vector<16x16xbf16>
    %cst_10 = arith.constant dense<0.000000e+00> : vector<24x16xf32>
    %9 = tpu.matmul %6, %8, %cst_10 {dimension_numbers = #tpu.dot_dimension_numbers<[1], [0], [0], [1], [0, 0, 1, 1], [], []>} : vector<24x16xbf16>, vector<16x16xbf16>, vector<24x16xf32> -> vector<24x16xf32>
    %10 = arith.addf %4, %9 : vector<24x16xf32>
    %c0_11 = arith.constant 0 : index
    %c2 = arith.constant 2 : index
    %c0_12 = arith.constant 0 : index
    %11 = vector.load %arg1[%c0_11, %c2, %c0_12] : memref<1x42x16xbf16, #tpu.memory_space<vmem>>, vector<1x24x16xbf16>
    %12 = vector.shape_cast %11 : vector<1x24x16xbf16> to vector<24x16xbf16>
    %c2_13 = arith.constant 2 : index
    %c0_14 = arith.constant 0 : index
    %c0_15 = arith.constant 0 : index
    %13 = vector.load %arg2[%c2_13, %c0_14, %c0_15] : memref<9x16x16xbf16, #tpu.memory_space<vmem>>, vector<1x16x16xbf16>
    %14 = vector.shape_cast %13 : vector<1x16x16xbf16> to vector<16x16xbf16>
    %cst_16 = arith.constant dense<0.000000e+00> : vector<24x16xf32>
    %15 = tpu.matmul %12, %14, %cst_16 {dimension_numbers = #tpu.dot_dimension_numbers<[1], [0], [0], [1], [0, 0, 1, 1], [], []>} : vector<24x16xbf16>, vector<16x16xbf16>, vector<24x16xf32> -> vector<24x16xf32>
    %16 = arith.addf %10, %15 : vector<24x16xf32>
    %c0_17 = arith.constant 0 : index
    %c6 = arith.constant 6 : index
    %c0_18 = arith.constant 0 : index
    %17 = vector.load %arg1[%c0_17, %c6, %c0_18] : memref<1x42x16xbf16, #tpu.memory_space<vmem>>, vector<1x24x16xbf16>
    %18 = vector.shape_cast %17 : vector<1x24x16xbf16> to vector<24x16xbf16>
    %c3 = arith.constant 3 : index
    %c0_19 = arith.constant 0 : index
    %c0_20 = arith.constant 0 : index
    %19 = vector.load %arg2[%c3, %c0_19, %c0_20] : memref<9x16x16xbf16, #tpu.memory_space<vmem>>, vector<1x16x16xbf16>
    %20 = vector.shape_cast %19 : vector<1x16x16xbf16> to vector<16x16xbf16>
    %cst_21 = arith.constant dense<0.000000e+00> : vector<24x16xf32>
    %21 = tpu.matmul %18, %20, %cst_21 {dimension_numbers = #tpu.dot_dimension_numbers<[1], [0], [0], [1], [0, 0, 1, 1], [], []>} : vector<24x16xbf16>, vector<16x16xbf16>, vector<24x16xf32> -> vector<24x16xf32>
    %22 = arith.addf %16, %21 : vector<24x16xf32>
    %c0_22 = arith.constant 0 : index
    %c7 = arith.constant 7 : index
    %c0_23 = arith.constant 0 : index
    %23 = vector.load %arg1[%c0_22, %c7, %c0_23] : memref<1x42x16xbf16, #tpu.memory_space<vmem>>, vector<1x24x16xbf16>
    %24 = vector.shape_cast %23 : vector<1x24x16xbf16> to vector<24x16xbf16>
    %c4 = arith.constant 4 : index
    %c0_24 = arith.constant 0 : index
    %c0_25 = arith.constant 0 : index
    %25 = vector.load %arg2[%c4, %c0_24, %c0_25] : memref<9x16x16xbf16, #tpu.memory_space<vmem>>, vector<1x16x16xbf16>
    %26 = vector.shape_cast %25 : vector<1x16x16xbf16> to vector<16x16xbf16>
    %cst_26 = arith.constant dense<0.000000e+00> : vector<24x16xf32>
    %27 = tpu.matmul %24, %26, %cst_26 {dimension_numbers = #tpu.dot_dimension_numbers<[1], [0], [0], [1], [0, 0, 1, 1], [], []>} : vector<24x16xbf16>, vector<16x16xbf16>, vector<24x16xf32> -> vector<24x16xf32>
    %28 = arith.addf %22, %27 : vector<24x16xf32>
    %c0_27 = arith.constant 0 : index
    %c8 = arith.constant 8 : index
    %c0_28 = arith.constant 0 : index
    %29 = vector.load %arg1[%c0_27, %c8, %c0_28] : memref<1x42x16xbf16, #tpu.memory_space<vmem>>, vector<1x24x16xbf16>
    %30 = vector.shape_cast %29 : vector<1x24x16xbf16> to vector<24x16xbf16>
    %c5 = arith.constant 5 : index
    %c0_29 = arith.constant 0 : index
    %c0_30 = arith.constant 0 : index
    %31 = vector.load %arg2[%c5, %c0_29, %c0_30] : memref<9x16x16xbf16, #tpu.memory_space<vmem>>, vector<1x16x16xbf16>
    %32 = vector.shape_cast %31 : vector<1x16x16xbf16> to vector<16x16xbf16>
    %cst_31 = arith.constant dense<0.000000e+00> : vector<24x16xf32>
    %33 = tpu.matmul %30, %32, %cst_31 {dimension_numbers = #tpu.dot_dimension_numbers<[1], [0], [0], [1], [0, 0, 1, 1], [], []>} : vector<24x16xbf16>, vector<16x16xbf16>, vector<24x16xf32> -> vector<24x16xf32>
    %34 = arith.addf %28, %33 : vector<24x16xf32>
    %c0_32 = arith.constant 0 : index
    %c12 = arith.constant 12 : index
    %c0_33 = arith.constant 0 : index
    %35 = vector.load %arg1[%c0_32, %c12, %c0_33] : memref<1x42x16xbf16, #tpu.memory_space<vmem>>, vector<1x24x16xbf16>
    %36 = vector.shape_cast %35 : vector<1x24x16xbf16> to vector<24x16xbf16>
    %c6_34 = arith.constant 6 : index
    %c0_35 = arith.constant 0 : index
    %c0_36 = arith.constant 0 : index
    %37 = vector.load %arg2[%c6_34, %c0_35, %c0_36] : memref<9x16x16xbf16, #tpu.memory_space<vmem>>, vector<1x16x16xbf16>
    %38 = vector.shape_cast %37 : vector<1x16x16xbf16> to vector<16x16xbf16>
    %cst_37 = arith.constant dense<0.000000e+00> : vector<24x16xf32>
    %39 = tpu.matmul %36, %38, %cst_37 {dimension_numbers = #tpu.dot_dimension_numbers<[1], [0], [0], [1], [0, 0, 1, 1], [], []>} : vector<24x16xbf16>, vector<16x16xbf16>, vector<24x16xf32> -> vector<24x16xf32>
    %40 = arith.addf %34, %39 : vector<24x16xf32>
    %c0_38 = arith.constant 0 : index
    %c13 = arith.constant 13 : index
    %c0_39 = arith.constant 0 : index
    %41 = vector.load %arg1[%c0_38, %c13, %c0_39] : memref<1x42x16xbf16, #tpu.memory_space<vmem>>, vector<1x24x16xbf16>
    %42 = vector.shape_cast %41 : vector<1x24x16xbf16> to vector<24x16xbf16>
    %c7_40 = arith.constant 7 : index
    %c0_41 = arith.constant 0 : index
    %c0_42 = arith.constant 0 : index
    %43 = vector.load %arg2[%c7_40, %c0_41, %c0_42] : memref<9x16x16xbf16, #tpu.memory_space<vmem>>, vector<1x16x16xbf16>
    %44 = vector.shape_cast %43 : vector<1x16x16xbf16> to vector<16x16xbf16>
    %cst_43 = arith.constant dense<0.000000e+00> : vector<24x16xf32>
    %45 = tpu.matmul %42, %44, %cst_43 {dimension_numbers = #tpu.dot_dimension_numbers<[1], [0], [0], [1], [0, 0, 1, 1], [], []>} : vector<24x16xbf16>, vector<16x16xbf16>, vector<24x16xf32> -> vector<24x16xf32>
    %46 = arith.addf %40, %45 : vector<24x16xf32>
    %c0_44 = arith.constant 0 : index
    %c14 = arith.constant 14 : index
    %c0_45 = arith.constant 0 : index
    %47 = vector.load %arg1[%c0_44, %c14, %c0_45] : memref<1x42x16xbf16, #tpu.memory_space<vmem>>, vector<1x24x16xbf16>
    %48 = vector.shape_cast %47 : vector<1x24x16xbf16> to vector<24x16xbf16>
    %c8_46 = arith.constant 8 : index
    %c0_47 = arith.constant 0 : index
    %c0_48 = arith.constant 0 : index
    %49 = vector.load %arg2[%c8_46, %c0_47, %c0_48] : memref<9x16x16xbf16, #tpu.memory_space<vmem>>, vector<1x16x16xbf16>
    %50 = vector.shape_cast %49 : vector<1x16x16xbf16> to vector<16x16xbf16>
    %cst_49 = arith.constant dense<0.000000e+00> : vector<24x16xf32>
    %51 = tpu.matmul %48, %50, %cst_49 {dimension_numbers = #tpu.dot_dimension_numbers<[1], [0], [0], [1], [0, 0, 1, 1], [], []>} : vector<24x16xbf16>, vector<16x16xbf16>, vector<24x16xf32> -> vector<24x16xf32>
    %52 = arith.addf %46, %51 : vector<24x16xf32>
    %c0_50 = arith.constant 0 : index
    %c0_51 = arith.constant 0 : index
    %53 = vector.load %arg3[%c0_50, %c0_51] : memref<1x16xf32, #tpu.memory_space<vmem>>, vector<1x16xf32>
    %54 = vector.broadcast %53 : vector<1x16xf32> to vector<24x16xf32>
    %55 = arith.addf %52, %54 : vector<24x16xf32>
    %cst_52 = arith.constant 0.000000e+00 : f32
    %56 = vector.broadcast %cst_52 : f32 to vector<24x16xf32>
    %57 = arith.cmpf oge, %55, %56 : vector<24x16xf32>
    %cst_53 = arith.constant 0.00999999977 : f32
    %58 = vector.broadcast %cst_53 : f32 to vector<24x16xf32>
    %59 = arith.mulf %58, %55 : vector<24x16xf32>
    %60 = arith.select %57, %55, %59 : vector<24x16xi1>, vector<24x16xf32>
    %61 = arith.truncf %60 : vector<24x16xf32> to vector<24x16xbf16>
    %c0_54 = arith.constant 0 : index
    %c0_55 = arith.constant 0 : index
    %c0_56 = arith.constant 0 : index
    %62 = vector.load %arg4[%c0_54, %c0_55, %c0_56] : memref<1x24x16xbf16, #tpu.memory_space<vmem>>, vector<1x24x16xbf16>
    %63 = vector.shape_cast %62 : vector<1x24x16xbf16> to vector<24x16xbf16>
    %64 = vector.shape_cast %61 : vector<24x16xbf16> to vector<1x24x16xbf16>
    tpu.vector_store %arg4[%c0_54, %c0_55, %c0_56], %64 {strides = array<i32>} : memref<1x24x16xbf16, #tpu.memory_space<vmem>>, vector<1x24x16xbf16>,
    return
  }
  func.func @transform_0(%arg0: i32) -> (i32, i32, i32) {
    %c0_i32 = arith.constant 0 : i32
    %c0_i32_0 = arith.constant 0 : i32
    %c0_i32_1 = arith.constant 0 : i32
    return %arg0, %c0_i32, %c0_i32_0 : i32, i32, i32
  }
  func.func @transform_1(%arg0: i32) -> (i32, i32, i32) {
    %c0_i32 = arith.constant 0 : i32
    %c0_i32_0 = arith.constant 0 : i32
    %c0_i32_1 = arith.constant 0 : i32
    %c0_i32_2 = arith.constant 0 : i32
    return %c0_i32, %c0_i32_0, %c0_i32_1 : i32, i32, i32
  }
  func.func @transform_2(%arg0: i32) -> (i32, i32) {
    %c0_i32 = arith.constant 0 : i32
    %c0_i32_0 = arith.constant 0 : i32
    %c0_i32_1 = arith.constant 0 : i32
    return %c0_i32, %c0_i32_0 : i32, i32
  }
  func.func @transform_3(%arg0: i32) -> (i32, i32, i32) {
    %c0_i32 = arith.constant 0 : i32
    %c0_i32_0 = arith.constant 0 : i32
    %c0_i32_1 = arith.constant 0 : i32
    return %arg0, %c0_i32, %c0_i32_0 : i32, i32, i32
  }
}

module attributes {stable_mosaic.version = 11 : i64} {
  func.func @_tap_matmul_kernel(%arg0: i32, %arg1: memref<1x2x8xbf16, #tpu.memory_space<vmem>>, %arg2: memref<1x8x256xbf16, #tpu.memory_space<vmem>>, %arg3: memref<1x256xf32, #tpu.memory_space<vmem>>, %arg4: memref<1x2x256xbf16, #tpu.memory_space<vmem>>) attributes {dimension_semantics = [#tpu.dimension_semantics<parallel>], iteration_bounds = array<i64: 1>, scalar_prefetch = 0 : i64, scratch_operands = 0 : i64, tpu.core_type = #tpu.core_type<tc>, window_params = [{transform_indices = @transform_0, window_bounds = array<i64: 1, 2, 8>}, {pipeline_mode = #tpu.pipeline_mode<synchronous>, transform_indices = @transform_1, window_bounds = array<i64: 1, 8, 256>}, {pipeline_mode = #tpu.pipeline_mode<synchronous>, transform_indices = @transform_2, window_bounds = array<i64: 1, 256>}, {transform_indices = @transform_3, window_bounds = array<i64: 1, 2, 256>}]} {
    %c0 = arith.constant 0 : index
    %c0_0 = arith.constant 0 : index
    %c0_1 = arith.constant 0 : index
    %0 = vector.load %arg1[%c0, %c0_0, %c0_1] : memref<1x2x8xbf16, #tpu.memory_space<vmem>>, vector<1x2x8xbf16>
    %1 = vector.shape_cast %0 : vector<1x2x8xbf16> to vector<2x8xbf16>
    %c0_2 = arith.constant 0 : index
    %c0_3 = arith.constant 0 : index
    %c0_4 = arith.constant 0 : index
    %2 = vector.load %arg2[%c0_2, %c0_3, %c0_4] : memref<1x8x256xbf16, #tpu.memory_space<vmem>>, vector<1x8x256xbf16>
    %3 = vector.shape_cast %2 : vector<1x8x256xbf16> to vector<8x256xbf16>
    %cst = arith.constant dense<0.000000e+00> : vector<2x256xf32>
    %4 = tpu.matmul %1, %3, %cst {dimension_numbers = #tpu.dot_dimension_numbers<[1], [0], [0], [1], [0, 0, 1, 1], [], []>} : vector<2x8xbf16>, vector<8x256xbf16>, vector<2x256xf32> -> vector<2x256xf32>
    %c0_5 = arith.constant 0 : index
    %c0_6 = arith.constant 0 : index
    %5 = vector.load %arg3[%c0_5, %c0_6] : memref<1x256xf32, #tpu.memory_space<vmem>>, vector<1x256xf32>
    %6 = vector.broadcast %5 : vector<1x256xf32> to vector<2x256xf32>
    %7 = arith.addf %4, %6 : vector<2x256xf32>
    %8 = arith.truncf %7 : vector<2x256xf32> to vector<2x256xbf16>
    %c0_7 = arith.constant 0 : index
    %c0_8 = arith.constant 0 : index
    %c0_9 = arith.constant 0 : index
    %9 = vector.load %arg4[%c0_7, %c0_8, %c0_9] : memref<1x2x256xbf16, #tpu.memory_space<vmem>>, vector<1x2x256xbf16>
    %10 = vector.shape_cast %9 : vector<1x2x256xbf16> to vector<2x256xbf16>
    %11 = vector.shape_cast %8 : vector<2x256xbf16> to vector<1x2x256xbf16>
    tpu.vector_store %arg4[%c0_7, %c0_8, %c0_9], %11 {strides = array<i32>} : memref<1x2x256xbf16, #tpu.memory_space<vmem>>, vector<1x2x256xbf16>,
    return
  }
  func.func @transform_0(%arg0: i32) -> (i32, i32, i32) {
    %c0_i32 = arith.constant 0 : i32
    %c0_i32_0 = arith.constant 0 : i32
    %c0_i32_1 = arith.constant 0 : i32
    return %arg0, %c0_i32, %c0_i32_0 : i32, i32, i32
  }
  func.func @transform_1(%arg0: i32) -> (i32, i32, i32) {
    %c0_i32 = arith.constant 0 : i32
    %c0_i32_0 = arith.constant 0 : i32
    %c0_i32_1 = arith.constant 0 : i32
    %c0_i32_2 = arith.constant 0 : i32
    return %c0_i32, %c0_i32_0, %c0_i32_1 : i32, i32, i32
  }
  func.func @transform_2(%arg0: i32) -> (i32, i32) {
    %c0_i32 = arith.constant 0 : i32
    %c0_i32_0 = arith.constant 0 : i32
    %c0_i32_1 = arith.constant 0 : i32
    return %c0_i32, %c0_i32_0 : i32, i32
  }
  func.func @transform_3(%arg0: i32) -> (i32, i32, i32) {
    %c0_i32 = arith.constant 0 : i32
    %c0_i32_0 = arith.constant 0 : i32
    %c0_i32_1 = arith.constant 0 : i32
    return %arg0, %c0_i32, %c0_i32_0 : i32, i32, i32
  }
}

module attributes {stable_mosaic.version = 11 : i64} {
  func.func @_tap_matmul_kernel(%arg0: i32, %arg1: memref<1x30x16xbf16, #tpu.memory_space<vmem>>, %arg2: memref<4x16x32xbf16, #tpu.memory_space<vmem>>, %arg3: memref<1x32xf32, #tpu.memory_space<vmem>>, %arg4: memref<1x20x32xbf16, #tpu.memory_space<vmem>>) attributes {dimension_semantics = [#tpu.dimension_semantics<parallel>], iteration_bounds = array<i64: 2>, scalar_prefetch = 0 : i64, scratch_operands = 0 : i64, tpu.core_type = #tpu.core_type<tc>, window_params = [{transform_indices = @transform_0, window_bounds = array<i64: 1, 30, 16>}, {pipeline_mode = #tpu.pipeline_mode<synchronous>, transform_indices = @transform_1, window_bounds = array<i64: 4, 16, 32>}, {pipeline_mode = #tpu.pipeline_mode<synchronous>, transform_indices = @transform_2, window_bounds = array<i64: 1, 32>}, {transform_indices = @transform_3, window_bounds = array<i64: 1, 20, 32>}]} {
    %c0 = arith.constant 0 : index
    %c0_0 = arith.constant 0 : index
    %c0_1 = arith.constant 0 : index
    %0 = vector.load %arg1[%c0, %c0_0, %c0_1] : memref<1x30x16xbf16, #tpu.memory_space<vmem>>, vector<1x20x16xbf16>
    %1 = vector.shape_cast %0 : vector<1x20x16xbf16> to vector<20x16xbf16>
    %c0_2 = arith.constant 0 : index
    %c0_3 = arith.constant 0 : index
    %c0_4 = arith.constant 0 : index
    %2 = vector.load %arg2[%c0_2, %c0_3, %c0_4] : memref<4x16x32xbf16, #tpu.memory_space<vmem>>, vector<1x16x32xbf16>
    %3 = vector.shape_cast %2 : vector<1x16x32xbf16> to vector<16x32xbf16>
    %cst = arith.constant dense<0.000000e+00> : vector<20x32xf32>
    %4 = tpu.matmul %1, %3, %cst {dimension_numbers = #tpu.dot_dimension_numbers<[1], [0], [0], [1], [0, 0, 1, 1], [], []>} : vector<20x16xbf16>, vector<16x32xbf16>, vector<20x32xf32> -> vector<20x32xf32>
    %c0_5 = arith.constant 0 : index
    %c1 = arith.constant 1 : index
    %c0_6 = arith.constant 0 : index
    %5 = vector.load %arg1[%c0_5, %c1, %c0_6] : memref<1x30x16xbf16, #tpu.memory_space<vmem>>, vector<1x20x16xbf16>
    %6 = vector.shape_cast %5 : vector<1x20x16xbf16> to vector<20x16xbf16>
    %c1_7 = arith.constant 1 : index
    %c0_8 = arith.constant 0 : index
    %c0_9 = arith.constant 0 : index
    %7 = vector.load %arg2[%c1_7, %c0_8, %c0_9] : memref<4x16x32xbf16, #tpu.memory_space<vmem>>, vector<1x16x32xbf16>
    %8 = vector.shape_cast %7 : vector<1x16x32xbf16> to vector<16x32xbf16>
    %cst_10 = arith.constant dense<0.000000e+00> : vector<20x32xf32>
    %9 = tpu.matmul %6, %8, %cst_10 {dimension_numbers = #tpu.dot_dimension_numbers<[1], [0], [0], [1], [0, 0, 1, 1], [], []>} : vector<20x16xbf16>, vector<16x32xbf16>, vector<20x32xf32> -> vector<20x32xf32>
    %10 = arith.addf %4, %9 : vector<20x32xf32>
    %c0_11 = arith.constant 0 : index
    %c5 = arith.constant 5 : index
    %c0_12 = arith.constant 0 : index
    %11 = vector.load %arg1[%c0_11, %c5, %c0_12] : memref<1x30x16xbf16, #tpu.memory_space<vmem>>, vector<1x20x16xbf16>
    %12 = vector.shape_cast %11 : vector<1x20x16xbf16> to vector<20x16xbf16>
    %c2 = arith.constant 2 : index
    %c0_13 = arith.constant 0 : index
    %c0_14 = arith.constant 0 : index
    %13 = vector.load %arg2[%c2, %c0_13, %c0_14] : memref<4x16x32xbf16, #tpu.memory_space<vmem>>, vector<1x16x32xbf16>
    %14 = vector.shape_cast %13 : vector<1x16x32xbf16> to vector<16x32xbf16>
    %cst_15 = arith.constant dense<0.000000e+00> : vector<20x32xf32>
    %15 = tpu.matmul %12, %14, %cst_15 {dimension_numbers = #tpu.dot_dimension_numbers<[1], [0], [0], [1], [0, 0, 1, 1], [], []>} : vector<20x16xbf16>, vector<16x32xbf16>, vector<20x32xf32> -> vector<20x32xf32>
    %16 = arith.addf %10, %15 : vector<20x32xf32>
    %c0_16 = arith.constant 0 : index
    %c6 = arith.constant 6 : index
    %c0_17 = arith.constant 0 : index
    %17 = vector.load %arg1[%c0_16, %c6, %c0_17] : memref<1x30x16xbf16, #tpu.memory_space<vmem>>, vector<1x20x16xbf16>
    %18 = vector.shape_cast %17 : vector<1x20x16xbf16> to vector<20x16xbf16>
    %c3 = arith.constant 3 : index
    %c0_18 = arith.constant 0 : index
    %c0_19 = arith.constant 0 : index
    %19 = vector.load %arg2[%c3, %c0_18, %c0_19] : memref<4x16x32xbf16, #tpu.memory_space<vmem>>, vector<1x16x32xbf16>
    %20 = vector.shape_cast %19 : vector<1x16x32xbf16> to vector<16x32xbf16>
    %cst_20 = arith.constant dense<0.000000e+00> : vector<20x32xf32>
    %21 = tpu.matmul %18, %20, %cst_20 {dimension_numbers = #tpu.dot_dimension_numbers<[1], [0], [0], [1], [0, 0, 1, 1], [], []>} : vector<20x16xbf16>, vector<16x32xbf16>, vector<20x32xf32> -> vector<20x32xf32>
    %22 = arith.addf %16, %21 : vector<20x32xf32>
    %c0_21 = arith.constant 0 : index
    %c0_22 = arith.constant 0 : index
    %23 = vector.load %arg3[%c0_21, %c0_22] : memref<1x32xf32, #tpu.memory_space<vmem>>, vector<1x32xf32>
    %24 = vector.broadcast %23 : vector<1x32xf32> to vector<20x32xf32>
    %25 = arith.addf %22, %24 : vector<20x32xf32>
    %cst_23 = arith.constant 0.000000e+00 : f32
    %26 = vector.broadcast %cst_23 : f32 to vector<20x32xf32>
    %27 = arith.cmpf oge, %25, %26 : vector<20x32xf32>
    %cst_24 = arith.constant 0.00999999977 : f32
    %28 = vector.broadcast %cst_24 : f32 to vector<20x32xf32>
    %29 = arith.mulf %28, %25 : vector<20x32xf32>
    %30 = arith.select %27, %25, %29 : vector<20x32xi1>, vector<20x32xf32>
    %31 = arith.truncf %30 : vector<20x32xf32> to vector<20x32xbf16>
    %c0_25 = arith.constant 0 : index
    %c0_26 = arith.constant 0 : index
    %c0_27 = arith.constant 0 : index
    %32 = vector.load %arg4[%c0_25, %c0_26, %c0_27] : memref<1x20x32xbf16, #tpu.memory_space<vmem>>, vector<1x20x32xbf16>
    %33 = vector.shape_cast %32 : vector<1x20x32xbf16> to vector<20x32xbf16>
    %34 = vector.shape_cast %31 : vector<20x32xbf16> to vector<1x20x32xbf16>
    tpu.vector_store %arg4[%c0_25, %c0_26, %c0_27], %34 {strides = array<i32>} : memref<1x20x32xbf16, #tpu.memory_space<vmem>>, vector<1x20x32xbf16>,
    return
  }
  func.func @transform_0(%arg0: i32) -> (i32, i32, i32) {
    %c0_i32 = arith.constant 0 : i32
    %c0_i32_0 = arith.constant 0 : i32
    %c0_i32_1 = arith.constant 0 : i32
    return %arg0, %c0_i32, %c0_i32_0 : i32, i32, i32
  }
  func.func @transform_1(%arg0: i32) -> (i32, i32, i32) {
    %c0_i32 = arith.constant 0 : i32
    %c0_i32_0 = arith.constant 0 : i32
    %c0_i32_1 = arith.constant 0 : i32
    %c0_i32_2 = arith.constant 0 : i32
    return %c0_i32, %c0_i32_0, %c0_i32_1 : i32, i32, i32
  }
  func.func @transform_2(%arg0: i32) -> (i32, i32) {
    %c0_i32 = arith.constant 0 : i32
    %c0_i32_0 = arith.constant 0 : i32
    %c0_i32_1 = arith.constant 0 : i32
    return %c0_i32, %c0_i32_0 : i32, i32
  }
  func.func @transform_3(%arg0: i32) -> (i32, i32, i32) {
    %c0_i32 = arith.constant 0 : i32
    %c0_i32_0 = arith.constant 0 : i32
    %c0_i32_1 = arith.constant 0 : i32
    return %arg0, %c0_i32, %c0_i32_0 : i32, i32, i32
  }
}

module attributes {stable_mosaic.version = 11 : i64} {
  func.func @_tap_matmul_kernel(%arg0: i32, %arg1: memref<1x90x8xbf16, #tpu.memory_space<vmem>>, %arg2: memref<4x8x32xbf16, #tpu.memory_space<vmem>>, %arg3: memref<1x32xf32, #tpu.memory_space<vmem>>, %arg4: memref<1x72x32xbf16, #tpu.memory_space<vmem>>) attributes {dimension_semantics = [#tpu.dimension_semantics<parallel>], iteration_bounds = array<i64: 2>, scalar_prefetch = 0 : i64, scratch_operands = 0 : i64, tpu.core_type = #tpu.core_type<tc>, window_params = [{transform_indices = @transform_0, window_bounds = array<i64: 1, 90, 8>}, {pipeline_mode = #tpu.pipeline_mode<synchronous>, transform_indices = @transform_1, window_bounds = array<i64: 4, 8, 32>}, {pipeline_mode = #tpu.pipeline_mode<synchronous>, transform_indices = @transform_2, window_bounds = array<i64: 1, 32>}, {transform_indices = @transform_3, window_bounds = array<i64: 1, 72, 32>}]} {
    %c0 = arith.constant 0 : index
    %c0_0 = arith.constant 0 : index
    %c0_1 = arith.constant 0 : index
    %0 = vector.load %arg1[%c0, %c0_0, %c0_1] : memref<1x90x8xbf16, #tpu.memory_space<vmem>>, vector<1x72x8xbf16>
    %1 = vector.shape_cast %0 : vector<1x72x8xbf16> to vector<72x8xbf16>
    %c0_2 = arith.constant 0 : index
    %c0_3 = arith.constant 0 : index
    %c0_4 = arith.constant 0 : index
    %2 = vector.load %arg2[%c0_2, %c0_3, %c0_4] : memref<4x8x32xbf16, #tpu.memory_space<vmem>>, vector<1x8x32xbf16>
    %3 = vector.shape_cast %2 : vector<1x8x32xbf16> to vector<8x32xbf16>
    %cst = arith.constant dense<0.000000e+00> : vector<72x32xf32>
    %4 = tpu.matmul %1, %3, %cst {dimension_numbers = #tpu.dot_dimension_numbers<[1], [0], [0], [1], [0, 0, 1, 1], [], []>} : vector<72x8xbf16>, vector<8x32xbf16>, vector<72x32xf32> -> vector<72x32xf32>
    %c0_5 = arith.constant 0 : index
    %c1 = arith.constant 1 : index
    %c0_6 = arith.constant 0 : index
    %5 = vector.load %arg1[%c0_5, %c1, %c0_6] : memref<1x90x8xbf16, #tpu.memory_space<vmem>>, vector<1x72x8xbf16>
    %6 = vector.shape_cast %5 : vector<1x72x8xbf16> to vector<72x8xbf16>
    %c1_7 = arith.constant 1 : index
    %c0_8 = arith.constant 0 : index
    %c0_9 = arith.constant 0 : index
    %7 = vector.load %arg2[%c1_7, %c0_8, %c0_9] : memref<4x8x32xbf16, #tpu.memory_space<vmem>>, vector<1x8x32xbf16>
    %8 = vector.shape_cast %7 : vector<1x8x32xbf16> to vector<8x32xbf16>
    %cst_10 = arith.constant dense<0.000000e+00> : vector<72x32xf32>
    %9 = tpu.matmul %6, %8, %cst_10 {dimension_numbers = #tpu.dot_dimension_numbers<[1], [0], [0], [1], [0, 0, 1, 1], [], []>} : vector<72x8xbf16>, vector<8x32xbf16>, vector<72x32xf32> -> vector<72x32xf32>
    %10 = arith.addf %4, %9 : vector<72x32xf32>
    %c0_11 = arith.constant 0 : index
    %c9 = arith.constant 9 : index
    %c0_12 = arith.constant 0 : index
    %11 = vector.load %arg1[%c0_11, %c9, %c0_12] : memref<1x90x8xbf16, #tpu.memory_space<vmem>>, vector<1x72x8xbf16>
    %12 = vector.shape_cast %11 : vector<1x72x8xbf16> to vector<72x8xbf16>
    %c2 = arith.constant 2 : index
    %c0_13 = arith.constant 0 : index
    %c0_14 = arith.constant 0 : index
    %13 = vector.load %arg2[%c2, %c0_13, %c0_14] : memref<4x8x32xbf16, #tpu.memory_space<vmem>>, vector<1x8x32xbf16>
    %14 = vector.shape_cast %13 : vector<1x8x32xbf16> to vector<8x32xbf16>
    %cst_15 = arith.constant dense<0.000000e+00> : vector<72x32xf32>
    %15 = tpu.matmul %12, %14, %cst_15 {dimension_numbers = #tpu.dot_dimension_numbers<[1], [0], [0], [1], [0, 0, 1, 1], [], []>} : vector<72x8xbf16>, vector<8x32xbf16>, vector<72x32xf32> -> vector<72x32xf32>
    %16 = arith.addf %10, %15 : vector<72x32xf32>
    %c0_16 = arith.constant 0 : index
    %c10 = arith.constant 10 : index
    %c0_17 = arith.constant 0 : index
    %17 = vector.load %arg1[%c0_16, %c10, %c0_17] : memref<1x90x8xbf16, #tpu.memory_space<vmem>>, vector<1x72x8xbf16>
    %18 = vector.shape_cast %17 : vector<1x72x8xbf16> to vector<72x8xbf16>
    %c3 = arith.constant 3 : index
    %c0_18 = arith.constant 0 : index
    %c0_19 = arith.constant 0 : index
    %19 = vector.load %arg2[%c3, %c0_18, %c0_19] : memref<4x8x32xbf16, #tpu.memory_space<vmem>>, vector<1x8x32xbf16>
    %20 = vector.shape_cast %19 : vector<1x8x32xbf16> to vector<8x32xbf16>
    %cst_20 = arith.constant dense<0.000000e+00> : vector<72x32xf32>
    %21 = tpu.matmul %18, %20, %cst_20 {dimension_numbers = #tpu.dot_dimension_numbers<[1], [0], [0], [1], [0, 0, 1, 1], [], []>} : vector<72x8xbf16>, vector<8x32xbf16>, vector<72x32xf32> -> vector<72x32xf32>
    %22 = arith.addf %16, %21 : vector<72x32xf32>
    %c0_21 = arith.constant 0 : index
    %c0_22 = arith.constant 0 : index
    %23 = vector.load %arg3[%c0_21, %c0_22] : memref<1x32xf32, #tpu.memory_space<vmem>>, vector<1x32xf32>
    %24 = vector.broadcast %23 : vector<1x32xf32> to vector<72x32xf32>
    %25 = arith.addf %22, %24 : vector<72x32xf32>
    %cst_23 = arith.constant 0.000000e+00 : f32
    %26 = vector.broadcast %cst_23 : f32 to vector<72x32xf32>
    %27 = arith.cmpf oge, %25, %26 : vector<72x32xf32>
    %cst_24 = arith.constant 0.00999999977 : f32
    %28 = vector.broadcast %cst_24 : f32 to vector<72x32xf32>
    %29 = arith.mulf %28, %25 : vector<72x32xf32>
    %30 = arith.select %27, %25, %29 : vector<72x32xi1>, vector<72x32xf32>
    %31 = arith.truncf %30 : vector<72x32xf32> to vector<72x32xbf16>
    %c0_25 = arith.constant 0 : index
    %c0_26 = arith.constant 0 : index
    %c0_27 = arith.constant 0 : index
    %32 = vector.load %arg4[%c0_25, %c0_26, %c0_27] : memref<1x72x32xbf16, #tpu.memory_space<vmem>>, vector<1x72x32xbf16>
    %33 = vector.shape_cast %32 : vector<1x72x32xbf16> to vector<72x32xbf16>
    %34 = vector.shape_cast %31 : vector<72x32xbf16> to vector<1x72x32xbf16>
    tpu.vector_store %arg4[%c0_25, %c0_26, %c0_27], %34 {strides = array<i32>} : memref<1x72x32xbf16, #tpu.memory_space<vmem>>, vector<1x72x32xbf16>,
    return
  }
  func.func @transform_0(%arg0: i32) -> (i32, i32, i32) {
    %c0_i32 = arith.constant 0 : i32
    %c0_i32_0 = arith.constant 0 : i32
    %c0_i32_1 = arith.constant 0 : i32
    return %arg0, %c0_i32, %c0_i32_0 : i32, i32, i32
  }
  func.func @transform_1(%arg0: i32) -> (i32, i32, i32) {
    %c0_i32 = arith.constant 0 : i32
    %c0_i32_0 = arith.constant 0 : i32
    %c0_i32_1 = arith.constant 0 : i32
    %c0_i32_2 = arith.constant 0 : i32
    return %c0_i32, %c0_i32_0, %c0_i32_1 : i32, i32, i32
  }
  func.func @transform_2(%arg0: i32) -> (i32, i32) {
    %c0_i32 = arith.constant 0 : i32
    %c0_i32_0 = arith.constant 0 : i32
    %c0_i32_1 = arith.constant 0 : i32
    return %c0_i32, %c0_i32_0 : i32, i32
  }
  func.func @transform_3(%arg0: i32) -> (i32, i32, i32) {
    %c0_i32 = arith.constant 0 : i32
    %c0_i32_0 = arith.constant 0 : i32
    %c0_i32_1 = arith.constant 0 : i32
    return %arg0, %c0_i32, %c0_i32_0 : i32, i32, i32
  }
}

module attributes {stable_mosaic.version = 11 : i64} {
  func.func @_tap_matmul_kernel(%arg0: i32, %arg1: memref<1x342x8xbf16, #tpu.memory_space<vmem>>, %arg2: memref<9x8x4xbf16, #tpu.memory_space<vmem>>, %arg3: memref<1x4xf32, #tpu.memory_space<vmem>>, %arg4: memref<1x288x4xf32, #tpu.memory_space<vmem>>) attributes {dimension_semantics = [#tpu.dimension_semantics<parallel>], iteration_bounds = array<i64: 2>, scalar_prefetch = 0 : i64, scratch_operands = 0 : i64, tpu.core_type = #tpu.core_type<tc>, window_params = [{transform_indices = @transform_0, window_bounds = array<i64: 1, 342, 8>}, {pipeline_mode = #tpu.pipeline_mode<synchronous>, transform_indices = @transform_1, window_bounds = array<i64: 9, 8, 4>}, {pipeline_mode = #tpu.pipeline_mode<synchronous>, transform_indices = @transform_2, window_bounds = array<i64: 1, 4>}, {transform_indices = @transform_3, window_bounds = array<i64: 1, 288, 4>}]} {
    %c0 = arith.constant 0 : index
    %c0_0 = arith.constant 0 : index
    %c0_1 = arith.constant 0 : index
    %0 = vector.load %arg1[%c0, %c0_0, %c0_1] : memref<1x342x8xbf16, #tpu.memory_space<vmem>>, vector<1x288x8xbf16>
    %1 = vector.shape_cast %0 : vector<1x288x8xbf16> to vector<288x8xbf16>
    %c0_2 = arith.constant 0 : index
    %c0_3 = arith.constant 0 : index
    %c0_4 = arith.constant 0 : index
    %2 = vector.load %arg2[%c0_2, %c0_3, %c0_4] : memref<9x8x4xbf16, #tpu.memory_space<vmem>>, vector<1x8x4xbf16>
    %3 = vector.shape_cast %2 : vector<1x8x4xbf16> to vector<8x4xbf16>
    %cst = arith.constant dense<0.000000e+00> : vector<288x4xf32>
    %4 = tpu.matmul %1, %3, %cst {dimension_numbers = #tpu.dot_dimension_numbers<[1], [0], [0], [1], [0, 0, 1, 1], [], []>} : vector<288x8xbf16>, vector<8x4xbf16>, vector<288x4xf32> -> vector<288x4xf32>
    %c0_5 = arith.constant 0 : index
    %c1 = arith.constant 1 : index
    %c0_6 = arith.constant 0 : index
    %5 = vector.load %arg1[%c0_5, %c1, %c0_6] : memref<1x342x8xbf16, #tpu.memory_space<vmem>>, vector<1x288x8xbf16>
    %6 = vector.shape_cast %5 : vector<1x288x8xbf16> to vector<288x8xbf16>
    %c1_7 = arith.constant 1 : index
    %c0_8 = arith.constant 0 : index
    %c0_9 = arith.constant 0 : index
    %7 = vector.load %arg2[%c1_7, %c0_8, %c0_9] : memref<9x8x4xbf16, #tpu.memory_space<vmem>>, vector<1x8x4xbf16>
    %8 = vector.shape_cast %7 : vector<1x8x4xbf16> to vector<8x4xbf16>
    %cst_10 = arith.constant dense<0.000000e+00> : vector<288x4xf32>
    %9 = tpu.matmul %6, %8, %cst_10 {dimension_numbers = #tpu.dot_dimension_numbers<[1], [0], [0], [1], [0, 0, 1, 1], [], []>} : vector<288x8xbf16>, vector<8x4xbf16>, vector<288x4xf32> -> vector<288x4xf32>
    %10 = arith.addf %4, %9 : vector<288x4xf32>
    %c0_11 = arith.constant 0 : index
    %c2 = arith.constant 2 : index
    %c0_12 = arith.constant 0 : index
    %11 = vector.load %arg1[%c0_11, %c2, %c0_12] : memref<1x342x8xbf16, #tpu.memory_space<vmem>>, vector<1x288x8xbf16>
    %12 = vector.shape_cast %11 : vector<1x288x8xbf16> to vector<288x8xbf16>
    %c2_13 = arith.constant 2 : index
    %c0_14 = arith.constant 0 : index
    %c0_15 = arith.constant 0 : index
    %13 = vector.load %arg2[%c2_13, %c0_14, %c0_15] : memref<9x8x4xbf16, #tpu.memory_space<vmem>>, vector<1x8x4xbf16>
    %14 = vector.shape_cast %13 : vector<1x8x4xbf16> to vector<8x4xbf16>
    %cst_16 = arith.constant dense<0.000000e+00> : vector<288x4xf32>
    %15 = tpu.matmul %12, %14, %cst_16 {dimension_numbers = #tpu.dot_dimension_numbers<[1], [0], [0], [1], [0, 0, 1, 1], [], []>} : vector<288x8xbf16>, vector<8x4xbf16>, vector<288x4xf32> -> vector<288x4xf32>
    %16 = arith.addf %10, %15 : vector<288x4xf32>
    %c0_17 = arith.constant 0 : index
    %c18 = arith.constant 18 : index
    %c0_18 = arith.constant 0 : index
    %17 = vector.load %arg1[%c0_17, %c18, %c0_18] : memref<1x342x8xbf16, #tpu.memory_space<vmem>>, vector<1x288x8xbf16>
    %18 = vector.shape_cast %17 : vector<1x288x8xbf16> to vector<288x8xbf16>
    %c3 = arith.constant 3 : index
    %c0_19 = arith.constant 0 : index
    %c0_20 = arith.constant 0 : index
    %19 = vector.load %arg2[%c3, %c0_19, %c0_20] : memref<9x8x4xbf16, #tpu.memory_space<vmem>>, vector<1x8x4xbf16>
    %20 = vector.shape_cast %19 : vector<1x8x4xbf16> to vector<8x4xbf16>
    %cst_21 = arith.constant dense<0.000000e+00> : vector<288x4xf32>
    %21 = tpu.matmul %18, %20, %cst_21 {dimension_numbers = #tpu.dot_dimension_numbers<[1], [0], [0], [1], [0, 0, 1, 1], [], []>} : vector<288x8xbf16>, vector<8x4xbf16>, vector<288x4xf32> -> vector<288x4xf32>
    %22 = arith.addf %16, %21 : vector<288x4xf32>
    %c0_22 = arith.constant 0 : index
    %c19 = arith.constant 19 : index
    %c0_23 = arith.constant 0 : index
    %23 = vector.load %arg1[%c0_22, %c19, %c0_23] : memref<1x342x8xbf16, #tpu.memory_space<vmem>>, vector<1x288x8xbf16>
    %24 = vector.shape_cast %23 : vector<1x288x8xbf16> to vector<288x8xbf16>
    %c4 = arith.constant 4 : index
    %c0_24 = arith.constant 0 : index
    %c0_25 = arith.constant 0 : index
    %25 = vector.load %arg2[%c4, %c0_24, %c0_25] : memref<9x8x4xbf16, #tpu.memory_space<vmem>>, vector<1x8x4xbf16>
    %26 = vector.shape_cast %25 : vector<1x8x4xbf16> to vector<8x4xbf16>
    %cst_26 = arith.constant dense<0.000000e+00> : vector<288x4xf32>
    %27 = tpu.matmul %24, %26, %cst_26 {dimension_numbers = #tpu.dot_dimension_numbers<[1], [0], [0], [1], [0, 0, 1, 1], [], []>} : vector<288x8xbf16>, vector<8x4xbf16>, vector<288x4xf32> -> vector<288x4xf32>
    %28 = arith.addf %22, %27 : vector<288x4xf32>
    %c0_27 = arith.constant 0 : index
    %c20 = arith.constant 20 : index
    %c0_28 = arith.constant 0 : index
    %29 = vector.load %arg1[%c0_27, %c20, %c0_28] : memref<1x342x8xbf16, #tpu.memory_space<vmem>>, vector<1x288x8xbf16>
    %30 = vector.shape_cast %29 : vector<1x288x8xbf16> to vector<288x8xbf16>
    %c5 = arith.constant 5 : index
    %c0_29 = arith.constant 0 : index
    %c0_30 = arith.constant 0 : index
    %31 = vector.load %arg2[%c5, %c0_29, %c0_30] : memref<9x8x4xbf16, #tpu.memory_space<vmem>>, vector<1x8x4xbf16>
    %32 = vector.shape_cast %31 : vector<1x8x4xbf16> to vector<8x4xbf16>
    %cst_31 = arith.constant dense<0.000000e+00> : vector<288x4xf32>
    %33 = tpu.matmul %30, %32, %cst_31 {dimension_numbers = #tpu.dot_dimension_numbers<[1], [0], [0], [1], [0, 0, 1, 1], [], []>} : vector<288x8xbf16>, vector<8x4xbf16>, vector<288x4xf32> -> vector<288x4xf32>
    %34 = arith.addf %28, %33 : vector<288x4xf32>
    %c0_32 = arith.constant 0 : index
    %c36 = arith.constant 36 : index
    %c0_33 = arith.constant 0 : index
    %35 = vector.load %arg1[%c0_32, %c36, %c0_33] : memref<1x342x8xbf16, #tpu.memory_space<vmem>>, vector<1x288x8xbf16>
    %36 = vector.shape_cast %35 : vector<1x288x8xbf16> to vector<288x8xbf16>
    %c6 = arith.constant 6 : index
    %c0_34 = arith.constant 0 : index
    %c0_35 = arith.constant 0 : index
    %37 = vector.load %arg2[%c6, %c0_34, %c0_35] : memref<9x8x4xbf16, #tpu.memory_space<vmem>>, vector<1x8x4xbf16>
    %38 = vector.shape_cast %37 : vector<1x8x4xbf16> to vector<8x4xbf16>
    %cst_36 = arith.constant dense<0.000000e+00> : vector<288x4xf32>
    %39 = tpu.matmul %36, %38, %cst_36 {dimension_numbers = #tpu.dot_dimension_numbers<[1], [0], [0], [1], [0, 0, 1, 1], [], []>} : vector<288x8xbf16>, vector<8x4xbf16>, vector<288x4xf32> -> vector<288x4xf32>
    %40 = arith.addf %34, %39 : vector<288x4xf32>
    %c0_37 = arith.constant 0 : index
    %c37 = arith.constant 37 : index
    %c0_38 = arith.constant 0 : index
    %41 = vector.load %arg1[%c0_37, %c37, %c0_38] : memref<1x342x8xbf16, #tpu.memory_space<vmem>>, vector<1x288x8xbf16>
    %42 = vector.shape_cast %41 : vector<1x288x8xbf16> to vector<288x8xbf16>
    %c7 = arith.constant 7 : index
    %c0_39 = arith.constant 0 : index
    %c0_40 = arith.constant 0 : index
    %43 = vector.load %arg2[%c7, %c0_39, %c0_40] : memref<9x8x4xbf16, #tpu.memory_space<vmem>>, vector<1x8x4xbf16>
    %44 = vector.shape_cast %43 : vector<1x8x4xbf16> to vector<8x4xbf16>
    %cst_41 = arith.constant dense<0.000000e+00> : vector<288x4xf32>
    %45 = tpu.matmul %42, %44, %cst_41 {dimension_numbers = #tpu.dot_dimension_numbers<[1], [0], [0], [1], [0, 0, 1, 1], [], []>} : vector<288x8xbf16>, vector<8x4xbf16>, vector<288x4xf32> -> vector<288x4xf32>
    %46 = arith.addf %40, %45 : vector<288x4xf32>
    %c0_42 = arith.constant 0 : index
    %c38 = arith.constant 38 : index
    %c0_43 = arith.constant 0 : index
    %47 = vector.load %arg1[%c0_42, %c38, %c0_43] : memref<1x342x8xbf16, #tpu.memory_space<vmem>>, vector<1x288x8xbf16>
    %48 = vector.shape_cast %47 : vector<1x288x8xbf16> to vector<288x8xbf16>
    %c8 = arith.constant 8 : index
    %c0_44 = arith.constant 0 : index
    %c0_45 = arith.constant 0 : index
    %49 = vector.load %arg2[%c8, %c0_44, %c0_45] : memref<9x8x4xbf16, #tpu.memory_space<vmem>>, vector<1x8x4xbf16>
    %50 = vector.shape_cast %49 : vector<1x8x4xbf16> to vector<8x4xbf16>
    %cst_46 = arith.constant dense<0.000000e+00> : vector<288x4xf32>
    %51 = tpu.matmul %48, %50, %cst_46 {dimension_numbers = #tpu.dot_dimension_numbers<[1], [0], [0], [1], [0, 0, 1, 1], [], []>} : vector<288x8xbf16>, vector<8x4xbf16>, vector<288x4xf32> -> vector<288x4xf32>
    %52 = arith.addf %46, %51 : vector<288x4xf32>
    %c0_47 = arith.constant 0 : index
    %c0_48 = arith.constant 0 : index
    %53 = vector.load %arg3[%c0_47, %c0_48] : memref<1x4xf32, #tpu.memory_space<vmem>>, vector<1x4xf32>
    %54 = vector.broadcast %53 : vector<1x4xf32> to vector<288x4xf32>
    %55 = arith.addf %52, %54 : vector<288x4xf32>
    %56 = math.tanh %55 : vector<288x4xf32>
    %c0_49 = arith.constant 0 : index
    %c0_50 = arith.constant 0 : index
    %c0_51 = arith.constant 0 : index
    %57 = vector.load %arg4[%c0_49, %c0_50, %c0_51] : memref<1x288x4xf32, #tpu.memory_space<vmem>>, vector<1x288x4xf32>
    %58 = vector.shape_cast %57 : vector<1x288x4xf32> to vector<288x4xf32>
    %59 = vector.shape_cast %56 : vector<288x4xf32> to vector<1x288x4xf32>
    tpu.vector_store %arg4[%c0_49, %c0_50, %c0_51], %59 {strides = array<i32>} : memref<1x288x4xf32, #tpu.memory_space<vmem>>, vector<1x288x4xf32>,
    return
  }
  func.func @transform_0(%arg0: i32) -> (i32, i32, i32) {
    %c0_i32 = arith.constant 0 : i32
    %c0_i32_0 = arith.constant 0 : i32
    %c0_i32_1 = arith.constant 0 : i32
    return %arg0, %c0_i32, %c0_i32_0 : i32, i32, i32
  }
  func.func @transform_1(%arg0: i32) -> (i32, i32, i32) {
    %c0_i32 = arith.constant 0 : i32
    %c0_i32_0 = arith.constant 0 : i32
    %c0_i32_1 = arith.constant 0 : i32
    %c0_i32_2 = arith.constant 0 : i32
    return %c0_i32, %c0_i32_0, %c0_i32_1 : i32, i32, i32
  }
  func.func @transform_2(%arg0: i32) -> (i32, i32) {
    %c0_i32 = arith.constant 0 : i32
    %c0_i32_0 = arith.constant 0 : i32
    %c0_i32_1 = arith.constant 0 : i32
    return %c0_i32, %c0_i32_0 : i32, i32
  }
  func.func @transform_3(%arg0: i32) -> (i32, i32, i32) {
    %c0_i32 = arith.constant 0 : i32
    %c0_i32_0 = arith.constant 0 : i32
    %c0_i32_1 = arith.constant 0 : i32
    return %arg0, %c0_i32, %c0_i32_0 : i32, i32, i32
  }
}

</mosaic_0001>

<bundles_post_ra>
// kernel: beta_vae_forward.10
= control target key start
LH: loop header
LB: loop body
LE: loop exit
PB: predicated region body
PF: predicated region fallthrough
CT: control target
= control target key end

     0   :  { %s1119_s12 = smov 0   ;;  %s1295_s0 = inlined_call_operand.vmem [shape: bf16[2,90,16], index: 0, kind: input, shape index: {}]   ;;  %s1296_s1 = inlined_call_operand.vmem [shape: bf16[4,16,8], index: 1, kind: input, shape index: {}]   ;;  %s1297_s2 = inlined_call_operand.vmem [shape: f32[1,8], index: 2, kind: input, shape index: {}]   ;;  %s1298_s3 = inlined_call_operand.vmem [shape: bf16[2,72,8], index: 3, kind: output, shape index: {}]  }
   0x1 LB: > { %s879_s13 = sadd.s32 4294967295, %s1095_s12   ;;  %p883_p0 = scmp.ge.s32.totalorder %s1095_s12, 1  ;;  %s1095_s12 = sphi %s1119_s12, %s13_s12  }
   0x2   : > { %p137_p1 = scmp.lt.s32.totalorder %s1095_s12, 3 }
   0x4   : > { %p138_p2 = pnand %p883_p0, %p137_p1 }
   0x5   : > { %v1073_v0 = vld [vmem:[%s1296_s1 + $0x8] sm:$0xff] (!%p138_p2)   ;;  %v1097_v1 = vmov (!%p138_p2), 0.0   ;;  %v1074_v2 = vld [vmem:[%s1296_s1] sm:$0xff] (!%p138_p2)   ;;  %vm1098_vm0 = vmmov (!%p138_p2), 0   ;;  %p161_p3 = scmp.lt.s32.totalorder (!%p138_p2), %s879_s13, 1  ;;  %vm258_vm1 = vcmask (!%p138_p2), 130048  }
   0x6   : > { %141 = sbr.rel (%p138_p2) target bundleno = 321 (0x141), region = 32  ;;  %973 = vmatprep.subr.bf16.mxu0 (!%p138_p2), %v1097_v1  ;;  %995 = vmatprep.subr.bf16.mxu1 (!%p138_p2), %v1097_v1  ;;  %v1078_v3 = vld [vmem:[%s1296_s1 + $0x18] sm:$0xff] (!%p138_p2)   ;;  %vm212_vm2 = vsmask.f32 (!%p138_p2), 7424  ;;  %v1077_v13 = vld [vmem:[%s1296_s1 + $0x10] sm:$0xff] (!%p138_p2)   ;;  %vm622_vm3 = vcmask (!%p138_p2), 1046528  }
   0x7   : > { %974 = vmatpush3.bf16.msra.mxu0 (!%p138_p2), %v1073_v0  ;;  %997 = vmatprep.mubr.msk.bf16.mxu1 (!%p138_p2), %vm1098_vm0, %v1097_v1  ;;  %vm814_vm5 = vcmask (!%p138_p2), 60416  }
   0x8   : > { %996 = vmatpush3.bf16.msra.mxu1 (!%p138_p2), %v1074_v2  ;;  %975 = vmatprep.mubr.msk.bf16.mxu0 (!%p138_p2), %vm1098_vm0, %v1097_v1 }
   0x9   : > { %1017 = vmatprep.subr.bf16.mxu0 (!%p138_p2), %v1097_v1  ;;  %1039 = vmatprep.subr.bf16.mxu1 (!%p138_p2), %v1097_v1 }
   0xd   : > { %s1300_s13 = smov (!%p161_p3, %s879_s13), 1 }
   0xe   : > { %s1061_s18 = smul.u32 48, %s1300_s13 }
   0xf   : > { %s1062_s28 = smul.u32 36, %s1300_s13 }
  0x10   : > { %s1147_s21 = scalar_lea.vmem %s1295_s0, %s1061_s18 }
  0x11   : > { %v1075_v4 = vld [vmem:[%s1147_s21] sm:$0xff]   ;;  %v1076_v5 = vld [vmem:[%s1147_s21 + $0x8] sm:$0xff]   ;;  %v1079_v9 = vld [vmem:[%s1147_s21 + $0x10] sm:$0xff]   ;;  %s1259_s4 = scalar_lea.vmem %s1298_s3, %s1062_s28 }
  0x12   : > { %998 = vmatmul.mubr.msk.bf16.vlgmr.msra.gmra.mrb[0].mxu1 %vm258_vm1, %v1075_v4  ;;  %v214_v6 = vshrl.u32 %v1075_v4, 16  ;;  %v216_v7 = vshll.u32 %v1075_v4, 16  ;;  %v221_v8 = vshll.u32 %v1076_v5, 16  ;;  %v225_v14 = vshrl.u32 %v1076_v5, 16  ;;  %v1080_v19 = vld [vmem:[%s1147_s21 + $0x18] sm:$0xff]   ;;  %v1084_v39 = vld [vmem:[%s1147_s21 + $0xc] sm:$0xff]  }
  0x13   : > { %1040 = vmatpush3.bf16.msra.mxu1 %v1078_v3  ;;  %1001 = vmatprep.mubr.msk.bf16.mxu1 %vm1098_vm0, %v1097_v1  ;;  %v229_v15 = vshll.u32 %v1079_v9, 16  ;;  %v233_v21 = vshrl.u32 %v1079_v9, 16  ;;  %v237_v22 = vshll.u32 %v1080_v19, 16  ;;  %v180_v23 = vld [vmem:[%s1147_s21 + $0x20] sm:$0xf]  ;;  %v241_v29 = vshrl.u32 %v1080_v19, 16 }
  0x14   : > { %v218_v10 = vrot.slane %v216_v7, 1  ;;  %v223_v11 = vrot.slane %v221_v8, 1  ;;  %v183_v24 = vld [vmem:[%s1147_s21 + $0x24] sm:$0x1]  ;;  %v437_v34 = vld [vmem:[%s1147_s21 + $0x8] sm:$0xf]  ;;  %v899_v38 = vcombine.low %v180_v23, %v180_v23 }
  0x15   : > { %v231_v18 = vrot.slane %v229_v15, 1  ;;  %v239_v26 = vrot.slane %v237_v22, 1  ;;  %v892_v27 = vcombine.low %v180_v23, %v183_v24  ;;  %v436_v33 = vld [vmem:[%s1147_s21 + $0x4] sm:$0xf]  ;;  %v624_v44 = vrot.slane %v1084_v39, 1  ;;  %v1086_v50 = vld [vmem:[%s1147_s21 + $0x14] sm:$0xff]  }
  0x16   : > { %v219_v12 = vor.u32 %v218_v10, %v214_v6  ;;  %v227_v17 = vor.u32 %v225_v14, %v223_v11  ;;  %v615_v35 = vld [vmem:[%s1147_s21 + $0x4] sm:$0xe]  ;;  %v908_v37 = vcombine.low %v436_v33, %v437_v34  ;;  %v482_v48 = vshll.u32 %v1084_v39, 16  ;;  %v1087_v58 = vld [vmem:[%s1147_s21 + $0x1c] sm:$0xff]  }
  0x17   : > { %v235_v25 = vor.u32 %v233_v21, %v231_v18  ;;  %v245_v30 = vshll.u32 %v892_v27, 16  ;;  %v243_v31 = vor.u32 %v241_v29, %v239_v26  ;;  %v921_v40 = vcombine.low %v615_v35, %v437_v34  ;;  %v1088_v3 = vld [vmem:[%s1147_s21 + $0x24] sm:$0x1f]  }
  0x18   : > { %v224_v16 = vsel %vm212_vm2, %v219_v12, %v223_v11  ;;  %v232_v20 = vsel %vm212_vm2, %v227_v17, %v231_v18  ;;  %v249_v41 = vshrl.u32 %v892_v27, 16  ;;  %v477_v42 = vshll.u32 %v908_v37, 16 }
  0x19   : > { %976 = vmatmul.mubr.msk.bf16.vlgmr.msra.gmra.mrb[0].mxu0 %vm258_vm1, %v224_v16  ;;  %v240_v28 = vsel %vm212_vm2, %v235_v25, %v239_v26  ;;  %v247_v32 = vrot.slane %v245_v30, 1  ;;  %v623_v43 = vrot.slane %v921_v40, 1  ;;  %v475_v46 = vshrl.u32 %v908_v37, 16 }
  0x1a   : > { %1018 = vmatpush3.bf16.msra.mxu0 %v1077_v13  ;;  %979 = vmatprep.mubr.msk.bf16.mxu0 %vm1098_vm0, %v1097_v1  ;;  %v479_v47 = vrot.slane %v477_v42, 1  ;;  %v484_v52 = vrot.slane %v482_v48, 1  ;;  %v626_v53 = vrot.slane %v1086_v50, 1  ;;  %v486_v55 = vshrl.u32 %v1084_v39, 16 }
  0x1b   : > { %1002 = vmatmul.mubr.msk.bf16.gmra.mrb[4].mxu1 %vm258_vm1, %v1076_v5  ;;  %v248_v36 = vsel %vm212_vm2, %v243_v31, %v247_v32  ;;  %v251_v45 = vor.u32 %v249_v41, %v247_v32  ;;  %v625_v49 = vsel %vm622_vm3, %v623_v43, %v624_v44  ;;  %v490_v56 = vshll.u32 %v1086_v50, 16 }
  0x1c   : > { %1005 = vmatprep.mubr.msk.bf16.mxu1 %vm1098_vm0, %v1097_v1  ;;  %v480_v51 = vor.u32 %v479_v47, %v475_v46  ;;  %v627_v57 = vsel %vm622_vm3, %v624_v44, %v626_v53  ;;  %v488_v59 = vor.u32 %v486_v55, %v484_v52  ;;  %v628_v61 = vrot.slane %v1087_v58, 1 }
  0x1d   : > { %v492_v60 = vrot.slane %v490_v56, 1  ;;  %v494_v63 = vshrl.u32 %v1086_v50, 16  ;;  %v498_v0 = vshll.u32 %v1087_v58, 16  ;;  %v630_v6 = vrot.slane %v1088_v3, 1 }
  0x1e   : > { %v485_v54 = vsel %vm212_vm2, %v480_v51, %v484_v52  ;;  %v629_v2 = vsel %vm622_vm3, %v626_v53, %v628_v61  ;;  %v502_v8 = vshrl.u32 %v1087_v58, 16  ;;  %v510_v14 = vshrl.u32 %v1088_v3, 16 }
  0x1f   : > { %v493_v62 = vsel %vm212_vm2, %v488_v59, %v492_v60  ;;  %v496_v4 = vor.u32 %v494_v63, %v492_v60  ;;  %v500_v5 = vrot.slane %v498_v0, 1  ;;  %v631_v10 = vsel %vm622_vm3, %v628_v61, %v630_v6 }
  0x21   : > { %980 = vmatmul.mubr.msk.bf16.gmra.mrb[4].mxu0 %vm258_vm1, %v232_v20  ;;  %v501_v7 = vsel %vm212_vm2, %v496_v4, %v500_v5  ;;  %v504_v11 = vor.u32 %v502_v8, %v500_v5  ;;  %v1251_v8 = vld [vmem:[%s1297_s2] ss:$0 sm:$0xff] }
  0x22   : > { %983 = vmatprep.mubr.msk.bf16.mxu0 %vm1098_vm0, %v1097_v1 }
  0x23   : > { %1006 = vmatmul.mubr.msk.bf16.gmra.mrb[8].mxu1 %vm258_vm1, %v1079_v9  ;;  %v506_v9 = vshll.u32 %v1088_v3, 16 }
  0x24   : > { %1009 = vmatprep.mubr.msk.bf16.mxu1 %vm1098_vm0, %v1097_v1 }
  0x25   : > { %v508_v12 = vrot.slane %v506_v9, 1 }
  0x27   : > { %v509_v13 = vsel %vm212_vm2, %v504_v11, %v508_v12  ;;  %v512_v15 = vor.u32 %v510_v14, %v508_v12 }
  0x29   : > { %984 = vmatmul.mubr.msk.bf16.gmra.mrb[8].mxu0 %vm258_vm1, %v240_v28 }
  0x2a   : > { %987 = vmatprep.mubr.msk.bf16.mxu0 %vm1098_vm0, %v1097_v1 }
  0x2b   : > { %1010 = vmatmul.mubr.msk.bf16.gmra.mrb[12].mxu1 %vm258_vm1, %v1080_v19 }
  0x2c   : > { %1013 = vmatprep.mubr.msk.bf16.mxu1 %vm1098_vm0, %v1097_v1 }
  0x31   : > { %988 = vmatmul.mubr.msk.bf16.gmra.mrb[12].mxu0 %vm258_vm1, %v248_v36 }
  0x32   : > { %991 = vmatprep.mubr.msk.bf16.mxu0 %vm1098_vm0, %v1097_v1 }
  0x33   : > { %1014 = vmatmul.mubr.msk.bf16.gmra.mrb[16].mxu1 %vm258_vm1, %v899_v38 }
  0x34   : > { %1041 = vmatprep.mubr.msk.bf16.mxu1 %vm1098_vm0, %v1097_v1 }
  0x39   : > { %992 = vmatmul.mubr.msk.bf16.gmra.mrb[16].mxu0 %vm258_vm1, %v251_v45 }
  0x3a   : > { %1019 = vmatprep.mubr.msk.bf16.mxu0 %vm1098_vm0, %v1097_v1 }
  0x3b   : > { %1042 = vmatmul.mubr.msk.bf16.vlgmr.msra.gmra.mrb[20].mxu1 %vm258_vm1, %v625_v49 }
  0x3c   : > { %1045 = vmatprep.mubr.msk.bf16.mxu1 %vm1098_vm0, %v1097_v1 }
  0x41   : > { %1020 = vmatmul.mubr.msk.bf16.vlgmr.msra.gmra.mrb[20].mxu0 %vm258_vm1, %v485_v54 }
  0x42   : > { %1023 = vmatprep.mubr.msk.bf16.mxu0 %vm1098_vm0, %v1097_v1 }
  0x43   : > { %1046 = vmatmul.mubr.msk.bf16.gmra.mrb[24].mxu1 %vm258_vm1, %v627_v57 }
  0x44   : > { %1049 = vmatprep.mubr.msk.bf16.mxu1 %vm1098_vm0, %v1097_v1 }
  0x49   : > { %1024 = vmatmul.mubr.msk.bf16.gmra.mrb[24].mxu0 %vm258_vm1, %v493_v62 }
  0x4a   : > { %1027 = vmatprep.mubr.msk.bf16.mxu0 %vm1098_vm0, %v1097_v1 }
  0x4b   : > { %1050 = vmatmul.mubr.msk.bf16.gmra.mrb[28].mxu1 %vm258_vm1, %v629_v2 }
  0x4c   : > { %1053 = vmatprep.mubr.msk.bf16.mxu1 %vm1098_vm0, %v1097_v1 }
  0x51   : > { %1028 = vmatmul.mubr.msk.bf16.gmra.mrb[28].mxu0 %vm258_vm1, %v501_v7 }
  0x52   : > { %1031 = vmatprep.mubr.msk.bf16.mxu0 %vm1098_vm0, %v1097_v1 }
  0x53   : > { %1054 = vmatmul.mubr.msk.bf16.gmra.mrb[32].mxu1 %vm258_vm1, %v631_v10 }
  0x54   : > { %1057 = vmatprep.mubr.msk.bf16.mxu1 %vm1098_vm0, %v1097_v1 }
  0x59   : > { %1032 = vmatmul.mubr.msk.bf16.gmra.mrb[32].mxu0 %vm258_vm1, %v509_v13 }
  0x5a   : > { %1035 = vmatprep.mubr.msk.bf16.mxu0 %vm1098_vm0, %v1097_v1 }
  0x5b   : > { %1058 = vmatmul.mubr.msk.bf16.gmra.mrb[36].mxu1 %vm258_vm1, %v630_v6 }
  0x61   : > { %1036 = vmatmul.mubr.msk.bf16.gmra.mrb[36].mxu0 %vm258_vm1, %v512_v15 }
  0xe5   : > { %v398_v16 = vpop.f32.mrb[0].mxu1 }
  0xe6   : > { %v999_v17 = vpop.f32.mrb[1].mxu1 }
  0xe7   : > { %v401_v18 = vpop.f32.mrb[2].mxu1 }
  0xe8   : > { %v1000_v19 = vpop.f32.mrb[3].mxu1 }
  0xec   : > { %v308_v20 = vpop.f32.mrb[0].mxu0 }
  0xed   : > { %v399_v21 = vadd.f32 %v398_v16, %v308_v20  ;;  %v977_v22 = vpop.f32.mrb[1].mxu0 }
  0xee   : > { %v311_v23 = vpop.f32.mrb[2].mxu0  ;;  %v406_v24 = vpop.f32.mrb[4].mxu1 }
  0xef   : > { %v402_v25 = vadd.f32 %v401_v18, %v311_v23  ;;  %v978_v26 = vpop.f32.mrb[3].mxu0  ;;  %v1003_v27 = vpop.f32.mrb[5].mxu1 }
  0xf0   : > { %v409_v28 = vpop.f32.mrb[6].mxu1 }
  0xf1   : > { %v1004_v29 = vpop.f32.mrb[7].mxu1 }
  0xf4   : > { %v316_v1 = vpop.f32.mrb[4].mxu0 }
  0xf5   : > { %v407_v30 = vadd.f32 %v406_v24, %v316_v1  ;;  %v981_v31 = vpop.f32.mrb[5].mxu0 }
  0xf6   : > { %v319_v32 = vpop.f32.mrb[6].mxu0  ;;  %v414_v33 = vpop.f32.mrb[8].mxu1 }
  0xf7   : > { %v1236_v34 = vadd.f32 %v409_v28, %v319_v32  ;;  %v982_v35 = vpop.f32.mrb[7].mxu0  ;;  %v1007_v36 = vpop.f32.mrb[9].mxu1 }
  0xf8   : > { %v417_v37 = vpop.f32.mrb[10].mxu1 }
  0xf9   : > { %v1008_v38 = vpop.f32.mrb[11].mxu1 }
  0xfc   : > { %v324_v39 = vpop.f32.mrb[8].mxu0 }
  0xfd   : > { %v1238_v40 = vadd.f32 %v414_v33, %v324_v39  ;;  %v985_v41 = vpop.f32.mrb[9].mxu0 }
  0xfe   : > { %v327_v42 = vpop.f32.mrb[10].mxu0  ;;  %v422_v43 = vpop.f32.mrb[12].mxu1 }
  0xff   : > { %v1240_v44 = vadd.f32 %v417_v37, %v327_v42  ;;  %v986_v45 = vpop.f32.mrb[11].mxu0  ;;  %v1011_v46 = vpop.f32.mrb[13].mxu1 }
 0x100   : > { %v425_v47 = vpop.f32.mrb[14].mxu1 }
 0x101   : > { %v1012_v48 = vpop.f32.mrb[15].mxu1 }
 0x104   : > { %v332_v49 = vpop.f32.mrb[12].mxu0 }
 0x105   : > { %v1242_v50 = vadd.f32 %v422_v43, %v332_v49  ;;  %v989_v51 = vpop.f32.mrb[13].mxu0 }
 0x106   : > { %v335_v52 = vpop.f32.mrb[14].mxu0  ;;  %v430_v53 = vpop.f32.mrb[16].mxu1 }
 0x107   : > { %v1244_v54 = vadd.f32 %v425_v47, %v335_v52  ;;  %v990_v55 = vpop.f32.mrb[15].mxu0  ;;  %v1015_v56 = vpop.f32.mrb[17].mxu1 }
 0x108   : > { %v433_v57 = vpop.f32.mrb[18].mxu1 }
 0x109   : > { %v1016_v58 = vpop.f32.mrb[19].mxu1 }
 0x10c   : > { %v340_v59 = vpop.f32.mrb[16].mxu0 }
 0x10d   : > { %v1246_v60 = vadd.f32 %v430_v53, %v340_v59  ;;  %v993_v61 = vpop.f32.mrb[17].mxu0 }
 0x10e   : > { %v343_v62 = vpop.f32.mrb[18].mxu0  ;;  %v687_v63 = vpop.f32.mrb[20].mxu1 }
 0x10f   : > { %v994_v0 = vpop.f32.mrb[19].mxu0  ;;  %v1043_v2 = vpop.f32.mrb[21].mxu1 }
 0x110   : > { %v690_v3 = vpop.f32.mrb[22].mxu1 }
 0x111   : > { %v1044_v4 = vpop.f32.mrb[23].mxu1 }
 0x114   : > { %v568_v5 = vpop.f32.mrb[20].mxu0 }
 0x115   : > { %v606_v6 = vadd.f32 %v568_v5, %v399_v21  ;;  %v1021_v7 = vpop.f32.mrb[21].mxu0 }
 0x116   : > { %v571_v9 = vpop.f32.mrb[22].mxu0  ;;  %v695_v10 = vpop.f32.mrb[24].mxu1 }
 0x117   : > { %v725_v11 = vadd.f32 %v687_v63, %v606_v6  ;;  %v607_v12 = vadd.f32 %v571_v9, %v402_v25  ;;  %v1022_v13 = vpop.f32.mrb[23].mxu0  ;;  %v1047_v14 = vpop.f32.mrb[25].mxu1 }
 0x118   : > { %v698_v15 = vpop.f32.mrb[26].mxu1 }
 0x119   : > { %v741_v16 = vadd.f32 %v1251_v8, %v725_v11  ;;  %v726_v17 = vadd.f32 %v690_v3, %v607_v12  ;;  %v1048_v18 = vpop.f32.mrb[27].mxu1 }
 0x11b   : > { %vm750_vm4 = vcmp.ge.f32.partialorder %v741_v16, 0.0  ;;  %v759_v19 = vmul.f32 0.01, %v741_v16  ;;  %v742_v20 = vadd.f32 %v1251_v8, %v726_v17 }
 0x11c   : > { %v576_v21 = vpop.f32.mrb[24].mxu0 }
 0x11d   : > { %v768_v22 = vsel %vm750_vm4, %v741_v16, %v759_v19  ;;  %vm751_vm6 = vcmp.ge.f32.partialorder %v742_v20, 0.0  ;;  %v760_v23 = vmul.f32 0.01, %v742_v20  ;;  %v608_v24 = vadd.f32 %v576_v21, %v407_v30  ;;  %v1025_v25 = vpop.f32.mrb[25].mxu0 }
 0x11e   : > { %v940_v26 = vpack.c.bf16 %v768_v22, %v768_v22  ;;  %v579_v27 = vpop.f32.mrb[26].mxu0  ;;  %v703_v28 = vpop.f32.mrb[28].mxu1 }
 0x11f   : > { %v769_v29 = vsel %vm751_vm6, %v742_v20, %v760_v23  ;;  %v727_v1 = vadd.f32 %v695_v10, %v608_v24  ;;  %v609_v31 = vadd.f32 %v579_v27, %v1236_v34  ;;  %v1026_v32 = vpop.f32.mrb[27].mxu0  ;;  %v1051_v33 = vpop.f32.mrb[29].mxu1 }
 0x120   : > { %815 = vst.msk [vmem:[%s1259_s4] sm:$0xf] %vm814_vm5, %v940_v26  ;;  %v941_v35 = vpack.c.bf16 %v769_v29, %v769_v29  ;;  %v706_v36 = vpop.f32.mrb[30].mxu1 }
 0x121   : > { %v743_v37 = vadd.f32 %v1251_v8, %v727_v1  ;;  %v728_v38 = vadd.f32 %v698_v15, %v609_v31  ;;  %v1052_v39 = vpop.f32.mrb[31].mxu1 }
 0x122   : > { %816 = vst.msk [vmem:[%s1259_s4 + $0x4] sm:$0xf] %vm814_vm5, %v941_v35 }
 0x123   : > { %vm752_vm7 = vcmp.ge.f32.partialorder %v743_v37, 0.0  ;;  %v761_v30 = vmul.f32 0.01, %v743_v37  ;;  %v744_v41 = vadd.f32 %v1251_v8, %v728_v38 }
 0x124   : > { %v584_v42 = vpop.f32.mrb[28].mxu0 }
 0x125   : > { %v770_v43 = vsel %vm752_vm7, %v743_v37, %v761_v30  ;;  %vm753_vm8 = vcmp.ge.f32.partialorder %v744_v41, 0.0  ;;  %v762_v34 = vmul.f32 0.01, %v744_v41  ;;  %v610_v45 = vadd.f32 %v584_v42, %v1238_v40  ;;  %v1029_v46 = vpop.f32.mrb[29].mxu0 }
 0x126   : > { %v942_v47 = vpack.c.bf16 %v770_v43, %v770_v43  ;;  %v587_v48 = vpop.f32.mrb[30].mxu0  ;;  %v711_v49 = vpop.f32.mrb[32].mxu1 }
 0x127   : > { %v771_v51 = vsel %vm753_vm8, %v744_v41, %v762_v34  ;;  %v729_v52 = vadd.f32 %v703_v28, %v610_v45  ;;  %v611_v53 = vadd.f32 %v587_v48, %v1240_v44  ;;  %v1030_v55 = vpop.f32.mrb[31].mxu0  ;;  %v1055_v56 = vpop.f32.mrb[33].mxu1 }
 0x128   : > { %817 = vst.msk [vmem:[%s1259_s4 + $0x8] sm:$0xf] %vm814_vm5, %v942_v47  ;;  %v943_v57 = vpack.c.bf16 %v771_v51, %v771_v51  ;;  %v714_v58 = vpop.f32.mrb[34].mxu1 }
 0x129   : > { %v745_v59 = vadd.f32 %v1251_v8, %v729_v52  ;;  %v730_v61 = vadd.f32 %v706_v36, %v611_v53  ;;  %v1056_v62 = vpop.f32.mrb[35].mxu1 }
 0x12a   : > { %818 = vst.msk [vmem:[%s1259_s4 + $0xc] sm:$0xf] %vm814_vm5, %v943_v57 }
 0x12b   : > { %vm754_vm9 = vcmp.ge.f32.partialorder %v745_v59, 0.0  ;;  %v763_v40 = vmul.f32 0.01, %v745_v59  ;;  %v746_v63 = vadd.f32 %v1251_v8, %v730_v61 }
 0x12c   : > { %v592_v0 = vpop.f32.mrb[32].mxu0 }
 0x12d   : > { %v772_v2 = vsel %vm754_vm9, %v745_v59, %v763_v40  ;;  %vm755_vm10 = vcmp.ge.f32.partialorder %v746_v63, 0.0  ;;  %v764_v44 = vmul.f32 0.01, %v746_v63  ;;  %v612_v3 = vadd.f32 %v592_v0, %v1242_v50  ;;  %v1033_v4 = vpop.f32.mrb[33].mxu0 }
 0x12e   : > { %v944_v5 = vpack.c.bf16 %v772_v2, %v772_v2  ;;  %v595_v6 = vpop.f32.mrb[34].mxu0  ;;  %v719_v7 = vpop.f32.mrb[36].mxu1 }
 0x12f   : > { %v773_v9 = vsel %vm755_vm10, %v746_v63, %v764_v44  ;;  %v731_v10 = vadd.f32 %v711_v49, %v612_v3  ;;  %v613_v11 = vadd.f32 %v595_v6, %v1244_v54  ;;  %v1034_v12 = vpop.f32.mrb[35].mxu0  ;;  %v1059_v13 = vpop.f32.mrb[37].mxu1 }
 0x130   : > { %819 = vst.msk [vmem:[%s1259_s4 + $0x10] sm:$0xf] %vm814_vm5, %v944_v5  ;;  %v945_v14 = vpack.c.bf16 %v773_v9, %v773_v9  ;;  %v722_v15 = vpop.f32.mrb[38].mxu1 }
 0x131   : > { %v747_v16 = vadd.f32 %v1251_v8, %v731_v10  ;;  %v732_v17 = vadd.f32 %v714_v58, %v613_v11  ;;  %v1060_v18 = vpop.f32.mrb[39].mxu1 }
 0x132   : > { %820 = vst.msk [vmem:[%s1259_s4 + $0x14] sm:$0xf] %vm814_vm5, %v945_v14 }
 0x133   : > { %vm756_vm11 = vcmp.ge.f32.partialorder %v747_v16, 0.0  ;;  %v765_v50 = vmul.f32 0.01, %v747_v16  ;;  %v748_v19 = vadd.f32 %v1251_v8, %v732_v17 }
 0x134   : > { %v600_v20 = vpop.f32.mrb[36].mxu0 }
 0x135   : > { %v774_v54 = vsel %vm756_vm11, %v747_v16, %v765_v50  ;;  %vm757_vm12 = vcmp.ge.f32.partialorder %v748_v19, 0.0  ;;  %v766_v21 = vmul.f32 0.01, %v748_v19  ;;  %v614_v22 = vadd.f32 %v600_v20, %v1246_v60  ;;  %v1037_v23 = vpop.f32.mrb[37].mxu0 }
 0x136   : > { %v946_v24 = vpack.c.bf16 %v774_v54, %v774_v54  ;;  %v603_v25 = vpop.f32.mrb[38].mxu0 }
 0x137   : > { %v775_v26 = vsel %vm757_vm12, %v748_v19, %v766_v21  ;;  %v733_v27 = vadd.f32 %v719_v7, %v614_v22  ;;  %v1038_v28 = vpop.f32.mrb[39].mxu0 }
 0x138   : > { %821 = vst.msk [vmem:[%s1259_s4 + $0x18] sm:$0xf] %vm814_vm5, %v946_v24  ;;  %v947_v29 = vpack.c.bf16 %v775_v26, %v775_v26 }
 0x139   : > { %v749_v1 = vadd.f32 %v1251_v8, %v733_v27 }
 0x13a   : > { %822 = vst.msk [vmem:[%s1259_s4 + $0x1c] sm:$0xf] %vm814_vm5, %v947_v29 }
 0x13b   : > { %vm758_vm13 = vcmp.ge.f32.partialorder %v749_v1, 0.0  ;;  %v767_v31 = vmul.f32 0.01, %v749_v1 }
 0x13d   : > { %v776_v32 = vsel %vm758_vm13, %v749_v1, %v767_v31 }
 0x13e   : > { %v948_v33 = vpack.c.bf16 %v776_v32, %v776_v32 }
 0x140   : > { %823 = vst.msk [vmem:[%s1259_s4 + $0x20] sm:$0xf] %vm814_vm5, %v948_v33 }
 0x141 PF: > { %s13_s12 = sadd.s32 1, %s1095_s12  }
 0x142   : > { %p10_p4 = scmp.ge.s32.totalorder %s13_s12, 4  }
 0x144   :  { %12 = sbr.rel (!%p10_p4) target bundleno = 1 (0x1), region = 65 }

// kernel: beta_vae_forward.11
= control target key start
LH: loop header
LB: loop body
LE: loop exit
PB: predicated region body
PF: predicated region fallthrough
CT: control target
= control target key end

     0   :  { %s2001_s12 = smov 0   ;;  %s2431_s0 = inlined_call_operand.vmem [shape: bf16[2,110,8], index: 0, kind: input, shape index: {}]   ;;  %s2432_s1 = inlined_call_operand.vmem [shape: bf16[9,8,8], index: 1, kind: input, shape index: {}]   ;;  %s2433_s2 = inlined_call_operand.vmem [shape: f32[1,8], index: 2, kind: input, shape index: {}]   ;;  %s2434_s3 = inlined_call_operand.vmem [shape: bf16[2,80,8], index: 3, kind: output, shape index: {}]  }
   0x1 LB: > { %s1576_s13 = sadd.s32 4294967295, %s1977_s12   ;;  %p1580_p0 = scmp.ge.s32.totalorder %s1977_s12, 1  ;;  %s1977_s12 = sphi %s2001_s12, %s13_s12  }
   0x2   : > { %p137_p1 = scmp.lt.s32.totalorder %s1977_s12, 3 }
   0x4   : > { %p138_p2 = pnand %p1580_p0, %p137_p1 }
   0x5   : > { %v1583_v0 = vld [vmem:[%s2432_s1 + $0x4] sm:$0xf] (!%p138_p2)  ;;  %vm275_vm0 = vcmask (!%p138_p2), 1043456   ;;  %p161_p3 = scmp.lt.s32.totalorder (!%p138_p2), %s1576_s13, 1  ;;  %v1979_v1 = vmov (!%p138_p2), 0.0   ;;  %vm1980_vm1 = vmmov (!%p138_p2), 0  }
   0x6   : > { %141 = sbr.rel (%p138_p2) target bundleno = 427 (0x1ab), region = 32  ;;  %1736 = vmatprep.subr.bf16.mxu0 (!%p138_p2), %v1979_v1  ;;  %1934 = vmatprep.subr.bf16.mxu1 (!%p138_p2), %v1979_v1  ;;  %v277_v2 = vsel (!%p138_p2), %vm275_vm0, %v1583_v0, 0  ;;  %vm214_vm2 = vsmask.f32 (!%p138_p2), 7424  ;;  %v1600_v13 = vld [vmem:[%s2432_s1 + $0x8] sm:$0xf] (!%p138_p2) }
   0x7   : > { %1737 = vmatpush3.bf16.msra.mxu0 (!%p138_p2), %v277_v2  ;;  %1935 = vmatpush3.bf16.msra.mxu1 (!%p138_p2), %v277_v2  ;;  %vm259_vm3 = vcmask (!%p138_p2), 64512   ;;  %v182_v22 = vld [vmem:[%s2432_s1] sm:$0xf] (!%p138_p2)  ;;  %v472_v26 = vsel (!%p138_p2), %vm275_vm0, %v1600_v13, 0  ;;  %vm444_vm4 = vcmask (!%p138_p2), 1046528   ;;  %vm877_vm6 = vcmask (!%p138_p2), 1045504  }
   0x8   : > { %1738 = vmatprep.mubr.msk.bf16.mxu0 (!%p138_p2), %vm1980_vm1, %v1979_v1  ;;  %1750 = vmatprep.mubr.msk.bf16.mxu1 (!%p138_p2), %vm1980_vm1, %v1979_v1  ;;  %v363_v31 = vsel (!%p138_p2), %vm275_vm0, %v182_v22, 0  ;;  %v1607_v48 = vld [vmem:[%s2432_s1 + $0xc] sm:$0xf] (!%p138_p2)  ;;  %v1619_v53 = vld [vmem:[%s2432_s1 + $0x10] sm:$0xf] (!%p138_p2)  ;;  %vm1310_vm8 = vcmask (!%p138_p2), 1044480  }
   0x9   : > { %1780 = vmatprep.subr.bf16.mxu0 (!%p138_p2), %v1979_v1  ;;  %1758 = vmatprep.subr.bf16.mxu1 (!%p138_p2), %v1979_v1  ;;  %v625_v50 = vsel (!%p138_p2), %vm275_vm0, %v1607_v48, 0  ;;  %v786_v55 = vsel (!%p138_p2), %vm275_vm0, %v1619_v53, 0  ;;  %vm716_vm5 = vsmask.f32 (!%p138_p2), 6400  ;;  %vm1149_vm7 = vsmask.f32 (!%p138_p2), 5376 }
   0xa   : > { %vm1510_vm10 = vcmask (!%p138_p2), 60416  }
   0xd   : > { %s2436_s13 = smov (!%p161_p3, %s1576_s13), 1 }
   0xe   : > { %s1936_s16 = smul.u32 56, %s2436_s13 }
   0xf   : > { %s1937_s11 = smul.u32 40, %s2436_s13 }
  0x10   : > { %s2027_s19 = scalar_lea.vmem %s2431_s0, %s1936_s16 }
  0x11   : > { %v172_v3 = vld [vmem:[%s2027_s19] sm:$0xf]  ;;  %v2031_v4 = vld [vmem:[%s2027_s19 + $0x4] sm:$0xf]  ;;  %v2037_v6 = vld [vmem:[%s2027_s19 + $0x8] sm:$0xff]   ;;  %s2392_s16 = scalar_lea.vmem %s2434_s3, %s1937_s11 }
  0x12   : > { %v2034_v5 = vcombine.low %v172_v3, %v2031_v4  ;;  %v223_v9 = vshll.u32 %v2037_v6, 16  ;;  %v2043_v10 = vld [vmem:[%s2027_s19 + $0x18] sm:$0xff]   ;;  %v2046_v11 = vld [vmem:[%s2027_s19 + $0x20] sm:$0xff]   ;;  %v2049_v12 = vld [vmem:[%s2027_s19 + $0x10] sm:$0xff]   ;;  %v227_v23 = vshrl.u32 %v2037_v6, 16  ;;  %v446_v52 = vrot.slane %v2037_v6, 1 }
  0x13   : > { %v239_v16 = vshll.u32 %v2043_v10, 16  ;;  %v243_v17 = vshrl.u32 %v2043_v10, 16  ;;  %v247_v18 = vshll.u32 %v2046_v11, 16  ;;  %v2058_v19 = vld [vmem:[%s2027_s19 + $0x28] ss:$0 sps:$4 sm:$0x11]  }
  0x14   : > { %v216_v7 = vshrl.u32 %v2034_v5, 16  ;;  %v218_v8 = vshll.u32 %v2034_v5, 16  ;;  %v225_v15 = vrot.slane %v223_v9, 1  ;;  %v231_v24 = vshll.u32 %v2049_v12, 16  ;;  %v2082_v39 = vld [vmem:[%s2027_s19 + $0x24] sm:$0xff]   ;;  %v2153_v2 = vld [vmem:[%s2027_s19 + $0xc] sm:$0xff]  }
  0x15   : > { %v241_v21 = vrot.slane %v239_v16, 1  ;;  %v249_v25 = vrot.slane %v247_v18, 1  ;;  %v251_v29 = vshrl.u32 %v2046_v11, 16  ;;  %v255_v30 = vshll.u32 %v2058_v19, 16  ;;  %v438_v43 = vld [vmem:[%s2027_s19] sm:$0xe] }
  0x16   : > { %v220_v14 = vrot.slane %v218_v8, 1  ;;  %v229_v33 = vor.u32 %v227_v23, %v225_v15  ;;  %v233_v34 = vrot.slane %v231_v24, 1  ;;  %v235_v38 = vshrl.u32 %v2049_v12, 16  ;;  %v1960_v40 = vld [vmem:[%s2027_s19 + $0x2c] ss:$0 sps:$4 sm:$0x11]  }
  0x17   : > { %v245_v28 = vor.u32 %v243_v17, %v241_v21  ;;  %v253_v35 = vor.u32 %v251_v29, %v249_v25  ;;  %v257_v36 = vrot.slane %v255_v30, 1  ;;  %v605_v44 = vrot.slane %v2082_v39, 1  ;;  %v557_v61 = vld [vmem:[%s2027_s19 + $0x4] sm:$0xe]  ;;  %v2148_v62 = vld [vmem:[%s2027_s19 + $0x8] sm:$0xf] }
  0x18   : > { %v221_v20 = vor.u32 %v220_v14, %v216_v7  ;;  %v234_v37 = vsel %vm214_vm2, %v229_v33, %v233_v34  ;;  %v237_v42 = vor.u32 %v235_v38, %v233_v34  ;;  %v607_v45 = vrot.slane %v1960_v40, 1  ;;  %v2172_v18 = vld [vmem:[%s2027_s19 + $0x14] sm:$0xff]   ;;  %v2192_v30 = vld [vmem:[%s2027_s19 + $0x1c] sm:$0xff]   ;;  %v2216_v48 = vld [vmem:[%s2027_s19 + $0x2c] ss:$0 sps:$4 sm:$0x33]  }
  0x19   : > { %v250_v32 = vsel %vm214_vm2, %v245_v28, %v249_v25  ;;  %v258_v41 = vsel %vm214_vm2, %v253_v35, %v257_v36  ;;  %v1601_v49 = vcombine.low %v438_v43, %v2031_v4  ;;  %v448_v56 = vrot.slane %v2049_v12, 1  ;;  %v1633_v24 = vld [vmem:[%s2432_s1 + $0x18] sm:$0xf]  ;;  %v871_v53 = vld [vmem:[%s2027_s19 + $0x4] sm:$0xc] }
  0x1a   : > { %v226_v27 = vsel %vm214_vm2, %v221_v20, %v225_v15  ;;  %1751 = vmatmul.mubr.msk.bf16.vlgmr.msra.gmra.mrb[0].mxu1 %vm259_vm3, %v250_v32  ;;  %v2097_v46 = vsel %vm444_vm4, %v605_v44, %v607_v45  ;;  %v242_v47 = vsel %vm214_vm2, %v237_v42, %v241_v21  ;;  %v450_v58 = vrot.slane %v2043_v10, 1 }
  0x1b   : > { %1739 = vmatmul.mubr.msk.bf16.vlgmr.msra.gmra.mrb[0].mxu0 %vm259_vm3, %v226_v27  ;;  %1759 = vmatpush3.bf16.msra.mxu1 %v363_v31  ;;  %v445_v51 = vrot.slane %v1601_v49, 1  ;;  %v449_v57 = vsel %vm444_vm4, %v446_v52, %v448_v56  ;;  %v452_v60 = vrot.slane %v2046_v11, 1  ;;  %v1608_v0 = vcombine.low %v557_v61, %v2148_v62 }
  0x1c   : > { %1781 = vmatpush3.bf16.msra.mxu0 %v472_v26  ;;  %1742 = vmatprep.mubr.msk.bf16.mxu0 %vm1980_vm1, %v1979_v1  ;;  %v451_v59 = vsel %vm444_vm4, %v448_v56, %v450_v58  ;;  %v454_v3 = vrot.slane %v2058_v19, 1  ;;  %v729_v7 = vshll.u32 %v2153_v2, 16  ;;  %v599_v9 = vrot.slane %v2153_v2, 1 }
  0x1d   : > { %1824 = vmatprep.subr.bf16.mxu0 %v1979_v1  ;;  %1754 = vmatprep.mubr.msk.bf16.mxu1 %vm1980_vm1, %v1979_v1  ;;  %v447_v54 = vsel %vm444_vm4, %v445_v51, %v446_v52  ;;  %v453_v63 = vsel %vm444_vm4, %v450_v58, %v452_v60  ;;  %v718_v4 = vshrl.u32 %v1608_v0, 16  ;;  %v598_v8 = vrot.slane %v1608_v0, 1  ;;  %v990_v58 = vld [vmem:[%s2027_s19 + $0x8] sm:$0xc] }
  0x1e   : > { %1802 = vmatprep.subr.bf16.mxu1 %v1979_v1  ;;  %v731_v16 = vrot.slane %v729_v7, 2  ;;  %v735_v21 = vshrl.u32 %v2172_v18, 16  ;;  %v738_v22 = vshll.u32 %v2172_v18, 16  ;;  %v601_v23 = vrot.slane %v2172_v18, 1  ;;  %v1652_v7 = vld [vmem:[%s2432_s1 + $0x20] sm:$0xf] }
  0x1f   : > { %v720_v13 = vrot.slane %v718_v4, 1  ;;  %v600_v17 = vsel %vm444_vm4, %v598_v8, %v599_v9  ;;  %v1058_v28 = vsel %vm275_vm0, %v1633_v24, 0  ;;  %v744_v32 = vshrl.u32 %v2192_v30, 16 }
  0x20   : > { %v737_v26 = vrot.slane %v735_v21, 1  ;;  %v740_v27 = vrot.slane %v738_v22, 2  ;;  %v602_v29 = vsel %vm444_vm4, %v599_v9, %v601_v23  ;;  %v747_v33 = vshll.u32 %v2192_v30, 16  ;;  %v2267_v9 = vld [vmem:[%s2027_s19 + $0x18] sm:$0xff]  }
  0x21   : > { %v603_v34 = vrot.slane %v2192_v30, 1  ;;  %v746_v36 = vrot.slane %v744_v32, 1  ;;  %v756_v42 = vshll.u32 %v2082_v39, 16  ;;  %v762_v51 = vshrl.u32 %v2216_v48, 16 }
  0x22   : > { %1755 = vmatmul.mubr.msk.bf16.gmra.mrb[4].mxu1 %vm259_vm3, %v258_v41  ;;  %v741_v31 = vor.u32 %v740_v27, %v737_v26  ;;  %v753_v41 = vshrl.u32 %v2082_v39, 16  ;;  %v765_v52 = vshll.u32 %v2216_v48, 16  ;;  %v1627_v56 = vcombine.low %v871_v53, %v2148_v62 }
  0x23   : > { %1743 = vmatmul.mubr.msk.bf16.gmra.mrb[4].mxu0 %vm259_vm3, %v234_v37  ;;  %1760 = vmatprep.mubr.msk.bf16.mxu1 %vm1980_vm1, %v1979_v1  ;;  %v749_v37 = vrot.slane %v747_v33, 2  ;;  %v604_v38 = vsel %vm444_vm4, %v601_v23, %v603_v34  ;;  %v606_v49 = vsel %vm444_vm4, %v603_v34, %v605_v44  ;;  %v879_v61 = vrot.slane %v2153_v2, 2 }
  0x24   : > { %1746 = vmatprep.mubr.msk.bf16.mxu0 %vm1980_vm1, %v1979_v1  ;;  %v755_v45 = vrot.slane %v753_v41, 1  ;;  %v887_v23 = vrot.slane %v2216_v48, 2 }
  0x25   : > { %v750_v40 = vor.u32 %v749_v37, %v746_v36 }
  0x27   : > { %v751_v43 = vsel %vm716_vm5, %v741_v31, %v750_v40 }
  0x2a   : > { %1761 = vmatmul.mubr.msk.bf16.vlgmr.msra.gmra.mrb[8].mxu1 %vm259_vm3, %v2034_v5  ;;  %v721_v5 = vshll.u32 %v1608_v0, 16 }
  0x2b   : > { %1747 = vmatmul.mubr.msk.bf16.gmra.mrb[8].mxu0 %vm259_vm3, %v242_v47  ;;  %1803 = vmatpush3.bf16.msra.mxu1 %v625_v50  ;;  %v758_v47 = vrot.slane %v756_v42, 2 }
  0x2c   : > { %1782 = vmatprep.mubr.msk.bf16.mxu0 %vm1980_vm1, %v1979_v1  ;;  %1764 = vmatprep.mubr.msk.bf16.mxu1 %vm1980_vm1, %v1979_v1  ;;  %v723_v14 = vrot.slane %v721_v5, 2 }
  0x2d   : > { %1846 = vmatprep.subr.bf16.mxu1 %v1979_v1  ;;  %v759_v50 = vor.u32 %v758_v47, %v755_v45 }
  0x2e   : > { %v724_v19 = vor.u32 %v723_v14, %v720_v13  ;;  %v1034_v13 = vrot.slane %v2267_v9, 2  ;;  %v883_v14 = vrot.slane %v2192_v30, 2 }
  0x2f   : > { %v760_v44 = vsel %vm716_vm5, %v750_v40, %v759_v50  ;;  %v1171_v40 = vshll.u32 %v2267_v9, 16 }
  0x31   : > { %v1173_v47 = vrot.slane %v1171_v40, 3 }
  0x32   : > { %1765 = vmatmul.mubr.msk.bf16.gmra.mrb[12].mxu1 %vm259_vm3, %v2037_v6  ;;  %v726_v6 = vshrl.u32 %v2153_v2, 16 }
  0x33   : > { %1783 = vmatmul.mubr.msk.bf16.vlgmr.msra.gmra.mrb[12].mxu0 %vm259_vm3, %v447_v54  ;;  %1768 = vmatprep.mubr.msk.bf16.mxu1 %vm1980_vm1, %v1979_v1  ;;  %v764_v54 = vrot.slane %v762_v51, 1 }
  0x34   : > { %1825 = vmatpush3.bf16.msra.mxu0 %v786_v55  ;;  %1786 = vmatprep.mubr.msk.bf16.mxu0 %vm1980_vm1, %v1979_v1  ;;  %v728_v15 = vrot.slane %v726_v6, 1  ;;  %v767_v55 = vrot.slane %v765_v52, 2  ;;  %v881_v6 = vrot.slane %v2172_v18, 2 }
  0x35   : > { %1868 = vmatprep.subr.bf16.mxu0 %v1979_v1 }
  0x36   : > { %v732_v20 = vor.u32 %v731_v16, %v728_v15  ;;  %v2281_v16 = vld [vmem:[%s2027_s19 + $0x20] sm:$0xff]  }
  0x37   : > { %v1036_v18 = vrot.slane %v2281_v16, 2  ;;  %v1177_v51 = vshrl.u32 %v2281_v16, 16  ;;  %v1180_v52 = vshll.u32 %v2281_v16, 16 }
  0x38   : > { %v733_v25 = vsel %vm716_vm5, %v724_v19, %v732_v20  ;;  %v742_v35 = vsel %vm716_vm5, %v732_v20, %v741_v31  ;;  %v2294_v20 = vld [vmem:[%s2027_s19 + $0x28] sm:$0xff]  }
  0x39   : > { %v1037_v19 = vsel %vm877_vm6, %v1034_v13, %v1036_v18  ;;  %v1038_v22 = vrot.slane %v2294_v20, 2 }
  0x3a   : > { %1769 = vmatmul.mubr.msk.bf16.gmra.mrb[16].mxu1 %vm259_vm3, %v2049_v12  ;;  %v1626_v12 = vld [vmem:[%s2432_s1 + $0x14] sm:$0xf] }
  0x3b   : > { %1787 = vmatmul.mubr.msk.bf16.gmra.mrb[16].mxu0 %vm259_vm3, %v449_v57  ;;  %1772 = vmatprep.mubr.msk.bf16.mxu1 %vm1980_vm1, %v1979_v1  ;;  %v768_v57 = vor.u32 %v767_v55, %v764_v54  ;;  %v1039_v27 = vsel %vm877_vm6, %v1036_v18, %v1038_v22  ;;  %v1179_v54 = vrot.slane %v1177_v51, 2  ;;  %v1182_v55 = vrot.slane %v1180_v52, 3 }
  0x3c   : > { %1790 = vmatprep.mubr.msk.bf16.mxu0 %vm1980_vm1, %v1979_v1 }
  0x3d   : > { %v769_v62 = vsel %vm716_vm5, %v759_v50, %v768_v57  ;;  %v1183_v57 = vor.u32 %v1182_v55, %v1179_v54 }
  0x42   : > { %1773 = vmatmul.mubr.msk.bf16.gmra.mrb[20].mxu1 %vm259_vm3, %v2043_v10  ;;  %v455_v10 = vsel %vm444_vm4, %v452_v60, %v454_v3  ;;  %v878_v60 = vrot.slane %v1627_v56, 2  ;;  %v1314_v56 = vrot.slane %v2267_v9, 3 }
  0x43   : > { %1791 = vmatmul.mubr.msk.bf16.gmra.mrb[20].mxu0 %vm259_vm3, %v451_v59  ;;  %1776 = vmatprep.mubr.msk.bf16.mxu1 %vm1980_vm1, %v1979_v1  ;;  %v2239_v59 = vld [vmem:[%s2027_s19 + $0xc] sm:$0xf] }
  0x44   : > { %1794 = vmatprep.mubr.msk.bf16.mxu0 %vm1980_vm1, %v1979_v1  ;;  %v1634_v0 = vcombine.low %v990_v58, %v2239_v59  ;;  %v880_v3 = vsel %vm877_vm6, %v878_v60, %v879_v61  ;;  %v1186_v58 = vshrl.u32 %v2294_v20, 16 }
  0x46   : > { %v1031_v2 = vrot.slane %v1634_v0, 2  ;;  %v1154_v24 = vshll.u32 %v1634_v0, 16 }
  0x48   : > { %v1156_v31 = vrot.slane %v1154_v24, 3 }
  0x4a   : > { %1777 = vmatmul.mubr.msk.bf16.gmra.mrb[24].mxu1 %vm259_vm3, %v2046_v11  ;;  %v905_v11 = vsel %vm275_vm0, %v1626_v12, 0  ;;  %v882_v12 = vsel %vm877_vm6, %v879_v61, %v881_v6 }
  0x4b   : > { %1795 = vmatmul.mubr.msk.bf16.gmra.mrb[24].mxu0 %vm259_vm3, %v453_v63  ;;  %1804 = vmatprep.mubr.msk.bf16.mxu1 %vm1980_vm1, %v1979_v1  ;;  %v1645_v63 = vld [vmem:[%s2432_s1 + $0x1c] sm:$0xf] }
  0x4c   : > { %1798 = vmatprep.mubr.msk.bf16.mxu0 %vm1980_vm1, %v1979_v1  ;;  %v1219_v4 = vsel %vm275_vm0, %v1645_v63, 0 }
  0x52   : > { %1805 = vmatmul.mubr.msk.bf16.vlgmr.msra.gmra.mrb[28].mxu1 %vm259_vm3, %v600_v17  ;;  %v884_v17 = vsel %vm877_vm6, %v881_v6, %v883_v14 }
  0x53   : > { %1799 = vmatmul.mubr.msk.bf16.gmra.mrb[28].mxu0 %vm259_vm3, %v455_v10  ;;  %1847 = vmatpush3.bf16.msra.mxu1 %v905_v11  ;;  %v1338_v10 = vsel %vm275_vm0, %v1652_v7, 0  ;;  %v885_v11 = vrot.slane %v2082_v39, 2  ;;  %v1151_v39 = vshrl.u32 %v1634_v0, 16  ;;  %v1970_v0 = vld [vmem:[%s2027_s19 + $0x30] ss:$0 sps:$4 sm:$0x77]  }
  0x54   : > { %1826 = vmatprep.mubr.msk.bf16.mxu0 %vm1980_vm1, %v1979_v1  ;;  %1808 = vmatprep.mubr.msk.bf16.mxu1 %vm1980_vm1, %v1979_v1 }
  0x55   : > { %1890 = vmatprep.subr.bf16.mxu1 %v1979_v1  ;;  %v886_v21 = vsel %vm877_vm6, %v883_v14, %v885_v11  ;;  %v1153_v30 = vrot.slane %v1151_v39, 2  ;;  %v1320_v14 = vrot.slane %v1970_v0, 3 }
  0x57   : > { %v1157_v36 = vor.u32 %v1156_v31, %v1153_v30 }
  0x5a   : > { %1809 = vmatmul.mubr.msk.bf16.gmra.mrb[32].mxu1 %vm259_vm3, %v602_v29  ;;  %v888_v29 = vsel %vm877_vm6, %v885_v11, %v887_v23 }
  0x5b   : > { %1827 = vmatmul.mubr.msk.bf16.vlgmr.msra.gmra.mrb[32].mxu0 %vm259_vm3, %v733_v25  ;;  %1812 = vmatprep.mubr.msk.bf16.mxu1 %vm1980_vm1, %v1979_v1 }
  0x5c   : > { %1869 = vmatpush3.bf16.msra.mxu0 %v1058_v28  ;;  %1830 = vmatprep.mubr.msk.bf16.mxu0 %vm1980_vm1, %v1979_v1  ;;  %v1968_v28 = vld [vmem:[%s2027_s19 + $0x30] ss:$0 sps:$4 sm:$0x33]  }
  0x5d   : > { %1912 = vmatprep.subr.bf16.mxu0 %v1979_v1  ;;  %v1040_v34 = vrot.slane %v1968_v28, 2 }
  0x5f   : > { %v1041_v41 = vsel %vm877_vm6, %v1038_v22, %v1040_v34 }
  0x62   : > { %1813 = vmatmul.mubr.msk.bf16.gmra.mrb[36].mxu1 %vm259_vm3, %v604_v38  ;;  %v1168_v38 = vshrl.u32 %v2267_v9, 16  ;;  %v1318_v9 = vrot.slane %v2294_v20, 3 }
  0x63   : > { %1831 = vmatmul.mubr.msk.bf16.gmra.mrb[36].mxu0 %vm259_vm3, %v742_v35  ;;  %1816 = vmatprep.mubr.msk.bf16.mxu1 %vm1980_vm1, %v1979_v1  ;;  %v1304_v35 = vld [vmem:[%s2027_s19 + $0x8] sm:$0x8] }
  0x64   : > { %1834 = vmatprep.mubr.msk.bf16.mxu0 %vm1980_vm1, %v1979_v1  ;;  %v1653_v42 = vcombine.low %v1304_v35, %v2239_v59  ;;  %v1170_v45 = vrot.slane %v1168_v38, 2  ;;  %v1189_v59 = vshll.u32 %v2294_v20, 16 }
  0x66   : > { %v1311_v48 = vrot.slane %v1653_v42, 3  ;;  %v1174_v50 = vor.u32 %v1173_v47, %v1170_v45  ;;  %v1191_v63 = vrot.slane %v1189_v59, 3 }
  0x68   : > { %v1184_v61 = vsel %vm1149_vm7, %v1174_v50, %v1183_v57 }
  0x6a   : > { %1817 = vmatmul.mubr.msk.bf16.gmra.mrb[40].mxu1 %vm259_vm3, %v606_v49 }
  0x6b   : > { %1835 = vmatmul.mubr.msk.bf16.gmra.mrb[40].mxu0 %vm259_vm3, %v751_v43  ;;  %1820 = vmatprep.mubr.msk.bf16.mxu1 %vm1980_vm1, %v1979_v1 }
  0x6c   : > { %1838 = vmatprep.mubr.msk.bf16.mxu0 %vm1980_vm1, %v1979_v1 }
  0x72   : > { %1821 = vmatmul.mubr.msk.bf16.gmra.mrb[44].mxu1 %vm259_vm3, %v2097_v46  ;;  %v2250_v46 = vld [vmem:[%s2027_s19 + $0x10] sm:$0xff]  }
  0x73   : > { %1839 = vmatmul.mubr.msk.bf16.gmra.mrb[44].mxu0 %vm259_vm3, %v760_v44  ;;  %1848 = vmatprep.mubr.msk.bf16.mxu1 %vm1980_vm1, %v1979_v1  ;;  %v1032_v5 = vrot.slane %v2250_v46, 2  ;;  %v1159_v25 = vshrl.u32 %v2250_v46, 16  ;;  %v1162_v26 = vshll.u32 %v2250_v46, 16  ;;  %v1312_v49 = vrot.slane %v2250_v46, 3 }
  0x74   : > { %1842 = vmatprep.mubr.msk.bf16.mxu0 %vm1980_vm1, %v1979_v1  ;;  %v1316_v46 = vrot.slane %v2281_v16, 3 }
  0x75   : > { %v1033_v8 = vsel %vm877_vm6, %v1031_v2, %v1032_v5  ;;  %v1035_v15 = vsel %vm877_vm6, %v1032_v5, %v1034_v13  ;;  %v1161_v32 = vrot.slane %v1159_v25, 2  ;;  %v1164_v33 = vrot.slane %v1162_v26, 3 }
  0x76   : > { %v1313_v53 = vsel %vm1310_vm8, %v1311_v48, %v1312_v49  ;;  %v1315_v60 = vsel %vm1310_vm8, %v1312_v49, %v1314_v56  ;;  %v1198_v2 = vshll.u32 %v1970_v0, 16  ;;  %v1317_v5 = vsel %vm1310_vm8, %v1314_v56, %v1316_v46 }
  0x77   : > { %v1165_v37 = vor.u32 %v1164_v33, %v1161_v32 }
  0x79   : > { %v1166_v43 = vsel %vm1149_vm7, %v1157_v36, %v1165_v37  ;;  %v1175_v44 = vsel %vm1149_vm7, %v1165_v37, %v1174_v50 }
  0x7a   : > { %1849 = vmatmul.mubr.msk.bf16.vlgmr.msra.gmra.mrb[48].mxu1 %vm259_vm3, %v880_v3 }
  0x7b   : > { %1843 = vmatmul.mubr.msk.bf16.gmra.mrb[48].mxu0 %vm259_vm3, %v769_v62  ;;  %1891 = vmatpush3.bf16.msra.mxu1 %v1219_v4  ;;  %v1188_v62 = vrot.slane %v1186_v58, 2  ;;  %v1195_v4 = vshrl.u32 %v1970_v0, 16 }
  0x7c   : > { %1870 = vmatprep.mubr.msk.bf16.mxu0 %vm1980_vm1, %v1979_v1  ;;  %1852 = vmatprep.mubr.msk.bf16.mxu1 %vm1980_vm1, %v1979_v1 }
  0x7d   : > { %v1192_v3 = vor.u32 %v1191_v63, %v1188_v62  ;;  %v1197_v7 = vrot.slane %v1195_v4, 2 }
  0x7f   : > { %v1193_v6 = vsel %vm1149_vm7, %v1183_v57, %v1192_v3 }
  0x82   : > { %1853 = vmatmul.mubr.msk.bf16.gmra.mrb[52].mxu1 %vm259_vm3, %v882_v12  ;;  %v1319_v12 = vsel %vm1310_vm8, %v1316_v46, %v1318_v9 }
  0x83   : > { %1871 = vmatmul.mubr.msk.bf16.vlgmr.msra.gmra.mrb[52].mxu0 %vm259_vm3, %v1033_v8  ;;  %1856 = vmatprep.mubr.msk.bf16.mxu1 %vm1980_vm1, %v1979_v1  ;;  %v1200_v8 = vrot.slane %v1198_v2, 3 }
  0x84   : > { %1913 = vmatpush3.bf16.msra.mxu0 %v1338_v10  ;;  %1874 = vmatprep.mubr.msk.bf16.mxu0 %vm1980_vm1, %v1979_v1 }
  0x85   : > { %v1201_v10 = vor.u32 %v1200_v8, %v1197_v7 }
  0x87   : > { %v1202_v13 = vsel %vm1149_vm7, %v1192_v3, %v1201_v10 }
  0x8a   : > { %1857 = vmatmul.mubr.msk.bf16.gmra.mrb[56].mxu1 %vm259_vm3, %v884_v17 }
  0x8b   : > { %1875 = vmatmul.mubr.msk.bf16.gmra.mrb[56].mxu0 %vm259_vm3, %v1035_v15  ;;  %1860 = vmatprep.mubr.msk.bf16.mxu1 %vm1980_vm1, %v1979_v1  ;;  %v1321_v15 = vsel %vm1310_vm8, %v1318_v9, %v1320_v14 }
  0x8c   : > { %1878 = vmatprep.mubr.msk.bf16.mxu0 %vm1980_vm1, %v1979_v1 }
  0x92   : > { %1861 = vmatmul.mubr.msk.bf16.gmra.mrb[60].mxu1 %vm259_vm3, %v886_v21 }
  0x93   : > { %1879 = vmatmul.mubr.msk.bf16.gmra.mrb[60].mxu0 %vm259_vm3, %v1037_v19  ;;  %1864 = vmatprep.mubr.msk.bf16.mxu1 %vm1980_vm1, %v1979_v1 }
  0x94   : > { %1882 = vmatprep.mubr.msk.bf16.mxu0 %vm1980_vm1, %v1979_v1 }
  0x9a   : > { %1865 = vmatmul.mubr.msk.bf16.gmra.mrb[64].mxu1 %vm259_vm3, %v888_v29 }
  0x9b   : > { %1883 = vmatmul.mubr.msk.bf16.gmra.mrb[64].mxu0 %vm259_vm3, %v1039_v27  ;;  %1892 = vmatprep.mubr.msk.bf16.mxu1 %vm1980_vm1, %v1979_v1 }
  0x9c   : > { %1886 = vmatprep.mubr.msk.bf16.mxu0 %vm1980_vm1, %v1979_v1 }
  0xa2   : > { %1893 = vmatmul.mubr.msk.bf16.vlgmr.msra.gmra.mrb[68].mxu1 %vm259_vm3, %v1166_v43 }
  0xa3   : > { %1887 = vmatmul.mubr.msk.bf16.gmra.mrb[68].mxu0 %vm259_vm3, %v1041_v41  ;;  %1896 = vmatprep.mubr.msk.bf16.mxu1 %vm1980_vm1, %v1979_v1 }
  0xa4   : > { %1914 = vmatprep.mubr.msk.bf16.mxu0 %vm1980_vm1, %v1979_v1 }
  0xaa   : > { %1897 = vmatmul.mubr.msk.bf16.gmra.mrb[72].mxu1 %vm259_vm3, %v1175_v44 }
  0xab   : > { %1915 = vmatmul.mubr.msk.bf16.vlgmr.msra.gmra.mrb[72].mxu0 %vm259_vm3, %v1313_v53  ;;  %1900 = vmatprep.mubr.msk.bf16.mxu1 %vm1980_vm1, %v1979_v1 }
  0xac   : > { %1918 = vmatprep.mubr.msk.bf16.mxu0 %vm1980_vm1, %v1979_v1 }
  0xb2   : > { %1901 = vmatmul.mubr.msk.bf16.gmra.mrb[76].mxu1 %vm259_vm3, %v1184_v61 }
  0xb3   : > { %1919 = vmatmul.mubr.msk.bf16.gmra.mrb[76].mxu0 %vm259_vm3, %v1315_v60  ;;  %1904 = vmatprep.mubr.msk.bf16.mxu1 %vm1980_vm1, %v1979_v1 }
  0xb4   : > { %1922 = vmatprep.mubr.msk.bf16.mxu0 %vm1980_vm1, %v1979_v1 }
  0xba   : > { %1905 = vmatmul.mubr.msk.bf16.gmra.mrb[80].mxu1 %vm259_vm3, %v1193_v6 }
  0xbb   : > { %1923 = vmatmul.mubr.msk.bf16.gmra.mrb[80].mxu0 %vm259_vm3, %v1317_v5  ;;  %1908 = vmatprep.mubr.msk.bf16.mxu1 %vm1980_vm1, %v1979_v1 }
  0xbc   : > { %1926 = vmatprep.mubr.msk.bf16.mxu0 %vm1980_vm1, %v1979_v1 }
  0xc2   : > { %1909 = vmatmul.mubr.msk.bf16.gmra.mrb[84].mxu1 %vm259_vm3, %v1202_v13 }
  0xc3   : > { %1927 = vmatmul.mubr.msk.bf16.gmra.mrb[84].mxu0 %vm259_vm3, %v1319_v12 }
  0xc4   : > { %1930 = vmatprep.mubr.msk.bf16.mxu0 %vm1980_vm1, %v1979_v1 }
  0xcb   : > { %1931 = vmatmul.mubr.msk.bf16.gmra.mrb[88].mxu0 %vm259_vm3, %v1321_v15 }
  0xed   : > { %v337_v11 = vpop.f32.mrb[0].mxu1 }
  0xee   : > { %v313_v16 = vpop.f32.mrb[0].mxu0  ;;  %v1752_v20 = vpop.f32.mrb[1].mxu1 }
  0xef   : > { %v1740_v17 = vpop.f32.mrb[1].mxu0  ;;  %v340_v21 = vpop.f32.mrb[2].mxu1 }
  0xf0   : > { %v316_v18 = vpop.f32.mrb[2].mxu0  ;;  %v1753_v22 = vpop.f32.mrb[3].mxu1 }
  0xf1   : > { %v1741_v19 = vpop.f32.mrb[3].mxu0 }
  0xf5   : > { %v345_v25 = vpop.f32.mrb[4].mxu1 }
  0xf6   : > { %v321_v23 = vpop.f32.mrb[4].mxu0  ;;  %v1756_v26 = vpop.f32.mrb[5].mxu1 }
  0xf7   : > { %v1744_v39 = vpop.f32.mrb[5].mxu0  ;;  %v348_v27 = vpop.f32.mrb[6].mxu1 }
  0xf8   : > { %v324_v24 = vpop.f32.mrb[6].mxu0  ;;  %v1757_v28 = vpop.f32.mrb[7].mxu1 }
  0xf9   : > { %v1745_v1 = vpop.f32.mrb[7].mxu0 }
  0xfd   : > { %v399_v31 = vpop.f32.mrb[8].mxu1 }
  0xfe   : > { %v329_v29 = vpop.f32.mrb[8].mxu0  ;;  %v400_v33 = vadd.f32 %v399_v31, %v313_v16  ;;  %v1762_v34 = vpop.f32.mrb[9].mxu1 }
  0xff   : > { %v1748_v30 = vpop.f32.mrb[9].mxu0  ;;  %v402_v36 = vpop.f32.mrb[10].mxu1 }
 0x100   : > { %v332_v32 = vpop.f32.mrb[10].mxu0  ;;  %v403_v37 = vadd.f32 %v402_v36, %v316_v18  ;;  %v1763_v38 = vpop.f32.mrb[11].mxu1 }
 0x101   : > { %v1749_v35 = vpop.f32.mrb[11].mxu0 }
 0x105   : > { %v407_v43 = vpop.f32.mrb[12].mxu1 }
 0x106   : > { %v508_v40 = vpop.f32.mrb[12].mxu0  ;;  %v408_v47 = vadd.f32 %v407_v43, %v321_v23  ;;  %v1766_v48 = vpop.f32.mrb[13].mxu1 }
 0x107   : > { %v547_v41 = vadd.f32 %v508_v40, %v400_v33  ;;  %v1784_v42 = vpop.f32.mrb[13].mxu0  ;;  %v410_v51 = vpop.f32.mrb[14].mxu1 }
 0x108   : > { %v511_v45 = vpop.f32.mrb[14].mxu0  ;;  %v411_v52 = vadd.f32 %v410_v51, %v324_v24  ;;  %v1767_v53 = vpop.f32.mrb[15].mxu1 }
 0x109   : > { %v548_v49 = vadd.f32 %v511_v45, %v403_v37  ;;  %v1785_v50 = vpop.f32.mrb[15].mxu0 }
 0x10d   : > { %v415_v56 = vpop.f32.mrb[16].mxu1 }
 0x10e   : > { %v516_v44 = vpop.f32.mrb[16].mxu0  ;;  %v416_v58 = vadd.f32 %v415_v56, %v329_v29  ;;  %v1770_v59 = vpop.f32.mrb[17].mxu1 }
 0x10f   : > { %v549_v54 = vadd.f32 %v516_v44, %v408_v47  ;;  %v1788_v55 = vpop.f32.mrb[17].mxu0  ;;  %v418_v62 = vpop.f32.mrb[18].mxu1 }
 0x110   : > { %v519_v57 = vpop.f32.mrb[18].mxu0  ;;  %v419_v63 = vadd.f32 %v418_v62, %v332_v32  ;;  %v1771_v0 = vpop.f32.mrb[19].mxu1 }
 0x111   : > { %v550_v60 = vadd.f32 %v519_v57, %v411_v52  ;;  %v1789_v61 = vpop.f32.mrb[19].mxu0 }
 0x115   : > { %v423_v2 = vpop.f32.mrb[20].mxu1 }
 0x116   : > { %v524_v46 = vpop.f32.mrb[20].mxu0  ;;  %v424_v6 = vadd.f32 %v423_v2, %v337_v11  ;;  %v1774_v7 = vpop.f32.mrb[21].mxu1 }
 0x117   : > { %v551_v3 = vadd.f32 %v524_v46, %v416_v58  ;;  %v1792_v4 = vpop.f32.mrb[21].mxu0  ;;  %v426_v10 = vpop.f32.mrb[22].mxu1 }
 0x118   : > { %v527_v5 = vpop.f32.mrb[22].mxu0  ;;  %v427_v12 = vadd.f32 %v426_v10, %v340_v21  ;;  %v1775_v13 = vpop.f32.mrb[23].mxu1 }
 0x119   : > { %v552_v8 = vadd.f32 %v527_v5, %v419_v63  ;;  %v1793_v9 = vpop.f32.mrb[23].mxu0 }
 0x11d   : > { %v431_v17 = vpop.f32.mrb[24].mxu1 }
 0x11e   : > { %v532_v14 = vpop.f32.mrb[24].mxu0  ;;  %v432_v19 = vadd.f32 %v431_v17, %v345_v25  ;;  %v1778_v20 = vpop.f32.mrb[25].mxu1 }
 0x11f   : > { %v553_v15 = vadd.f32 %v532_v14, %v424_v6  ;;  %v1796_v16 = vpop.f32.mrb[25].mxu0  ;;  %v434_v39 = vpop.f32.mrb[26].mxu1 }
 0x120   : > { %v535_v18 = vpop.f32.mrb[26].mxu0  ;;  %v435_v24 = vadd.f32 %v434_v39, %v348_v27  ;;  %v1779_v1 = vpop.f32.mrb[27].mxu1 }
 0x121   : > { %v554_v22 = vadd.f32 %v535_v18, %v427_v12  ;;  %v1797_v23 = vpop.f32.mrb[27].mxu0 }
 0x125   : > { %v661_v29 = vpop.f32.mrb[28].mxu1 }
 0x126   : > { %v540_v26 = vpop.f32.mrb[28].mxu0  ;;  %v700_v31 = vadd.f32 %v661_v29, %v547_v41  ;;  %v1806_v21 = vpop.f32.mrb[29].mxu1 }
 0x127   : > { %v555_v11 = vadd.f32 %v540_v26, %v432_v19  ;;  %v1800_v28 = vpop.f32.mrb[29].mxu0  ;;  %v664_v34 = vpop.f32.mrb[30].mxu1 }
 0x128   : > { %v543_v30 = vpop.f32.mrb[30].mxu0  ;;  %v701_v35 = vadd.f32 %v664_v34, %v548_v49  ;;  %v1807_v36 = vpop.f32.mrb[31].mxu1 }
 0x129   : > { %v556_v32 = vadd.f32 %v543_v30, %v435_v24  ;;  %v1801_v33 = vpop.f32.mrb[31].mxu0 }
 0x12d   : > { %v669_v40 = vpop.f32.mrb[32].mxu1 }
 0x12e   : > { %v822_v37 = vpop.f32.mrb[32].mxu0  ;;  %v702_v43 = vadd.f32 %v669_v40, %v549_v54  ;;  %v1810_v27 = vpop.f32.mrb[33].mxu1 }
 0x12f   : > { %v861_v25 = vadd.f32 %v822_v37, %v700_v31  ;;  %v1828_v38 = vpop.f32.mrb[33].mxu0  ;;  %v672_v48 = vpop.f32.mrb[34].mxu1 }
 0x130   : > { %v825_v42 = vpop.f32.mrb[34].mxu0  ;;  %v703_v50 = vadd.f32 %v672_v48, %v550_v60  ;;  %v1811_v51 = vpop.f32.mrb[35].mxu1 }
 0x131   : > { %v862_v45 = vadd.f32 %v825_v42, %v701_v35  ;;  %v1829_v47 = vpop.f32.mrb[35].mxu0 }
 0x135   : > { %v677_v44 = vpop.f32.mrb[36].mxu1 }
 0x136   : > { %v830_v52 = vpop.f32.mrb[36].mxu0  ;;  %v704_v56 = vadd.f32 %v677_v44, %v551_v3  ;;  %v1814_v49 = vpop.f32.mrb[37].mxu1 }
 0x137   : > { %v863_v41 = vadd.f32 %v830_v52, %v702_v43  ;;  %v1832_v53 = vpop.f32.mrb[37].mxu0  ;;  %v680_v59 = vpop.f32.mrb[38].mxu1 }
 0x138   : > { %v833_v55 = vpop.f32.mrb[38].mxu0  ;;  %v705_v61 = vadd.f32 %v680_v59, %v552_v8  ;;  %v1815_v62 = vpop.f32.mrb[39].mxu1 }
 0x139   : > { %v864_v57 = vadd.f32 %v833_v55, %v703_v50  ;;  %v1833_v58 = vpop.f32.mrb[39].mxu0 }
 0x13d   : > { %v685_v46 = vpop.f32.mrb[40].mxu1 }
 0x13e   : > { %v838_v63 = vpop.f32.mrb[40].mxu0  ;;  %v706_v2 = vadd.f32 %v685_v46, %v553_v15  ;;  %v1818_v60 = vpop.f32.mrb[41].mxu1 }
 0x13f   : > { %v865_v54 = vadd.f32 %v838_v63, %v704_v56  ;;  %v1836_v0 = vpop.f32.mrb[41].mxu0  ;;  %v688_v7 = vpop.f32.mrb[42].mxu1 }
 0x140   : > { %v841_v4 = vpop.f32.mrb[42].mxu0  ;;  %v707_v9 = vadd.f32 %v688_v7, %v554_v22  ;;  %v1819_v10 = vpop.f32.mrb[43].mxu1 }
 0x141   : > { %v866_v5 = vadd.f32 %v841_v4, %v705_v61  ;;  %v1837_v6 = vpop.f32.mrb[43].mxu0 }
 0x145   : > { %v693_v14 = vpop.f32.mrb[44].mxu1 }
 0x146   : > { %v846_v12 = vpop.f32.mrb[44].mxu0  ;;  %v708_v17 = vadd.f32 %v693_v14, %v555_v11  ;;  %v1822_v8 = vpop.f32.mrb[45].mxu1 }
 0x147   : > { %v867_v3 = vadd.f32 %v846_v12, %v706_v2  ;;  %v1840_v13 = vpop.f32.mrb[45].mxu0  ;;  %v696_v20 = vpop.f32.mrb[46].mxu1 }
 0x148   : > { %v849_v16 = vpop.f32.mrb[46].mxu0  ;;  %v709_v23 = vadd.f32 %v696_v20, %v556_v32  ;;  %v1823_v39 = vpop.f32.mrb[47].mxu1 }
 0x149   : > { %v868_v18 = vadd.f32 %v849_v16, %v707_v9  ;;  %v1841_v19 = vpop.f32.mrb[47].mxu0 }
 0x14d   : > { %v941_v26 = vpop.f32.mrb[48].mxu1 }
 0x14e   : > { %v854_v24 = vpop.f32.mrb[48].mxu0  ;;  %v980_v29 = vadd.f32 %v941_v26, %v861_v25  ;;  %v1850_v22 = vpop.f32.mrb[49].mxu1 }
 0x14f   : > { %v869_v15 = vadd.f32 %v854_v24, %v708_v17  ;;  %v1844_v1 = vpop.f32.mrb[49].mxu0  ;;  %v944_v21 = vpop.f32.mrb[50].mxu1 }
 0x150   : > { %v857_v28 = vpop.f32.mrb[50].mxu0  ;;  %v981_v33 = vadd.f32 %v944_v21, %v862_v45  ;;  %v1851_v34 = vpop.f32.mrb[51].mxu1 }
 0x151   : > { %v870_v30 = vadd.f32 %v857_v28, %v709_v23  ;;  %v1845_v31 = vpop.f32.mrb[51].mxu0 }
 0x155   : > { %v949_v37 = vpop.f32.mrb[52].mxu1 }
 0x156   : > { %v1094_v35 = vpop.f32.mrb[52].mxu0  ;;  %v982_v40 = vadd.f32 %v949_v37, %v863_v41  ;;  %v1854_v32 = vpop.f32.mrb[53].mxu1 }
 0x157   : > { %v1133_v11 = vadd.f32 %v1094_v35, %v980_v29  ;;  %v1872_v36 = vpop.f32.mrb[53].mxu0  ;;  %v952_v27 = vpop.f32.mrb[54].mxu1 }
 0x158   : > { %v1097_v38 = vpop.f32.mrb[54].mxu0  ;;  %v983_v47 = vadd.f32 %v952_v27, %v864_v57  ;;  %v1855_v48 = vpop.f32.mrb[55].mxu1 }
 0x159   : > { %v1134_v42 = vadd.f32 %v1097_v38, %v981_v33  ;;  %v1873_v43 = vpop.f32.mrb[55].mxu0 }
 0x15d   : > { %v957_v52 = vpop.f32.mrb[56].mxu1 }
 0x15e   : > { %v1102_v50 = vpop.f32.mrb[56].mxu0  ;;  %v984_v44 = vadd.f32 %v957_v52, %v865_v54  ;;  %v1858_v45 = vpop.f32.mrb[57].mxu1 }
 0x15f   : > { %v1135_v25 = vadd.f32 %v1102_v50, %v982_v40  ;;  %v1876_v51 = vpop.f32.mrb[57].mxu0  ;;  %v960_v49 = vpop.f32.mrb[58].mxu1 }
 0x160   : > { %v1105_v53 = vpop.f32.mrb[58].mxu0  ;;  %v985_v58 = vadd.f32 %v960_v49, %v866_v5  ;;  %v1859_v59 = vpop.f32.mrb[59].mxu1 }
 0x161   : > { %v1136_v55 = vadd.f32 %v1105_v53, %v983_v47  ;;  %v1877_v56 = vpop.f32.mrb[59].mxu0 }
 0x165   : > { %v965_v63 = vpop.f32.mrb[60].mxu1 }
 0x166   : > { %v1110_v61 = vpop.f32.mrb[60].mxu0  ;;  %v986_v57 = vadd.f32 %v965_v63, %v867_v3  ;;  %v1862_v46 = vpop.f32.mrb[61].mxu1 }
 0x167   : > { %v2369_v41 = vadd.f32 %v1110_v61, %v984_v44  ;;  %v1880_v62 = vpop.f32.mrb[61].mxu0  ;;  %v968_v60 = vpop.f32.mrb[62].mxu1 }
 0x168   : > { %v1113_v0 = vpop.f32.mrb[62].mxu0  ;;  %v987_v6 = vadd.f32 %v968_v60, %v868_v18  ;;  %v1863_v54 = vpop.f32.mrb[63].mxu1 }
 0x169   : > { %v2371_v4 = vadd.f32 %v1113_v0, %v985_v58  ;;  %v1881_v2 = vpop.f32.mrb[63].mxu0 }
 0x16d   : > { %v973_v5 = vpop.f32.mrb[64].mxu1 }
 0x16e   : > { %v1118_v7 = vpop.f32.mrb[64].mxu0  ;;  %v988_v13 = vadd.f32 %v973_v5, %v869_v15  ;;  %v1866_v14 = vpop.f32.mrb[65].mxu1 }
 0x16f   : > { %v2373_v9 = vadd.f32 %v1118_v7, %v986_v57  ;;  %v1884_v10 = vpop.f32.mrb[65].mxu0  ;;  %v976_v8 = vpop.f32.mrb[66].mxu1 }
 0x170   : > { %v1121_v12 = vpop.f32.mrb[66].mxu0  ;;  %v989_v3 = vadd.f32 %v976_v8, %v870_v30  ;;  %v1867_v19 = vpop.f32.mrb[67].mxu1  ;;  %v2384_v30 = vld [vmem:[%s2433_s2] ss:$0 sm:$0xff] }
 0x171   : > { %v2375_v16 = vadd.f32 %v1121_v12, %v987_v6  ;;  %v1885_v17 = vpop.f32.mrb[67].mxu0 }
 0x175   : > { %v1255_v18 = vpop.f32.mrb[68].mxu1 }
 0x176   : > { %v1126_v20 = vpop.f32.mrb[68].mxu0  ;;  %v1294_v1 = vadd.f32 %v1255_v18, %v1133_v11  ;;  %v1894_v26 = vpop.f32.mrb[69].mxu1 }
 0x177   : > { %v2377_v23 = vadd.f32 %v1126_v20, %v988_v13  ;;  %v1888_v39 = vpop.f32.mrb[69].mxu0  ;;  %v1258_v15 = vpop.f32.mrb[70].mxu1 }
 0x178   : > { %v1129_v24 = vpop.f32.mrb[70].mxu0  ;;  %v1295_v22 = vadd.f32 %v1258_v15, %v1134_v42  ;;  %v1895_v31 = vpop.f32.mrb[71].mxu1 }
 0x179   : > { %v2379_v28 = vadd.f32 %v1129_v24, %v989_v3  ;;  %v1889_v29 = vpop.f32.mrb[71].mxu0 }
 0x17d   : > { %v1263_v35 = vpop.f32.mrb[72].mxu1 }
 0x17e   : > { %v1374_v21 = vpop.f32.mrb[72].mxu0  ;;  %v1296_v37 = vadd.f32 %v1263_v35, %v1135_v25  ;;  %v1898_v38 = vpop.f32.mrb[73].mxu1 }
 0x17f   : > { %v1413_v33 = vadd.f32 %v1374_v21, %v1294_v1  ;;  %v1916_v34 = vpop.f32.mrb[73].mxu0  ;;  %v1266_v43 = vpop.f32.mrb[74].mxu1 }
 0x180   : > { %v1377_v36 = vpop.f32.mrb[74].mxu0  ;;  %v1297_v27 = vadd.f32 %v1266_v43, %v1136_v55  ;;  %v1899_v48 = vpop.f32.mrb[75].mxu1 }
 0x181   : > { %v1430_v11 = vadd.f32 %v2384_v30, %v1413_v33  ;;  %v1414_v40 = vadd.f32 %v1377_v36, %v1295_v22  ;;  %v1917_v32 = vpop.f32.mrb[75].mxu0 }
 0x183   : > { %vm1440_vm9 = vcmp.ge.f32.partialorder %v1430_v11, 0.0  ;;  %v1450_v42 = vmul.f32 0.01, %v1430_v11  ;;  %v1431_v47 = vadd.f32 %v2384_v30, %v1414_v40 }
 0x185   : > { %v1460_v50 = vsel %vm1440_vm9, %v1430_v11, %v1450_v42  ;;  %vm1441_vm11 = vcmp.ge.f32.partialorder %v1431_v47, 0.0  ;;  %v1451_v25 = vmul.f32 0.01, %v1431_v47  ;;  %v1271_v56 = vpop.f32.mrb[76].mxu1 }
 0x186   : > { %v1672_v51 = vpack.c.bf16 %v1460_v50, %v1460_v50  ;;  %v1382_v52 = vpop.f32.mrb[76].mxu0  ;;  %v1298_v58 = vadd.f32 %v1271_v56, %v2369_v41  ;;  %v1902_v61 = vpop.f32.mrb[77].mxu1 }
 0x187   : > { %v1461_v53 = vsel %vm1441_vm11, %v1431_v47, %v1451_v25  ;;  %v1415_v44 = vadd.f32 %v1382_v52, %v1296_v37  ;;  %v1920_v45 = vpop.f32.mrb[77].mxu0  ;;  %v1274_v0 = vpop.f32.mrb[78].mxu1 }
 0x188   : > { %1511 = vst.msk [vmem:[%s2392_s16] sm:$0xf] %vm1510_vm10, %v1672_v51  ;;  %v1673_v55 = vpack.c.bf16 %v1461_v53, %v1461_v53  ;;  %v1385_v49 = vpop.f32.mrb[78].mxu0  ;;  %v1299_v46 = vadd.f32 %v1274_v0, %v2371_v4  ;;  %v1903_v60 = vpop.f32.mrb[79].mxu1 }
 0x189   : > { %v1432_v59 = vadd.f32 %v2384_v30, %v1415_v44  ;;  %v1416_v62 = vadd.f32 %v1385_v49, %v1297_v27  ;;  %v1921_v63 = vpop.f32.mrb[79].mxu0 }
 0x18a   : > { %1512 = vst.msk [vmem:[%s2392_s16 + $0x4] sm:$0xf] %vm1510_vm10, %v1673_v55 }
 0x18b   : > { %vm1442_vm12 = vcmp.ge.f32.partialorder %v1432_v59, 0.0  ;;  %v1452_v57 = vmul.f32 0.01, %v1432_v59  ;;  %v1433_v2 = vadd.f32 %v2384_v30, %v1416_v62 }
 0x18d   : > { %v1462_v6 = vsel %vm1442_vm12, %v1432_v59, %v1452_v57  ;;  %vm1443_vm13 = vcmp.ge.f32.partialorder %v1433_v2, 0.0  ;;  %v1453_v41 = vmul.f32 0.01, %v1433_v2  ;;  %v1279_v14 = vpop.f32.mrb[80].mxu1 }
 0x18e   : > { %v1674_v54 = vpack.c.bf16 %v1462_v6, %v1462_v6  ;;  %v1390_v7 = vpop.f32.mrb[80].mxu0  ;;  %v1300_v8 = vadd.f32 %v1279_v14, %v2373_v9  ;;  %v1906_v3 = vpop.f32.mrb[81].mxu1 }
 0x18f   : > { %v1463_v10 = vsel %vm1443_vm13, %v1433_v2, %v1453_v41  ;;  %v1417_v5 = vadd.f32 %v1390_v7, %v1298_v58  ;;  %v1924_v12 = vpop.f32.mrb[81].mxu0  ;;  %v1282_v39 = vpop.f32.mrb[82].mxu1 }
 0x190   : > { %1513 = vst.msk [vmem:[%s2392_s16 + $0x8] sm:$0xf] %vm1510_vm10, %v1674_v54  ;;  %v1675_v13 = vpack.c.bf16 %v1463_v10, %v1463_v10  ;;  %v1393_v17 = vpop.f32.mrb[82].mxu0  ;;  %v1301_v24 = vadd.f32 %v1282_v39, %v2375_v16  ;;  %v1907_v26 = vpop.f32.mrb[83].mxu1 }
 0x191   : > { %v1434_v4 = vadd.f32 %v2384_v30, %v1417_v5  ;;  %v1418_v19 = vadd.f32 %v1393_v17, %v1299_v46  ;;  %v1925_v20 = vpop.f32.mrb[83].mxu0 }
 0x192   : > { %1514 = vst.msk [vmem:[%s2392_s16 + $0xc] sm:$0xf] %vm1510_vm10, %v1675_v13 }
 0x193   : > { %vm1444_vm14 = vcmp.ge.f32.partialorder %v1434_v4, 0.0  ;;  %v1454_v18 = vmul.f32 0.01, %v1434_v4  ;;  %v1435_v1 = vadd.f32 %v2384_v30, %v1418_v19 }
 0x195   : > { %v1464_v29 = vsel %vm1444_vm14, %v1434_v4, %v1454_v18  ;;  %vm1445_vm15 = vcmp.ge.f32.partialorder %v1435_v1, 0.0  ;;  %v1455_v9 = vmul.f32 0.01, %v1435_v1  ;;  %v1287_v35 = vpop.f32.mrb[84].mxu1 }
 0x196   : > { %v1676_v15 = vpack.c.bf16 %v1464_v29, %v1464_v29  ;;  %v1398_v22 = vpop.f32.mrb[84].mxu0  ;;  %v1302_v37 = vadd.f32 %v1287_v35, %v2377_v23  ;;  %v1910_v11 = vpop.f32.mrb[85].mxu1 }
 0x197   : > { %v1465_v31 = vsel %vm1445_vm15, %v1435_v1, %v1455_v9  ;;  %v1419_v21 = vadd.f32 %v1398_v22, %v1300_v8  ;;  %v1928_v33 = vpop.f32.mrb[85].mxu0  ;;  %v1290_v32 = vpop.f32.mrb[86].mxu1 }
 0x198   : > { %1515 = vst.msk [vmem:[%s2392_s16 + $0x10] sm:$0xf] %vm1510_vm10, %v1676_v15  ;;  %v1677_v34 = vpack.c.bf16 %v1465_v31, %v1465_v31  ;;  %v1401_v36 = vpop.f32.mrb[86].mxu0  ;;  %v1303_v42 = vadd.f32 %v1290_v32, %v2379_v28  ;;  %v1911_v47 = vpop.f32.mrb[87].mxu1 }
 0x199   : > { %v1436_v16 = vadd.f32 %v2384_v30, %v1419_v21  ;;  %v1420_v38 = vadd.f32 %v1401_v36, %v1301_v24  ;;  %v1929_v40 = vpop.f32.mrb[87].mxu0 }
 0x19a   : > { %1516 = vst.msk [vmem:[%s2392_s16 + $0x14] sm:$0xf] %vm1510_vm10, %v1677_v34 }
 0x19b   : > { %vm1446_vm0 = vcmp.ge.f32.partialorder %v1436_v16, 0.0  ;;  %v1456_v43 = vmul.f32 0.01, %v1436_v16  ;;  %v1437_v27 = vadd.f32 %v2384_v30, %v1420_v38 }
 0x19d   : > { %v1466_v48 = vsel %vm1446_vm0, %v1436_v16, %v1456_v43  ;;  %vm1447_vm1 = vcmp.ge.f32.partialorder %v1437_v27, 0.0  ;;  %v1457_v23 = vmul.f32 0.01, %v1437_v27 }
 0x19e   : > { %v1678_v50 = vpack.c.bf16 %v1466_v48, %v1466_v48  ;;  %v1406_v25 = vpop.f32.mrb[88].mxu0 }
 0x19f   : > { %v1467_v51 = vsel %vm1447_vm1, %v1437_v27, %v1457_v23  ;;  %v1421_v52 = vadd.f32 %v1406_v25, %v1302_v37  ;;  %v1932_v53 = vpop.f32.mrb[89].mxu0 }
 0x1a0   : > { %1517 = vst.msk [vmem:[%s2392_s16 + $0x18] sm:$0xf] %vm1510_vm10, %v1678_v50  ;;  %v1679_v44 = vpack.c.bf16 %v1467_v51, %v1467_v51  ;;  %v1409_v45 = vpop.f32.mrb[90].mxu0 }
 0x1a1   : > { %v1438_v28 = vadd.f32 %v2384_v30, %v1421_v52  ;;  %v1422_v55 = vadd.f32 %v1409_v45, %v1303_v42  ;;  %v1933_v56 = vpop.f32.mrb[91].mxu0 }
 0x1a2   : > { %1518 = vst.msk [vmem:[%s2392_s16 + $0x1c] sm:$0xf] %vm1510_vm10, %v1679_v44 }
 0x1a3   : > { %vm1448_vm2 = vcmp.ge.f32.partialorder %v1438_v28, 0.0  ;;  %v1458_v49 = vmul.f32 0.01, %v1438_v28  ;;  %v1439_v58 = vadd.f32 %v2384_v30, %v1422_v55 }
 0x1a5   : > { %v1468_v59 = vsel %vm1448_vm2, %v1438_v28, %v1458_v49  ;;  %vm1449_vm3 = vcmp.ge.f32.partialorder %v1439_v58, 0.0  ;;  %v1459_v61 = vmul.f32 0.01, %v1439_v58 }
 0x1a6   : > { %v1680_v62 = vpack.c.bf16 %v1468_v59, %v1468_v59 }
 0x1a7   : > { %v1469_v63 = vsel %vm1449_vm3, %v1439_v58, %v1459_v61 }
 0x1a8   : > { %1519 = vst.msk [vmem:[%s2392_s16 + $0x20] sm:$0xf] %vm1510_vm10, %v1680_v62  ;;  %v1681_v0 = vpack.c.bf16 %v1469_v63, %v1469_v63 }
 0x1aa   : > { %1520 = vst.msk [vmem:[%s2392_s16 + $0x24] sm:$0xf] %vm1510_vm10, %v1681_v0 }
 0x1ab PF: > { %s13_s12 = sadd.s32 1, %s1977_s12  }
 0x1ac   : > { %p10_p4 = scmp.ge.s32.totalorder %s13_s12, 4  }
 0x1ae   :  { %12 = sbr.rel (!%p10_p4) target bundleno = 1 (0x1), region = 70 }

// kernel: beta_vae_forward.12
= control target key start
LH: loop header
LB: loop body
LE: loop exit
PB: predicated region body
PF: predicated region fallthrough
CT: control target
= control target key end

     0   :  { %s775_s12 = smov 0   ;;  %s832_s0 = inlined_call_operand.vmem [shape: bf16[2,30,32], index: 0, kind: input, shape index: {}]   ;;  %s833_s1 = inlined_call_operand.vmem [shape: bf16[4,32,16], index: 1, kind: input, shape index: {}]   ;;  %s834_s2 = inlined_call_operand.vmem [shape: f32[1,16], index: 2, kind: input, shape index: {}]   ;;  %s835_s3 = inlined_call_operand.vmem [shape: bf16[2,20,16], index: 3, kind: output, shape index: {}]  }
   0x1 LB: > { %s624_s13 = sadd.s32 4294967295, %s753_s12   ;;  %p628_p0 = scmp.ge.s32.totalorder %s753_s12, 1  ;;  %s753_s12 = sphi %s775_s12, %s13_s12  }
   0x2   : > { %p137_p1 = scmp.lt.s32.totalorder %s753_s12, 3 }
   0x4   : > { %p138_p2 = pnand %p628_p0, %p137_p1 }
   0x5   : > { %v733_v0 = vld [vmem:[%s833_s1 + $0x10] sm:$0xff] (!%p138_p2)   ;;  %p161_p3 = scmp.lt.s32.totalorder (!%p138_p2), %s624_s13, 1  ;;  %v734_v1 = vld [vmem:[%s833_s1] sm:$0xff] (!%p138_p2)   ;;  %v735_v2 = vld [vmem:[%s833_s1 + $0x18] sm:$0xff] (!%p138_p2)   ;;  %vm221_vm0 = vcmask (!%p138_p2), 261120   ;;  %vm459_vm2 = vcmask (!%p138_p2), 1044480  }
   0x6   : > { %141 = sbr.rel (%p138_p2) target bundleno = 260 (0x104), region = 32  ;;  %692 = vmatprep.subr.bf16.mxu0 (!%p138_p2), %v733_v0  ;;  %700 = vmatprep.subr.bf16.mxu1 (!%p138_p2), %v734_v1  ;;  %v736_v3 = vld [vmem:[%s833_s1 + $0x8] sm:$0xff] (!%p138_p2)   ;;  %vm193_vm1 = vsmask.f32 (!%p138_p2), 7424  ;;  %v740_v4 = vld [vmem:[%s833_s1 + $0x20] sm:$0xff] (!%p138_p2)   ;;  %v741_v7 = vld [vmem:[%s833_s1 + $0x30] sm:$0xff] (!%p138_p2)  }
   0x7   : > { %693 = vmatpush3.bf16.msra.mxu0 (!%p138_p2), %v733_v0  ;;  %701 = vmatpush3.bf16.msra.mxu1 (!%p138_p2), %v734_v1  ;;  %v743_v14 = vld [vmem:[%s833_s1 + $0x38] sm:$0xff] (!%p138_p2)   ;;  %v742_v24 = vld [vmem:[%s833_s1 + $0x28] sm:$0xff] (!%p138_p2)   ;;  %vm363_vm3 = vsmask.f32 (!%p138_p2), 5376  ;;  %v666_v58 = vld [vmem:[%s834_s2] ss:$0 sm:$0xff] (!%p138_p2) }
   0x8   : > { %694 = vmatprep.subr.bf16.mxu0 (!%p138_p2), %v735_v2  ;;  %702 = vmatprep.subr.bf16.mxu1 (!%p138_p2), %v736_v3  ;;  %vm567_vm6 = vcmask (!%p138_p2), 123904   ;;  %vm564_vm7 = vcmask (!%p138_p2), 125952  }
   0xb   : > { %695 = vmatpush3.bf16.msra.mxu0 (!%p138_p2), %v735_v2  ;;  %703 = vmatpush3.bf16.msra.mxu1 (!%p138_p2), %v736_v3 }
   0xc   : > { %708 = vmatprep.subr.bf16.mxu0 (!%p138_p2), %v740_v4  ;;  %716 = vmatprep.subr.bf16.mxu1 (!%p138_p2), %v741_v7 }
   0xd   : > { %s837_s13 = smov (!%p161_p3, %s624_s13), 1 }
   0xe   : > { %s672_s22 = sshll.u32 %s837_s13, 4  ;;  %s724_s9 = smul.u32 12, %s837_s13 }
   0xf   : > { %s165_s27 = scalar_lea.vmem %s832_s0, %s672_s22 }
  0x10   : > { %v737_v5 = vld [vmem:[%s165_s27] sm:$0xff]   ;;  %v738_v6 = vld [vmem:[%s165_s27 + $0x8] ss:$0 sps:$4 sm:$0x77]   ;;  %s170_s14 = scalar_lea.vmem %s835_s3, %s724_s9 }
  0x11   : > { %704 = vmatprep.mubr.msk.bf16.mxu1 %vm221_vm0, %v737_v5  ;;  %v195_v8 = vshrl.u32 %v737_v5, 16  ;;  %v197_v9 = vshll.u32 %v737_v5, 16  ;;  %v202_v10 = vshll.u32 %v738_v6, 16  ;;  %v206_v11 = vshrl.u32 %v738_v6, 16  ;;  %v344_v16 = vld [vmem:[%s165_s27] sm:$0xc] }
  0x12   : > { %v739_v12 = vld [vmem:[%s165_s27 + $0x8] ss:$0 sps:$4 sm:$0x33]   ;;  %v345_v18 = vld [vmem:[%s165_s27 + $0x4] sm:$0xf] }
  0x13   : > { %v199_v13 = vrot.slane %v197_v9, 1  ;;  %v204_v15 = vrot.slane %v202_v10, 1  ;;  %705 = vmatmul.mubr.msk.bf16.vlgmr.msra.gmra.mrb[0].mxu1 %vm221_vm0, %v739_v12  ;;  %v651_v20 = vcombine.low %v344_v16, %v345_v18  ;;  %v745_v21 = vld [vmem:[%s165_s27 + $0x8] sm:$0x1f]   ;;  %v450_v22 = vld [vmem:[%s165_s27] sm:$0x8] }
  0x14   : > { %717 = vmatpush3.bf16.msra.mxu1 %v741_v7  ;;  %v661_v25 = vcombine.low %v450_v22, %v345_v18  ;;  %v461_v26 = vrot.slane %v745_v21, 3  ;;  %v373_v29 = vshrl.u32 %v745_v21, 16  ;;  %v376_v31 = vshll.u32 %v745_v21, 16 }
  0x15   : > { %v200_v17 = vor.u32 %v199_v13, %v195_v8  ;;  %v208_v19 = vor.u32 %v206_v11, %v204_v15  ;;  %718 = vmatprep.subr.bf16.mxu1 %v743_v14  ;;  %v365_v27 = vshrl.u32 %v651_v20, 16  ;;  %v368_v28 = vshll.u32 %v651_v20, 16 }
  0x16   : > { %v460_v30 = vrot.slane %v661_v25, 3  ;;  %v375_v34 = vrot.slane %v373_v29, 2  ;;  %v378_v36 = vrot.slane %v376_v31, 3 }
  0x17   : > { %v205_v23 = vsel %vm193_vm1, %v200_v17, %v204_v15  ;;  %v367_v32 = vrot.slane %v365_v27, 2  ;;  %v370_v33 = vrot.slane %v368_v28, 3 }
  0x18   : > { %696 = vmatprep.mubr.msk.bf16.mxu0 %vm221_vm0, %v205_v23  ;;  %719 = vmatpush3.bf16.msra.mxu1 %v743_v14  ;;  %v462_v35 = vsel %vm459_vm2, %v460_v30, %v461_v26  ;;  %v379_v38 = vor.u32 %v378_v36, %v375_v34 }
  0x19   : > { %697 = vmatmul.mubr.msk.bf16.vlgmr.msra.gmra.mrb[0].mxu0 %vm221_vm0, %v208_v19  ;;  %720 = vmatprep.mubr.msk.bf16.mxu1 %vm221_vm0, %v462_v35  ;;  %v371_v37 = vor.u32 %v370_v33, %v367_v32 }
  0x1a   : > { %709 = vmatpush3.bf16.msra.mxu0 %v740_v4 }
  0x1b   : > { %710 = vmatprep.subr.bf16.mxu0 %v742_v24  ;;  %721 = vmatmul.mubr.msk.bf16.vlgmr.msra.gmra.mrb[4].mxu1 %vm221_vm0, %v461_v26  ;;  %v380_v39 = vsel %vm363_vm3, %v371_v37, %v379_v38 }
  0x1c   : > { %712 = vmatprep.mubr.msk.bf16.mxu0 %vm221_vm0, %v380_v39 }
  0x1e   : > { %711 = vmatpush3.bf16.msra.mxu0 %v742_v24 }
  0x21   : > { %713 = vmatmul.mubr.msk.bf16.vlgmr.msra.gmra.mrb[4].mxu0 %vm221_vm0, %v379_v38 }
  0xe6   : > { %v706_v40 = vpop.f32.mrb[0].mxu1 }
  0xe7   : > { %v330_v41 = vpop.f32.mrb[1].mxu1 }
  0xe8   : > { %v707_v42 = vpop.f32.mrb[2].mxu1 }
  0xe9   : > { %v333_v43 = vpop.f32.mrb[3].mxu1 }
  0xec   : > { %v698_v44 = vpop.f32.mrb[0].mxu0 }
  0xed   : > { %v339_v45 = vadd.f32 %v706_v40, %v698_v44  ;;  %v262_v46 = vpop.f32.mrb[1].mxu0 }
  0xee   : > { %v331_v47 = vadd.f32 %v330_v41, %v262_v46  ;;  %v699_v48 = vpop.f32.mrb[2].mxu0  ;;  %v722_v51 = vpop.f32.mrb[4].mxu1 }
  0xef   : > { %v265_v49 = vpop.f32.mrb[3].mxu0  ;;  %v515_v52 = vpop.f32.mrb[5].mxu1 }
  0xf0   : > { %v334_v50 = vadd.f32 %v333_v43, %v265_v49  ;;  %v723_v53 = vpop.f32.mrb[6].mxu1 }
  0xf1   : > { %v518_v54 = vpop.f32.mrb[7].mxu1 }
  0xf4   : > { %v714_v55 = vpop.f32.mrb[4].mxu0 }
  0xf5   : > { %v449_v56 = vadd.f32 %v714_v55, %v339_v45  ;;  %v433_v57 = vpop.f32.mrb[5].mxu0 }
  0xf6   : > { %v447_v59 = vadd.f32 %v433_v57, %v331_v47  ;;  %v715_v60 = vpop.f32.mrb[6].mxu0 }
  0xf7   : > { %v531_v61 = vadd.f32 %v722_v51, %v449_v56  ;;  %v436_v62 = vpop.f32.mrb[7].mxu0 }
  0xf8   : > { %v529_v63 = vadd.f32 %v515_v52, %v447_v59  ;;  %v448_v0 = vadd.f32 %v436_v62, %v334_v50 }
  0xf9   : > { %v541_v1 = vadd.f32 %v666_v58, %v531_v61 }
  0xfa   : > { %v539_v2 = vadd.f32 %v666_v58, %v529_v63  ;;  %v530_v3 = vadd.f32 %v518_v54, %v448_v0 }
  0xfb   : > { %vm544_vm4 = vcmp.ge.f32.partialorder %v541_v1, 0.0  ;;  %v547_v4 = vmul.f32 0.01, %v541_v1 }
  0xfc   : > { %vm542_vm5 = vcmp.ge.f32.partialorder %v539_v2, 0.0  ;;  %v545_v5 = vmul.f32 0.01, %v539_v2  ;;  %v540_v6 = vadd.f32 %v666_v58, %v530_v3 }
  0xfd   : > { %v550_v7 = vsel %vm544_vm4, %v541_v1, %v547_v4 }
  0xfe   : > { %v675_v8 = vpack.c.bf16 %v550_v7, %v550_v7  ;;  %v548_v9 = vsel %vm542_vm5, %v539_v2, %v545_v5  ;;  %vm543_vm8 = vcmp.ge.f32.partialorder %v540_v6, 0.0  ;;  %v546_v10 = vmul.f32 0.01, %v540_v6 }
  0xff   : > { %v673_v11 = vpack.c.bf16 %v548_v9, %v548_v9 }
 0x100   : > { %568 = vst.msk [vmem:[%s170_s14 + $0x8] sm:$0x3] %vm567_vm6, %v675_v8  ;;  %v549_v12 = vsel %vm543_vm8, %v540_v6, %v546_v10 }
 0x101   : > { %565 = vst.msk [vmem:[%s170_s14] sm:$0xf] %vm564_vm7, %v673_v11  ;;  %v674_v13 = vpack.c.bf16 %v549_v12, %v549_v12 }
 0x103   : > { %566 = vst.msk [vmem:[%s170_s14 + $0x4] sm:$0xf] %vm564_vm7, %v674_v13 }
 0x104 PF: > { %s13_s12 = sadd.s32 1, %s753_s12  }
 0x105   : > { %p10_p4 = scmp.ge.s32.totalorder %s13_s12, 4  }
 0x107   :  { %12 = sbr.rel (!%p10_p4) target bundleno = 1 (0x1), region = 65 }

// kernel: beta_vae_forward.14
= control target key start
LH: loop header
LB: loop body
LE: loop exit
PB: predicated region body
PF: predicated region fallthrough
CT: control target
= control target key end

     0   :  { %v432_v1 = vmov 0.0   ;;  %vm433_vm0 = vmmov 0   ;;  %v434_v15 = vmov 1966171168   ;;  %v83_v17 = vlaneseq  ;;  %s545_s1 = inlined_call_operand.vmem [shape: bf16[1,384,16], index: 1, kind: input, shape index: {}]   ;;  %s546_s0 = inlined_call_operand.vmem [shape: bf16[1,2,384], index: 0, kind: input, shape index: {}]   ;;  %s547_s2 = inlined_call_operand.vmem [shape: f32[1,16], index: 2, kind: input, shape index: {}]   ;;  %s548_s3 = inlined_call_operand.vmem [shape: f32[1,2,16], index: 3, kind: output, shape index: {}]  }
   0x1   :  { %v408_v0 = vld [vmem:[%s545_s1 + $0x40] sm:$0xff]   ;;  %385 = vmatprep.subr.bf16.mxu1 %v432_v1  ;;  %401 = vmatprep.mubr.msk.bf16.mxu1 %vm433_vm0, %v432_v1  ;;  %v411_v4 = vld [vmem:[%s545_s1 + $0x48] sm:$0xff]   ;;  %v414_v7 = vld [vmem:[%s545_s1 + $0x50] sm:$0xff]   ;;  %v81_v16 = vunpack.c.l.s4 %v434_v15  ;;  %vm322_vm1 = vcmask 123904  }
   0x2   :  { %v409_v2 = vld [vmem:[%s545_s1] sm:$0xff]   ;;  %354 = vmatprep.subr.bf16.mxu0 %v408_v0  ;;  %v412_v5 = vld [vmem:[%s545_s1 + $0x8] sm:$0xff]   ;;  %v415_v8 = vld [vmem:[%s545_s1 + $0x10] sm:$0xff]   ;;  %v84_v22 = vshrl.u32 %v83_v17, 7 }
   0x3   :  { %v410_v3 = vld [vmem:[%s545_s1 + $0x80] sm:$0xff]   ;;  %355 = vmatpush3.bf16.msra.mxu0 %v409_v2  ;;  %v413_v6 = vld [vmem:[%s545_s1 + $0x88] sm:$0xff]   ;;  %v416_v9 = vld [vmem:[%s545_s1 + $0x90] sm:$0xff]   ;;  %v82_v21 = vunpack.c.0.s8 %v81_v16 }
   0x4   :  { %386 = vmatpush3.bf16.msra.mxu1 %v410_v3  ;;  %356 = vmatprep.subr.bf16.mxu0 %v411_v4  ;;  %v417_v10 = vld [vmem:[%s545_s1 + $0x58] sm:$0xff]   ;;  %v420_v13 = vld [vmem:[%s545_s1 + $0x60] sm:$0xff]   ;;  %v423_v19 = vld [vmem:[%s545_s1 + $0x68] sm:$0xff]  }
   0x5   :  { %387 = vmatprep.subr.bf16.mxu1 %v432_v1  ;;  %v418_v11 = vld [vmem:[%s545_s1 + $0x18] sm:$0xff]   ;;  %v421_v14 = vld [vmem:[%s545_s1 + $0x20] sm:$0xff]   ;;  %v424_v20 = vld [vmem:[%s545_s1 + $0x28] sm:$0xff]   ;;  %v85_v26 = vsub.s32 %v82_v21, %v84_v22 }
   0x6   :  { %v419_v12 = vld [vmem:[%s545_s1 + $0x98] sm:$0xff]   ;;  %v422_v18 = vld [vmem:[%s545_s1 + $0xa0] sm:$0xff]   ;;  %v425_v23 = vld [vmem:[%s545_s1 + $0xa8] sm:$0xff]  }
   0x7   :  { %357 = vmatpush3.bf16.msra.mxu0 %v412_v5  ;;  %v426_v24 = vld [vmem:[%s545_s1 + $0x70] sm:$0xff]   ;;  %v329_v27 = vld.sshfl [vmem:[%s546_s0] sm:$0x13 pattern:$0x75316420]  ;;  %v429_v29 = vld [vmem:[%s545_s1 + $0x78] sm:$0xff]  }
   0x8   :  { %388 = vmatpush3.bf16.msra.mxu1 %v413_v6  ;;  %358 = vmatprep.subr.bf16.mxu0 %v414_v7  ;;  %v427_v25 = vld [vmem:[%s545_s1 + $0x30] sm:$0xff]   ;;  %v79_v30 = vcombine.high %v329_v27, %v329_v27  ;;  %v430_v32 = vld [vmem:[%s545_s1 + $0x38] sm:$0xff]   ;;  %v86_v33 = vrot.slane %v329_v27, %v85_v26  ;;  %v328_v38 = vld [vmem:[%s547_s2] ss:$0 sm:$0xff] }
   0x9   :  { %389 = vmatprep.subr.bf16.mxu1 %v432_v1  ;;  %v428_v28 = vld [vmem:[%s545_s1 + $0xb0] sm:$0xff]   ;;  %v431_v34 = vld [vmem:[%s545_s1 + $0xb8] sm:$0xff]  }
   0xa   :  { %v93_v31 = vrot.slane %v79_v30, %v85_v26  ;;  %v94_v35 = vcombine.high %v86_v33, %v86_v33 }
   0xb   :  { %359 = vmatpush3.bf16.msra.mxu0 %v415_v8 }
   0xc   :  { %390 = vmatpush3.bf16.msra.mxu1 %v416_v9  ;;  %360 = vmatprep.subr.bf16.mxu0 %v417_v10 }
   0xd   :  { %391 = vmatprep.subr.bf16.mxu1 %v432_v1  ;;  %274 = vmatprep.mubr.bf16.mxu0 %v93_v31 }
   0xf   :  { %361 = vmatpush3.bf16.msra.mxu0 %v418_v11 }
  0x10   :  { %392 = vmatpush3.bf16.msra.mxu1 %v419_v12  ;;  %362 = vmatprep.subr.bf16.mxu0 %v420_v13 }
  0x11   :  { %393 = vmatprep.subr.bf16.mxu1 %v432_v1 }
  0x13   :  { %363 = vmatpush3.bf16.msra.mxu0 %v421_v14 }
  0x14   :  { %394 = vmatpush3.bf16.msra.mxu1 %v422_v18  ;;  %364 = vmatprep.subr.bf16.mxu0 %v423_v19 }
  0x15   :  { %395 = vmatprep.subr.bf16.mxu1 %v432_v1 }
  0x17   :  { %365 = vmatpush3.bf16.msra.mxu0 %v424_v20 }
  0x18   :  { %396 = vmatpush3.bf16.msra.mxu1 %v425_v23  ;;  %366 = vmatprep.subr.bf16.mxu0 %v426_v24 }
  0x19   :  { %397 = vmatprep.subr.bf16.mxu1 %v432_v1 }
  0x1b   :  { %367 = vmatpush3.bf16.msra.mxu0 %v427_v25 }
  0x1c   :  { %398 = vmatpush3.bf16.msra.mxu1 %v428_v28  ;;  %368 = vmatprep.subr.bf16.mxu0 %v429_v29 }
  0x1d   :  { %399 = vmatprep.subr.bf16.mxu1 %v432_v1 }
  0x1f   :  { %369 = vmatpush3.bf16.msra.mxu0 %v430_v32 }
  0x20   :  { %400 = vmatpush3.bf16.msra.mxu1 %v431_v34 }
  0x22   :  { %275 = vmatmul.mubr.bf16.vlgmr.msra.gmra.mrb[0].mxu0 %v86_v33 }
  0x23   :  { %402 = vmatmul.mubr.bf16.vlgmr.msra.gmra.mrb[0].mxu1 %v94_v35 }
  0xf5   :  { %v370_v36 = vpop.f32.mrb[0].mxu0 }
  0xf6   :  { %v371_v37 = vpop.f32.mrb[1].mxu0  ;;  %v316_v39 = vpop.f32.mrb[0].mxu1 }
  0xf7   :  { %v372_v40 = vadd.f32 %v371_v37, %v370_v36  ;;  %v373_v41 = vpop.f32.mrb[2].mxu0  ;;  %v403_v42 = vpop.f32.mrb[1].mxu1 }
  0xf8   :  { %v374_v43 = vpop.f32.mrb[3].mxu0  ;;  %v319_v44 = vpop.f32.mrb[2].mxu1 }
  0xf9   :  { %v277_v45 = vadd.f32 %v372_v40, %v328_v38  ;;  %v404_v46 = vpop.f32.mrb[3].mxu1 }
  0xfb   :  { %v317_v47 = vadd.f32 %v316_v39, %v277_v45 }
  0xfd   :  { %323 = vst.msk [vmem:[%s548_s3] sm:$0x3] %vm322_vm1, %v317_v47 }

// kernel: beta_vae_forward.15
= control target key start
LH: loop header
LB: loop body
LE: loop exit
PB: predicated region body
PF: predicated region fallthrough
CT: control target
= control target key end

     0   :  { %vm38_vm0 = vcmask 1043456   ;;  %v121_v1 = vmov 0   ;;  %vm34_vm1 = vcmask 64512   ;;  %v19_v6 = vlaneseq  ;;  %s155_s1 = inlined_call_operand.vmem [shape: bf16[1,8,256], index: 1, kind: input, shape index: {}]   ;;  %s156_s0 = inlined_call_operand.vmem [shape: bf16[1,2,8], index: 0, kind: input, shape index: {}]   ;;  %s157_s2 = inlined_call_operand.vmem [shape: f32[1,256], index: 2, kind: input, shape index: {}]   ;;  %s158_s3 = inlined_call_operand.vmem [shape: bf16[1,2,256], index: 3, kind: output, shape index: {}]  }
   0x1   :  { %v16_v0 = vld [vmem:[%s155_s1] sm:$0xff]  ;;  %77 = vmatprep.mubr.bf16.mxu0 %v121_v1  ;;  %v122_v11 = vmov 1966171168  }
   0x2   :  { %v112_v2 = vcombine.high %v16_v0, %v16_v0  ;;  %v111_v3 = vcombine.low %v16_v0, %v16_v0  ;;  %v15_v5 = vld [vmem:[%s156_s0] sm:$0x1]  ;;  %v20_v7 = vshrl.u32 %v19_v6, 7  ;;  %v92_v12 = vunpack.c.l.s4 %v122_v11 }
   0x3   :  { %v17_v9 = vld [vmem:[%s157_s2] sm:$0x3] }
   0x4   :  { %113 = vmatprep.subr.msk.bf16.mxu0 %vm38_vm0, %v112_v2  ;;  %v40_v4 = vsel %vm38_vm0, %v111_v3, 0  ;;  %v21_v8 = vsub.s32 0, %v20_v7  ;;  %v25_v10 = vsub.s32 1, %v20_v7  ;;  %v93_v15 = vunpack.c.0.s8 %v92_v12 }
   0x5   :  { %46 = vmatpush1.bf16.msra.mxu0 %v40_v4 }
   0x6   :  { %v22_v13 = vrot.slane %v17_v9, %v21_v8  ;;  %v26_v14 = vrot.slane %v17_v9, %v25_v10  ;;  %v96_v20 = vsub.s32 %v93_v15, %v20_v7 }
   0x8   :  { %114 = vmatmul.mubr.msk.bf16.vlgmr.msra.gmra.mrb[0].mxu0 %vm34_vm1, %v15_v5 }
  0xdb   :  { %v79_v16 = vpop.f32.mrb[0].mxu0 }
  0xdc   :  { %v80_v17 = vadd.f32 %v79_v16, %v22_v13  ;;  %v81_v18 = vpop.f32.mrb[1].mxu0 }
  0xdd   :  { %v82_v19 = vadd.f32 %v81_v18, %v26_v14  ;;  %v83_v21 = vpop.f32.mrb[2].mxu0 }
  0xde   :  { %v84_v22 = vpop.f32.mrb[3].mxu0 }
  0xdf   :  { %v115_v23 = vpack.c.bf16 %v82_v19, %v80_v17 }
  0xe1   :  { %v97_v24 = vrot.slane %v115_v23, %v96_v20 }
  0xe3   :  { %116 = vst.sshfl [vmem:[%s158_s3] sm:$0x5 pattern:$0x73625140] %v97_v24 }

// kernel: beta_vae_forward.13
= control target key start
LH: loop header
LB: loop body
LE: loop exit
PB: predicated region body
PF: predicated region fallthrough
CT: control target
= control target key end

     0   :  { %s1185_s12 = smov 0   ;;  %s1310_s0 = inlined_call_operand.vmem [shape: bf16[2,42,16], index: 0, kind: input, shape index: {}]   ;;  %s1311_s1 = inlined_call_operand.vmem [shape: bf16[9,16,16], index: 1, kind: input, shape index: {}]   ;;  %s1312_s2 = inlined_call_operand.vmem [shape: f32[1,16], index: 2, kind: input, shape index: {}]   ;;  %s1313_s3 = inlined_call_operand.vmem [shape: bf16[2,24,16], index: 3, kind: output, shape index: {}]  }
   0x1 LB: > { %s972_s13 = sadd.s32 4294967295, %s1163_s12   ;;  %p976_p0 = scmp.ge.s32.totalorder %s1163_s12, 1  ;;  %s1163_s12 = sphi %s1185_s12, %s13_s12  }
   0x2   : > { %p137_p1 = scmp.lt.s32.totalorder %s1163_s12, 3 }
   0x4   : > { %p138_p2 = pnand %p976_p0, %p137_p1 }
   0x5   : > { %v1135_v0 = vld [vmem:[%s1311_s1 + $0x8] sm:$0xff] (!%p138_p2)   ;;  %p161_p3 = scmp.lt.s32.totalorder (!%p138_p2), %s972_s13, 1  ;;  %v1136_v1 = vld [vmem:[%s1311_s1] sm:$0xff] (!%p138_p2)   ;;  %v1204_v2 = vld [vmem:[%s1311_s1 + $0x10] sm:$0xff] (!%p138_p2)   ;;  %vm213_vm0 = vcmask (!%p138_p2), 130048   ;;  %vm335_vm2 = vcmask (!%p138_p2), 1046528  }
   0x6   : > { %141 = sbr.rel (%p138_p2) target bundleno = 285 (0x11d), region = 32  ;;  %1071 = vmatprep.subr.bf16.mxu0 (!%p138_p2), %v1135_v0  ;;  %1077 = vmatprep.subr.bf16.mxu1 (!%p138_p2), %v1136_v1  ;;  %v1141_v3 = vld [vmem:[%s1311_s1 + $0x18] sm:$0xff] (!%p138_p2)   ;;  %vm191_vm1 = vsmask.f32 (!%p138_p2), 7424  ;;  %vm413_vm3 = vcmask (!%p138_p2), 1044480   ;;  %v1226_v7 = vld [vmem:[%s1311_s1 + $0x28] sm:$0xff] (!%p138_p2)  }
   0x7   : > { %1072 = vmatpush3.bf16.msra.mxu0 (!%p138_p2), %v1135_v0  ;;  %1078 = vmatpush3.bf16.msra.mxu1 (!%p138_p2), %v1136_v1  ;;  %v1143_v45 = vld [vmem:[%s1311_s1 + $0x20] sm:$0xff] (!%p138_p2)   ;;  %v1151_v51 = vld [vmem:[%s1311_s1 + $0x38] sm:$0xff] (!%p138_p2)   ;;  %vm487_vm4 = vsmask.f32 (!%p138_p2), 4352  ;;  %vm727_vm5 = vsmask.f32 (!%p138_p2), 5376 }
   0x8   : > { %1083 = vmatprep.subr.bf16.mxu0 (!%p138_p2), %v1204_v2  ;;  %1089 = vmatprep.subr.bf16.mxu1 (!%p138_p2), %v1141_v3  ;;  %vm653_vm6 = vcmask (!%p138_p2), 1045504   ;;  %vm913_vm9 = vcmask (!%p138_p2), 125952  }
   0xd   : > { %s1315_s13 = smov (!%p161_p3, %s972_s13), 1 }
   0xe   : > { %s1125_s20 = smul.u32 24, %s1315_s13 }
   0xf   : > { %s1126_s11 = smul.u32 12, %s1315_s13 }
  0x10   : > { %s1214_s25 = scalar_lea.vmem %s1310_s0, %s1125_s20 }
  0x11   : > { %v172_v4 = vld [vmem:[%s1214_s25] sm:$0xf]  ;;  %v1218_v5 = vld [vmem:[%s1214_s25 + $0x4] sm:$0xf]  ;;  %v1221_v6 = vld [vmem:[%s1214_s25 + $0x8] sm:$0xf]  ;;  %s170_s16 = scalar_lea.vmem %s1313_s3, %s1126_s11 }
  0x12   : > { %v177_v8 = vld [vmem:[%s1214_s25 + $0xc] sm:$0x1]  ;;  %v981_v9 = vcombine.low %v172_v4, %v1218_v5  ;;  %v986_v10 = vcombine.low %v1221_v6, %v1221_v6  ;;  %v328_v11 = vld [vmem:[%s1214_s25] sm:$0xe]  ;;  %v636_v30 = vld [vmem:[%s1214_s25 + $0x4] sm:$0xc]  ;;  %v1011_v49 = vcombine.low %v1218_v5, %v1221_v6 }
  0x13   : > { %v402_v12 = vld [vmem:[%s1214_s25] sm:$0x8]  ;;  %v1235_v13 = vcombine.low %v1221_v6, %v177_v8  ;;  %v992_v14 = vcombine.low %v328_v11, %v1218_v5  ;;  %v403_v15 = vld [vmem:[%s1214_s25 + $0xc] sm:$0x7]  ;;  %v1254_v34 = vld [vmem:[%s1214_s25 + $0x8] sm:$0xf] }
  0x14   : > { %v998_v16 = vcombine.low %v402_v12, %v1218_v5  ;;  %v1241_v17 = vld [vmem:[%s1214_s25 + $0xc] sm:$0xf]  ;;  %v193_v18 = vshrl.u32 %v981_v9, 16  ;;  %v195_v19 = vshll.u32 %v981_v9, 16  ;;  %1079 = vmatprep.mubr.msk.bf16.mxu1 %vm213_vm0, %v981_v9  ;;  %v999_v20 = vcombine.low %v1221_v6, %v403_v15  ;;  %v720_v43 = vld [vmem:[%s1214_s25 + $0x10] sm:$0x7] }
  0x15   : > { %v1005_v21 = vcombine.low %v1221_v6, %v1241_v17  ;;  %v200_v22 = vshll.u32 %v1235_v13, 16  ;;  %v204_v23 = vshrl.u32 %v1235_v13, 16  ;;  %1080 = vmatmul.mubr.msk.bf16.vlgmr.msra.gmra.mrb[0].mxu1 %vm213_vm0, %v986_v10  ;;  %v336_v24 = vrot.slane %v992_v14, 1  ;;  %v638_v38 = vld [vmem:[%s1214_s25 + $0xc] sm:$0xf]  ;;  %v1155_v10 = vld [vmem:[%s1311_s1 + $0x40] sm:$0xff]  }
  0x16   : > { %v337_v25 = vrot.slane %v1235_v13, 1  ;;  %v197_v26 = vrot.slane %v195_v19, 1  ;;  %1090 = vmatpush3.bf16.msra.mxu1 %v1141_v3  ;;  %v414_v27 = vrot.slane %v998_v16, 3  ;;  %v415_v28 = vrot.slane %v999_v20, 3  ;;  %v639_v59 = vld [vmem:[%s1214_s25 + $0x10] sm:$0x3] }
  0x17   : > { %v489_v29 = vshrl.u32 %v998_v16, 16  ;;  %v202_v31 = vrot.slane %v200_v22, 1  ;;  %1101 = vmatprep.subr.bf16.mxu1 %v1226_v7  ;;  %v492_v32 = vshll.u32 %v998_v16, 16  ;;  %v497_v33 = vshrl.u32 %v1005_v21, 16  ;;  %v808_v8 = vld [vmem:[%s1214_s25 + $0x4] sm:$0x8] }
  0x18   : > { %v198_v35 = vor.u32 %v197_v26, %v193_v18  ;;  %v416_v36 = vsel %vm413_vm3, %v414_v27, %v415_v28  ;;  %v500_v37 = vshll.u32 %v1005_v21, 16  ;;  %v338_v40 = vsel %vm335_vm2, %v336_v24, %v337_v25 }
  0x19   : > { %v206_v39 = vor.u32 %v204_v23, %v202_v31  ;;  %1091 = vmatprep.mubr.msk.bf16.mxu1 %vm213_vm0, %v416_v36  ;;  %v491_v41 = vrot.slane %v489_v29, 3  ;;  %v494_v42 = vrot.slane %v492_v32, 4  ;;  %v499_v46 = vrot.slane %v497_v33, 3 }
  0x1a   : > { %v203_v44 = vsel %vm191_vm1, %v198_v35, %v202_v31  ;;  %v502_v47 = vrot.slane %v500_v37, 4  ;;  %v1018_v48 = vcombine.low %v636_v30, %v1254_v34  ;;  %v1025_v50 = vcombine.low %v638_v38, %v720_v43 }
  0x1b   : > { %1073 = vmatprep.mubr.msk.bf16.mxu0 %vm213_vm0, %v203_v44  ;;  %v495_v56 = vor.u32 %v494_v42, %v491_v41  ;;  %v1012_v3 = vcombine.low %v1241_v17, %v1241_v17  ;;  %v1019_v4 = vcombine.low %v638_v38, %v639_v59  ;;  %v1031_v11 = vcombine.low %v808_v8, %v1254_v34 }
  0x1c   : > { %1074 = vmatmul.mubr.msk.bf16.vlgmr.msra.gmra.mrb[0].mxu0 %vm213_vm0, %v206_v39  ;;  %v729_v52 = vshrl.u32 %v1018_v48, 16  ;;  %v732_v53 = vshll.u32 %v1018_v48, 16  ;;  %v737_v54 = vshrl.u32 %v1025_v50, 16  ;;  %v740_v55 = vshll.u32 %v1025_v50, 16 }
  0x1d   : > { %1084 = vmatpush3.bf16.msra.mxu0 %v1204_v2  ;;  %1085 = vmatprep.mubr.msk.bf16.mxu0 %vm213_vm0, %v338_v40  ;;  %v503_v57 = vor.u32 %v502_v47, %v499_v46  ;;  %v1148_v2 = vld [vmem:[%s1311_s1 + $0x30] sm:$0xff]   ;;  %v654_v6 = vrot.slane %v1018_v48, 2  ;;  %v815_v12 = vrot.slane %v1031_v11, 3  ;;  %v816_v13 = vrot.slane %v1025_v50, 3 }
  0x1e   : > { %1095 = vmatprep.subr.bf16.mxu0 %v1143_v45  ;;  %1092 = vmatmul.mubr.msk.bf16.vlgmr.msra.gmra.mrb[4].mxu1 %vm213_vm0, %v415_v28  ;;  %v731_v58 = vrot.slane %v729_v52, 2  ;;  %v734_v60 = vrot.slane %v732_v53, 3  ;;  %v739_v61 = vrot.slane %v737_v54, 2  ;;  %v742_v62 = vrot.slane %v740_v55, 3 }
  0x1f   : > { %1102 = vmatpush3.bf16.msra.mxu1 %v1226_v7  ;;  %1103 = vmatprep.mubr.msk.bf16.mxu1 %vm213_vm0, %v1011_v49  ;;  %v504_v1 = vsel %vm487_vm4, %v495_v56, %v503_v57  ;;  %v655_v7 = vrot.slane %v1019_v4, 2  ;;  %v817_v14 = vsel %vm413_vm3, %v815_v12, %v816_v13 }
  0x20   : > { %1113 = vmatprep.subr.bf16.mxu1 %v1151_v51  ;;  %v735_v63 = vor.u32 %v734_v60, %v731_v58  ;;  %v743_v0 = vor.u32 %v742_v62, %v739_v61 }
  0x21   : > { %v656_v9 = vsel %vm653_vm6, %v654_v6, %v655_v7 }
  0x22   : > { %v744_v5 = vsel %vm727_vm5, %v735_v63, %v743_v0 }
  0x24   : > { %1086 = vmatmul.mubr.msk.bf16.vlgmr.msra.gmra.mrb[4].mxu0 %vm213_vm0, %v337_v25 }
  0x25   : > { %1096 = vmatpush3.bf16.msra.mxu0 %v1143_v45  ;;  %1097 = vmatprep.mubr.msk.bf16.mxu0 %vm213_vm0, %v504_v1 }
  0x26   : > { %1107 = vmatprep.subr.bf16.mxu0 %v1148_v2  ;;  %1104 = vmatmul.mubr.msk.bf16.vlgmr.msra.gmra.mrb[8].mxu1 %vm213_vm0, %v1012_v3 }
  0x27   : > { %1114 = vmatpush3.bf16.msra.mxu1 %v1151_v51  ;;  %1115 = vmatprep.mubr.msk.bf16.mxu1 %vm213_vm0, %v744_v5  ;;  %v1035_v5 = vld [vmem:[%s1312_s2] ss:$0 sm:$0xff] }
  0x2c   : > { %1098 = vmatmul.mubr.msk.bf16.vlgmr.msra.gmra.mrb[8].mxu0 %vm213_vm0, %v503_v57 }
  0x2d   : > { %1108 = vmatpush3.bf16.msra.mxu0 %v1148_v2  ;;  %1109 = vmatprep.mubr.msk.bf16.mxu0 %vm213_vm0, %v656_v9 }
  0x2e   : > { %1119 = vmatprep.subr.bf16.mxu0 %v1155_v10  ;;  %1116 = vmatmul.mubr.msk.bf16.vlgmr.msra.gmra.mrb[12].mxu1 %vm213_vm0, %v743_v0 }
  0x34   : > { %1110 = vmatmul.mubr.msk.bf16.vlgmr.msra.gmra.mrb[12].mxu0 %vm213_vm0, %v655_v7 }
  0x35   : > { %1120 = vmatpush3.bf16.msra.mxu0 %v1155_v10  ;;  %1121 = vmatprep.mubr.msk.bf16.mxu0 %vm213_vm0, %v817_v14 }
  0x3c   : > { %1122 = vmatmul.mubr.msk.bf16.vlgmr.msra.gmra.mrb[16].mxu0 %vm213_vm0, %v816_v13 }
  0xe8   : > { %v1081_v15 = vpop.f32.mrb[0].mxu1 }
  0xe9   : > { %v314_v16 = vpop.f32.mrb[1].mxu1 }
  0xea   : > { %v1082_v17 = vpop.f32.mrb[2].mxu1 }
  0xeb   : > { %v317_v18 = vpop.f32.mrb[3].mxu1 }
  0xef   : > { %v1075_v19 = vpop.f32.mrb[0].mxu0 }
  0xf0   : > { %v323_v20 = vadd.f32 %v1081_v15, %v1075_v19  ;;  %v254_v21 = vpop.f32.mrb[1].mxu0 }
  0xf1   : > { %v315_v22 = vadd.f32 %v314_v16, %v254_v21  ;;  %v1076_v23 = vpop.f32.mrb[2].mxu0  ;;  %v1093_v24 = vpop.f32.mrb[4].mxu1 }
  0xf2   : > { %v257_v25 = vpop.f32.mrb[3].mxu0  ;;  %v463_v26 = vpop.f32.mrb[5].mxu1 }
  0xf3   : > { %v318_v27 = vadd.f32 %v317_v18, %v257_v25  ;;  %v1094_v28 = vpop.f32.mrb[6].mxu1 }
  0xf4   : > { %v466_v29 = vpop.f32.mrb[7].mxu1 }
  0xf7   : > { %v1087_v30 = vpop.f32.mrb[4].mxu0 }
  0xf8   : > { %v401_v31 = vadd.f32 %v1087_v30, %v323_v20  ;;  %v385_v32 = vpop.f32.mrb[5].mxu0 }
  0xf9   : > { %v399_v33 = vadd.f32 %v385_v32, %v315_v22  ;;  %v1088_v34 = vpop.f32.mrb[6].mxu0  ;;  %v1105_v35 = vpop.f32.mrb[8].mxu1 }
  0xfa   : > { %v479_v36 = vadd.f32 %v1093_v24, %v401_v31  ;;  %v388_v37 = vpop.f32.mrb[7].mxu0  ;;  %v619_v38 = vpop.f32.mrb[9].mxu1 }
  0xfb   : > { %v400_v39 = vadd.f32 %v388_v37, %v318_v27  ;;  %v477_v40 = vadd.f32 %v463_v26, %v399_v33  ;;  %v1106_v41 = vpop.f32.mrb[10].mxu1 }
  0xfc   : > { %v622_v42 = vpop.f32.mrb[11].mxu1 }
  0xfd   : > { %v478_v43 = vadd.f32 %v466_v29, %v400_v39 }
  0xff   : > { %v1099_v44 = vpop.f32.mrb[8].mxu0 }
 0x100   : > { %v567_v45 = vadd.f32 %v1099_v44, %v479_v36  ;;  %v551_v46 = vpop.f32.mrb[9].mxu0 }
 0x101   : > { %v565_v47 = vadd.f32 %v551_v46, %v477_v40  ;;  %v1100_v48 = vpop.f32.mrb[10].mxu0  ;;  %v1117_v49 = vpop.f32.mrb[12].mxu1 }
 0x102   : > { %v635_v50 = vadd.f32 %v1105_v35, %v567_v45  ;;  %v554_v51 = vpop.f32.mrb[11].mxu0  ;;  %v791_v52 = vpop.f32.mrb[13].mxu1 }
 0x103   : > { %v566_v53 = vadd.f32 %v554_v51, %v478_v43  ;;  %v633_v54 = vadd.f32 %v619_v38, %v565_v47  ;;  %v1118_v55 = vpop.f32.mrb[14].mxu1 }
 0x104   : > { %v794_v56 = vpop.f32.mrb[15].mxu1 }
 0x105   : > { %v634_v57 = vadd.f32 %v622_v42, %v566_v53 }
 0x107   : > { %v1111_v58 = vpop.f32.mrb[12].mxu0 }
 0x108   : > { %v719_v59 = vadd.f32 %v1111_v58, %v635_v50  ;;  %v703_v60 = vpop.f32.mrb[13].mxu0 }
 0x109   : > { %v717_v61 = vadd.f32 %v703_v60, %v633_v54  ;;  %v1112_v62 = vpop.f32.mrb[14].mxu0 }
 0x10a   : > { %v807_v63 = vadd.f32 %v1117_v49, %v719_v59  ;;  %v706_v0 = vpop.f32.mrb[15].mxu0 }
 0x10b   : > { %v718_v1 = vadd.f32 %v706_v0, %v634_v57  ;;  %v805_v2 = vadd.f32 %v791_v52, %v717_v61 }
 0x10d   : > { %v806_v3 = vadd.f32 %v794_v56, %v718_v1 }
 0x10f   : > { %v1123_v4 = vpop.f32.mrb[16].mxu0 }
 0x110   : > { %v880_v6 = vadd.f32 %v1123_v4, %v807_v63  ;;  %v864_v7 = vpop.f32.mrb[17].mxu0 }
 0x111   : > { %v878_v8 = vadd.f32 %v864_v7, %v805_v2  ;;  %v1124_v9 = vpop.f32.mrb[18].mxu0 }
 0x112   : > { %v890_v10 = vadd.f32 %v1035_v5, %v880_v6  ;;  %v867_v11 = vpop.f32.mrb[19].mxu0 }
 0x113   : > { %v888_v12 = vadd.f32 %v1035_v5, %v878_v8  ;;  %v879_v13 = vadd.f32 %v867_v11, %v806_v3 }
 0x114   : > { %vm893_vm7 = vcmp.ge.f32.partialorder %v890_v10, 0.0  ;;  %v896_v14 = vmul.f32 0.01, %v890_v10 }
 0x115   : > { %vm891_vm8 = vcmp.ge.f32.partialorder %v888_v12, 0.0  ;;  %v894_v15 = vmul.f32 0.01, %v888_v12  ;;  %v889_v16 = vadd.f32 %v1035_v5, %v879_v13 }
 0x116   : > { %v899_v17 = vsel %vm893_vm7, %v890_v10, %v896_v14 }
 0x117   : > { %v1043_v18 = vpack.c.bf16 %v899_v17, %v899_v17  ;;  %v897_v19 = vsel %vm891_vm8, %v888_v12, %v894_v15  ;;  %vm892_vm10 = vcmp.ge.f32.partialorder %v889_v16, 0.0  ;;  %v895_v20 = vmul.f32 0.01, %v889_v16 }
 0x118   : > { %v1041_v21 = vpack.c.bf16 %v897_v19, %v897_v19 }
 0x119   : > { %916 = vst.msk [vmem:[%s170_s16 + $0x8] sm:$0xf] %vm913_vm9, %v1043_v18  ;;  %v898_v22 = vsel %vm892_vm10, %v889_v16, %v895_v20 }
 0x11a   : > { %914 = vst.msk [vmem:[%s170_s16] sm:$0xf] %vm913_vm9, %v1041_v21  ;;  %v1042_v23 = vpack.c.bf16 %v898_v22, %v898_v22 }
 0x11c   : > { %915 = vst.msk [vmem:[%s170_s16 + $0x4] sm:$0xf] %vm913_vm9, %v1042_v23 }
 0x11d PF: > { %s13_s12 = sadd.s32 1, %s1163_s12  }
 0x11e   : > { %p10_p4 = scmp.ge.s32.totalorder %s13_s12, 4  }
 0x120   :  { %12 = sbr.rel (!%p10_p4) target bundleno = 1 (0x1), region = 70 }

// kernel: beta_vae_forward.16
= control target key start
LH: loop header
LB: loop body
LE: loop exit
PB: predicated region body
PF: predicated region fallthrough
CT: control target
= control target key end

     0   :  { %s717_s12 = smov 0   ;;  %s763_s0 = inlined_call_operand.vmem [shape: bf16[2,30,16], index: 0, kind: input, shape index: {}]   ;;  %s764_s1 = inlined_call_operand.vmem [shape: bf16[4,16,32], index: 1, kind: input, shape index: {}]   ;;  %s765_s2 = inlined_call_operand.vmem [shape: f32[1,32], index: 2, kind: input, shape index: {}]   ;;  %s766_s3 = inlined_call_operand.vmem [shape: bf16[2,20,32], index: 3, kind: output, shape index: {}]  }
   0x1 LB: > { %s592_s13 = sadd.s32 4294967295, %s695_s12   ;;  %p596_p0 = scmp.ge.s32.totalorder %s695_s12, 1  ;;  %s695_s12 = sphi %s717_s12, %s13_s12  }
   0x2   : > { %p137_p1 = scmp.lt.s32.totalorder %s695_s12, 3 }
   0x4   : > { %p138_p2 = pnand %p596_p0, %p137_p1 }
   0x5   : > { %v679_v0 = vld [vmem:[%s764_s1 + $0x8] sm:$0xff] (!%p138_p2)   ;;  %p161_p3 = scmp.lt.s32.totalorder (!%p138_p2), %s592_s13, 1  ;;  %v680_v1 = vld [vmem:[%s764_s1] sm:$0xff] (!%p138_p2)   ;;  %v684_v2 = vld [vmem:[%s764_s1 + $0x10] sm:$0xff] (!%p138_p2)   ;;  %vm211_vm0 = vcmask (!%p138_p2), 130048   ;;  %vm433_vm2 = vcmask (!%p138_p2), 1044480  }
   0x6   : > { %141 = sbr.rel (%p138_p2) target bundleno = 260 (0x104), region = 32  ;;  %646 = vmatprep.subr.bf16.mxu0 (!%p138_p2), %v679_v0  ;;  %652 = vmatprep.subr.bf16.mxu1 (!%p138_p2), %v680_v1  ;;  %v685_v3 = vld [vmem:[%s764_s1 + $0x18] sm:$0xff] (!%p138_p2)   ;;  %vm189_vm1 = vsmask.f32 (!%p138_p2), 7424  ;;  %vm345_vm3 = vsmask.f32 (!%p138_p2), 5376 }
   0x7   : > { %647 = vmatpush3.bf16.msra.mxu0 (!%p138_p2), %v679_v0  ;;  %653 = vmatpush3.bf16.msra.mxu1 (!%p138_p2), %v680_v1  ;;  %v624_v54 = vld [vmem:[%s765_s2] ss:$0 sm:$0xff] (!%p138_p2)  ;;  %vm535_vm6 = vcmask (!%p138_p2), 254976   ;;  %vm532_vm7 = vcmask (!%p138_p2), 257024  }
   0x8   : > { %658 = vmatprep.subr.bf16.mxu0 (!%p138_p2), %v684_v2  ;;  %664 = vmatprep.subr.bf16.mxu1 (!%p138_p2), %v685_v3 }
   0xd   : > { %s768_s13 = smov (!%p161_p3, %s592_s13), 1 }
   0xe   : > { %s630_s20 = sshll.u32 %s768_s13, 4  ;;  %s670_s28 = smul.u32 12, %s768_s13 }
   0xf   : > { %s165_s25 = scalar_lea.vmem %s763_s0, %s630_s20 }
  0x10   : > { %v681_v4 = vld [vmem:[%s165_s25] sm:$0xff]   ;;  %v682_v5 = vld [vmem:[%s165_s25 + $0x8] ss:$0 sps:$4 sm:$0x77]   ;;  %s170_s4 = scalar_lea.vmem %s766_s3, %s670_s28 }
  0x11   : > { %654 = vmatprep.mubr.msk.bf16.mxu1 %vm211_vm0, %v681_v4  ;;  %v191_v6 = vshrl.u32 %v681_v4, 16  ;;  %v193_v7 = vshll.u32 %v681_v4, 16  ;;  %v328_v8 = vld [vmem:[%s165_s25] sm:$0xc]  ;;  %v198_v9 = vshll.u32 %v682_v5, 16  ;;  %v202_v10 = vshrl.u32 %v682_v5, 16 }
  0x12   : > { %v683_v11 = vld [vmem:[%s165_s25 + $0x8] ss:$0 sps:$4 sm:$0x33]   ;;  %v329_v13 = vld [vmem:[%s165_s25 + $0x4] sm:$0xf] }
  0x13   : > { %v195_v12 = vrot.slane %v193_v7, 1  ;;  %v200_v14 = vrot.slane %v198_v9, 1  ;;  %655 = vmatmul.mubr.msk.bf16.vlgmr.msra.gmra.mrb[0].mxu1 %vm211_vm0, %v683_v11  ;;  %v613_v15 = vcombine.low %v328_v8, %v329_v13  ;;  %v687_v16 = vld [vmem:[%s165_s25 + $0x8] sm:$0x1f]   ;;  %v426_v18 = vld [vmem:[%s165_s25] sm:$0x8] }
  0x14   : > { %665 = vmatpush3.bf16.msra.mxu1 %v685_v3  ;;  %v620_v20 = vcombine.low %v426_v18, %v329_v13  ;;  %v435_v21 = vrot.slane %v687_v16, 3  ;;  %v355_v25 = vshrl.u32 %v687_v16, 16  ;;  %v358_v26 = vshll.u32 %v687_v16, 16 }
  0x15   : > { %v196_v17 = vor.u32 %v195_v12, %v191_v6  ;;  %v204_v19 = vor.u32 %v202_v10, %v200_v14  ;;  %v347_v22 = vshrl.u32 %v613_v15, 16  ;;  %v350_v24 = vshll.u32 %v613_v15, 16 }
  0x16   : > { %v434_v27 = vrot.slane %v620_v20, 3  ;;  %v357_v30 = vrot.slane %v355_v25, 2  ;;  %v360_v31 = vrot.slane %v358_v26, 3 }
  0x17   : > { %v201_v23 = vsel %vm189_vm1, %v196_v17, %v200_v14  ;;  %v349_v28 = vrot.slane %v347_v22, 2  ;;  %v352_v29 = vrot.slane %v350_v24, 3 }
  0x18   : > { %648 = vmatprep.mubr.msk.bf16.mxu0 %vm211_vm0, %v201_v23  ;;  %v436_v32 = vsel %vm433_vm2, %v434_v27, %v435_v21  ;;  %v361_v34 = vor.u32 %v360_v31, %v357_v30 }
  0x19   : > { %649 = vmatmul.mubr.msk.bf16.vlgmr.msra.gmra.mrb[0].mxu0 %vm211_vm0, %v204_v19  ;;  %666 = vmatprep.mubr.msk.bf16.mxu1 %vm211_vm0, %v436_v32  ;;  %v353_v33 = vor.u32 %v352_v29, %v349_v28 }
  0x1a   : > { %659 = vmatpush3.bf16.msra.mxu0 %v684_v2 }
  0x1b   : > { %667 = vmatmul.mubr.msk.bf16.vlgmr.msra.gmra.mrb[4].mxu1 %vm211_vm0, %v435_v21  ;;  %v362_v35 = vsel %vm345_vm3, %v353_v33, %v361_v34 }
  0x1c   : > { %660 = vmatprep.mubr.msk.bf16.mxu0 %vm211_vm0, %v362_v35 }
  0x21   : > { %661 = vmatmul.mubr.msk.bf16.vlgmr.msra.gmra.mrb[4].mxu0 %vm211_vm0, %v361_v34 }
  0xe6   : > { %v656_v36 = vpop.f32.mrb[0].mxu1 }
  0xe7   : > { %v314_v37 = vpop.f32.mrb[1].mxu1 }
  0xe8   : > { %v657_v38 = vpop.f32.mrb[2].mxu1 }
  0xe9   : > { %v317_v39 = vpop.f32.mrb[3].mxu1 }
  0xec   : > { %v650_v40 = vpop.f32.mrb[0].mxu0 }
  0xed   : > { %v323_v41 = vadd.f32 %v656_v36, %v650_v40  ;;  %v252_v42 = vpop.f32.mrb[1].mxu0 }
  0xee   : > { %v315_v43 = vadd.f32 %v314_v37, %v252_v42  ;;  %v651_v44 = vpop.f32.mrb[2].mxu0  ;;  %v668_v46 = vpop.f32.mrb[4].mxu1 }
  0xef   : > { %v255_v45 = vpop.f32.mrb[3].mxu0  ;;  %v483_v48 = vpop.f32.mrb[5].mxu1 }
  0xf0   : > { %v318_v47 = vadd.f32 %v317_v39, %v255_v45  ;;  %v669_v49 = vpop.f32.mrb[6].mxu1 }
  0xf1   : > { %v486_v50 = vpop.f32.mrb[7].mxu1 }
  0xf4   : > { %v662_v51 = vpop.f32.mrb[4].mxu0 }
  0xf5   : > { %v425_v52 = vadd.f32 %v662_v51, %v323_v41  ;;  %v409_v53 = vpop.f32.mrb[5].mxu0 }
  0xf6   : > { %v423_v55 = vadd.f32 %v409_v53, %v315_v43  ;;  %v663_v56 = vpop.f32.mrb[6].mxu0 }
  0xf7   : > { %v499_v57 = vadd.f32 %v668_v46, %v425_v52  ;;  %v412_v58 = vpop.f32.mrb[7].mxu0 }
  0xf8   : > { %v497_v59 = vadd.f32 %v483_v48, %v423_v55  ;;  %v424_v60 = vadd.f32 %v412_v58, %v318_v47 }
  0xf9   : > { %v509_v61 = vadd.f32 %v624_v54, %v499_v57 }
  0xfa   : > { %v507_v62 = vadd.f32 %v624_v54, %v497_v59  ;;  %v498_v63 = vadd.f32 %v486_v50, %v424_v60 }
  0xfb   : > { %vm512_vm4 = vcmp.ge.f32.partialorder %v509_v61, 0.0  ;;  %v515_v0 = vmul.f32 0.01, %v509_v61 }
  0xfc   : > { %vm510_vm5 = vcmp.ge.f32.partialorder %v507_v62, 0.0  ;;  %v513_v1 = vmul.f32 0.01, %v507_v62  ;;  %v508_v2 = vadd.f32 %v624_v54, %v498_v63 }
  0xfd   : > { %v518_v3 = vsel %vm512_vm4, %v509_v61, %v515_v0 }
  0xfe   : > { %v633_v4 = vpack.c.bf16 %v518_v3, %v518_v3  ;;  %v516_v5 = vsel %vm510_vm5, %v507_v62, %v513_v1  ;;  %vm511_vm8 = vcmp.ge.f32.partialorder %v508_v2, 0.0  ;;  %v514_v6 = vmul.f32 0.01, %v508_v2 }
  0xff   : > { %v631_v7 = vpack.c.bf16 %v516_v5, %v516_v5 }
 0x100   : > { %536 = vst.msk [vmem:[%s170_s4 + $0x8] sm:$0x3] %vm535_vm6, %v633_v4  ;;  %v517_v8 = vsel %vm511_vm8, %v508_v2, %v514_v6 }
 0x101   : > { %533 = vst.msk [vmem:[%s170_s4] sm:$0xf] %vm532_vm7, %v631_v7  ;;  %v632_v9 = vpack.c.bf16 %v517_v8, %v517_v8 }
 0x103   : > { %534 = vst.msk [vmem:[%s170_s4 + $0x4] sm:$0xf] %vm532_vm7, %v632_v9 }
 0x104 PF: > { %s13_s12 = sadd.s32 1, %s695_s12  }
 0x105   : > { %p10_p4 = scmp.ge.s32.totalorder %s13_s12, 4  }
 0x107   :  { %12 = sbr.rel (!%p10_p4) target bundleno = 1 (0x1), region = 65 }

// kernel: beta_vae_forward.18
= control target key start
LH: loop header
LB: loop body
LE: loop exit
PB: predicated region body
PF: predicated region fallthrough
CT: control target
= control target key end

     0   :  { %s1093_s12 = smov 0   ;;  %s1273_s0 = inlined_call_operand.vmem [shape: bf16[2,90,8], index: 0, kind: input, shape index: {}]   ;;  %s1274_s1 = inlined_call_operand.vmem [shape: bf16[4,8,32], index: 1, kind: input, shape index: {}]   ;;  %s1275_s2 = inlined_call_operand.vmem [shape: f32[1,32], index: 2, kind: input, shape index: {}]   ;;  %s1276_s3 = inlined_call_operand.vmem [shape: bf16[2,72,32], index: 3, kind: output, shape index: {}]  }
   0x1 LB: > { %s864_s13 = sadd.s32 4294967295, %s1069_s12   ;;  %p868_p0 = scmp.ge.s32.totalorder %s1069_s12, 1  ;;  %s1069_s12 = sphi %s1093_s12, %s13_s12  }
   0x2   : > { %p137_p1 = scmp.lt.s32.totalorder %s1069_s12, 3 }
   0x4   : > { %p138_p2 = pnand %p868_p0, %p137_p1 }
   0x5   : > { %v871_v0 = vld [vmem:[%s1274_s1 + $0x4] sm:$0xf] (!%p138_p2)  ;;  %vm266_vm0 = vcmask (!%p138_p2), 1043456   ;;  %v181_v1 = vld [vmem:[%s1274_s1] sm:$0xf] (!%p138_p2)  ;;  %v1071_v2 = vmov (!%p138_p2), 0.0  }
   0x6   : > { %141 = sbr.rel (%p138_p2) target bundleno = 321 (0x141), region = 32  ;;  %951 = vmatprep.subr.bf16.mxu0 (!%p138_p2), %v1071_v2  ;;  %973 = vmatprep.subr.bf16.mxu1 (!%p138_p2), %v1071_v2  ;;  %v268_v3 = vsel (!%p138_p2), %vm266_vm0, %v871_v0, 0  ;;  %v355_v4 = vsel (!%p138_p2), %vm266_vm0, %v181_v1, 0  ;;  %p161_p3 = scmp.lt.s32.totalorder (!%p138_p2), %s864_s13, 1  ;;  %vm1072_vm1 = vmmov (!%p138_p2), 0   ;;  %vm250_vm2 = vcmask (!%p138_p2), 64512  }
   0x7   : > { %952 = vmatpush3.bf16.msra.mxu0 (!%p138_p2), %v268_v3  ;;  %974 = vmatpush3.bf16.msra.mxu1 (!%p138_p2), %v355_v4  ;;  %v899_v5 = vld [vmem:[%s1274_s1 + $0xc] sm:$0xf] (!%p138_p2)  ;;  %v888_v14 = vld [vmem:[%s1274_s1 + $0x8] sm:$0xf] (!%p138_p2)  ;;  %vm210_vm3 = vsmask.f32 (!%p138_p2), 7424 }
   0x8   : > { %975 = vmatprep.mubr.msk.bf16.mxu1 (!%p138_p2), %vm1072_vm1, %v1071_v2  ;;  %953 = vmatprep.mubr.msk.bf16.mxu0 (!%p138_p2), %vm1072_vm1, %v1071_v2  ;;  %v636_v7 = vsel (!%p138_p2), %vm266_vm0, %v899_v5, 0  ;;  %v521_v19 = vsel (!%p138_p2), %vm266_vm0, %v888_v14, 0  ;;  %vm610_vm4 = vcmask (!%p138_p2), 1046528   ;;  %vm799_vm6 = vcmask (!%p138_p2), 257024  }
   0x9   : > { %995 = vmatprep.subr.bf16.mxu0 (!%p138_p2), %v1071_v2  ;;  %1017 = vmatprep.subr.bf16.mxu1 (!%p138_p2), %v1071_v2 }
   0xd   : > { %s1278_s13 = smov (!%p161_p3, %s864_s13), 1 }
   0xe   : > { %s1039_s18 = smul.u32 48, %s1278_s13 }
   0xf   : > { %s1040_s28 = smul.u32 36, %s1278_s13 }
  0x10   : > { %s1126_s23 = scalar_lea.vmem %s1273_s0, %s1039_s18 }
  0x11   : > { %v1051_v6 = vld [vmem:[%s1126_s23] sm:$0xff]   ;;  %v1052_v8 = vld [vmem:[%s1126_s23 + $0x8] sm:$0xff]   ;;  %v1053_v12 = vld [vmem:[%s1126_s23 + $0x10] sm:$0xff]   ;;  %s1237_s4 = scalar_lea.vmem %s1276_s3, %s1040_s28 }
  0x12   : > { %976 = vmatmul.mubr.msk.bf16.vlgmr.msra.gmra.mrb[0].mxu1 %vm250_vm2, %v1051_v6  ;;  %v212_v9 = vshrl.u32 %v1051_v6, 16  ;;  %v214_v10 = vshll.u32 %v1051_v6, 16  ;;  %v219_v11 = vshll.u32 %v1052_v8, 16  ;;  %v223_v17 = vshrl.u32 %v1052_v8, 16  ;;  %v1054_v23 = vld [vmem:[%s1126_s23 + $0x18] sm:$0xff]   ;;  %v1058_v43 = vld [vmem:[%s1126_s23 + $0xc] sm:$0xff]  }
  0x13   : > { %1018 = vmatpush3.bf16.msra.mxu1 %v636_v7  ;;  %979 = vmatprep.mubr.msk.bf16.mxu1 %vm1072_vm1, %v1071_v2  ;;  %v227_v18 = vshll.u32 %v1053_v12, 16  ;;  %v231_v25 = vshrl.u32 %v1053_v12, 16  ;;  %v235_v26 = vshll.u32 %v1054_v23, 16  ;;  %v180_v27 = vld [vmem:[%s1126_s23 + $0x20] sm:$0xf]  ;;  %v239_v33 = vshrl.u32 %v1054_v23, 16 }
  0x14   : > { %v216_v13 = vrot.slane %v214_v10, 1  ;;  %v221_v15 = vrot.slane %v219_v11, 1  ;;  %v182_v28 = vld [vmem:[%s1126_s23 + $0x24] sm:$0x1]  ;;  %v430_v38 = vld [vmem:[%s1126_s23 + $0x8] sm:$0xf]  ;;  %v882_v42 = vcombine.low %v180_v27, %v180_v27 }
  0x15   : > { %v229_v22 = vrot.slane %v227_v18, 1  ;;  %v237_v30 = vrot.slane %v235_v26, 1  ;;  %v876_v31 = vcombine.low %v180_v27, %v182_v28  ;;  %v429_v37 = vld [vmem:[%s1126_s23 + $0x4] sm:$0xf]  ;;  %v612_v48 = vrot.slane %v1058_v43, 1  ;;  %v1060_v54 = vld [vmem:[%s1126_s23 + $0x14] sm:$0xff]  }
  0x16   : > { %v217_v16 = vor.u32 %v216_v13, %v212_v9  ;;  %v225_v21 = vor.u32 %v223_v17, %v221_v15  ;;  %v604_v39 = vld [vmem:[%s1126_s23 + $0x4] sm:$0xe]  ;;  %v889_v41 = vcombine.low %v429_v37, %v430_v38  ;;  %v474_v52 = vshll.u32 %v1058_v43, 16  ;;  %v1061_v62 = vld [vmem:[%s1126_s23 + $0x1c] sm:$0xff]  }
  0x17   : > { %v233_v29 = vor.u32 %v231_v25, %v229_v22  ;;  %v243_v34 = vshll.u32 %v876_v31, 16  ;;  %v241_v35 = vor.u32 %v239_v33, %v237_v30  ;;  %v900_v44 = vcombine.low %v604_v39, %v430_v38  ;;  %v1062_v7 = vld [vmem:[%s1126_s23 + $0x24] sm:$0x1f]  }
  0x18   : > { %v222_v20 = vsel %vm210_vm3, %v217_v16, %v221_v15  ;;  %v230_v24 = vsel %vm210_vm3, %v225_v21, %v229_v22  ;;  %v247_v45 = vshrl.u32 %v876_v31, 16  ;;  %v469_v46 = vshll.u32 %v889_v41, 16 }
  0x19   : > { %954 = vmatmul.mubr.msk.bf16.vlgmr.msra.gmra.mrb[0].mxu0 %vm250_vm2, %v222_v20  ;;  %v238_v32 = vsel %vm210_vm3, %v233_v29, %v237_v30  ;;  %v245_v36 = vrot.slane %v243_v34, 1  ;;  %v611_v47 = vrot.slane %v900_v44, 1  ;;  %v467_v50 = vshrl.u32 %v889_v41, 16 }
  0x1a   : > { %996 = vmatpush3.bf16.msra.mxu0 %v521_v19  ;;  %957 = vmatprep.mubr.msk.bf16.mxu0 %vm1072_vm1, %v1071_v2  ;;  %v471_v51 = vrot.slane %v469_v46, 1  ;;  %v476_v56 = vrot.slane %v474_v52, 1  ;;  %v614_v57 = vrot.slane %v1060_v54, 1  ;;  %v478_v59 = vshrl.u32 %v1058_v43, 16 }
  0x1b   : > { %980 = vmatmul.mubr.msk.bf16.gmra.mrb[4].mxu1 %vm250_vm2, %v1052_v8  ;;  %v246_v40 = vsel %vm210_vm3, %v241_v35, %v245_v36  ;;  %v249_v49 = vor.u32 %v247_v45, %v245_v36  ;;  %v613_v53 = vsel %vm610_vm4, %v611_v47, %v612_v48  ;;  %v482_v60 = vshll.u32 %v1060_v54, 16 }
  0x1c   : > { %983 = vmatprep.mubr.msk.bf16.mxu1 %vm1072_vm1, %v1071_v2  ;;  %v472_v55 = vor.u32 %v471_v51, %v467_v50  ;;  %v615_v61 = vsel %vm610_vm4, %v612_v48, %v614_v57  ;;  %v480_v63 = vor.u32 %v478_v59, %v476_v56  ;;  %v616_v1 = vrot.slane %v1061_v62, 1 }
  0x1d   : > { %v484_v0 = vrot.slane %v482_v60, 1  ;;  %v486_v4 = vshrl.u32 %v1060_v54, 16  ;;  %v490_v5 = vshll.u32 %v1061_v62, 16  ;;  %v618_v10 = vrot.slane %v1062_v7, 1 }
  0x1e   : > { %v477_v58 = vsel %vm210_vm3, %v472_v55, %v476_v56  ;;  %v617_v6 = vsel %vm610_vm4, %v614_v57, %v616_v1  ;;  %v498_v13 = vshll.u32 %v1062_v7, 16  ;;  %v502_v18 = vshrl.u32 %v1062_v7, 16 }
  0x1f   : > { %v485_v3 = vsel %vm210_vm3, %v480_v63, %v484_v0  ;;  %v488_v8 = vor.u32 %v486_v4, %v484_v0  ;;  %v492_v9 = vrot.slane %v490_v5, 1  ;;  %v619_v14 = vsel %vm610_vm4, %v616_v1, %v618_v10 }
  0x20   : > { %v500_v16 = vrot.slane %v498_v13, 1 }
  0x21   : > { %958 = vmatmul.mubr.msk.bf16.gmra.mrb[4].mxu0 %vm250_vm2, %v230_v24  ;;  %v493_v11 = vsel %vm210_vm3, %v488_v8, %v492_v9 }
  0x22   : > { %961 = vmatprep.mubr.msk.bf16.mxu0 %vm1072_vm1, %v1071_v2  ;;  %v504_v19 = vor.u32 %v502_v18, %v500_v16 }
  0x23   : > { %984 = vmatmul.mubr.msk.bf16.gmra.mrb[8].mxu1 %vm250_vm2, %v1053_v12  ;;  %v494_v12 = vshrl.u32 %v1061_v62, 16 }
  0x24   : > { %987 = vmatprep.mubr.msk.bf16.mxu1 %vm1072_vm1, %v1071_v2 }
  0x25   : > { %v496_v15 = vor.u32 %v494_v12, %v492_v9  ;;  %v1229_v12 = vld [vmem:[%s1275_s2] ss:$0 sm:$0xff] }
  0x27   : > { %v501_v17 = vsel %vm210_vm3, %v496_v15, %v500_v16 }
  0x29   : > { %962 = vmatmul.mubr.msk.bf16.gmra.mrb[8].mxu0 %vm250_vm2, %v238_v32 }
  0x2a   : > { %965 = vmatprep.mubr.msk.bf16.mxu0 %vm1072_vm1, %v1071_v2 }
  0x2b   : > { %988 = vmatmul.mubr.msk.bf16.gmra.mrb[12].mxu1 %vm250_vm2, %v1054_v23 }
  0x2c   : > { %991 = vmatprep.mubr.msk.bf16.mxu1 %vm1072_vm1, %v1071_v2 }
  0x31   : > { %966 = vmatmul.mubr.msk.bf16.gmra.mrb[12].mxu0 %vm250_vm2, %v246_v40 }
  0x32   : > { %969 = vmatprep.mubr.msk.bf16.mxu0 %vm1072_vm1, %v1071_v2 }
  0x33   : > { %992 = vmatmul.mubr.msk.bf16.gmra.mrb[16].mxu1 %vm250_vm2, %v882_v42 }
  0x34   : > { %1019 = vmatprep.mubr.msk.bf16.mxu1 %vm1072_vm1, %v1071_v2 }
  0x39   : > { %970 = vmatmul.mubr.msk.bf16.gmra.mrb[16].mxu0 %vm250_vm2, %v249_v49 }
  0x3a   : > { %997 = vmatprep.mubr.msk.bf16.mxu0 %vm1072_vm1, %v1071_v2 }
  0x3b   : > { %1020 = vmatmul.mubr.msk.bf16.vlgmr.msra.gmra.mrb[20].mxu1 %vm250_vm2, %v613_v53 }
  0x3c   : > { %1023 = vmatprep.mubr.msk.bf16.mxu1 %vm1072_vm1, %v1071_v2 }
  0x41   : > { %998 = vmatmul.mubr.msk.bf16.vlgmr.msra.gmra.mrb[20].mxu0 %vm250_vm2, %v477_v58 }
  0x42   : > { %1001 = vmatprep.mubr.msk.bf16.mxu0 %vm1072_vm1, %v1071_v2 }
  0x43   : > { %1024 = vmatmul.mubr.msk.bf16.gmra.mrb[24].mxu1 %vm250_vm2, %v615_v61 }
  0x44   : > { %1027 = vmatprep.mubr.msk.bf16.mxu1 %vm1072_vm1, %v1071_v2 }
  0x49   : > { %1002 = vmatmul.mubr.msk.bf16.gmra.mrb[24].mxu0 %vm250_vm2, %v485_v3 }
  0x4a   : > { %1005 = vmatprep.mubr.msk.bf16.mxu0 %vm1072_vm1, %v1071_v2 }
  0x4b   : > { %1028 = vmatmul.mubr.msk.bf16.gmra.mrb[28].mxu1 %vm250_vm2, %v617_v6 }
  0x4c   : > { %1031 = vmatprep.mubr.msk.bf16.mxu1 %vm1072_vm1, %v1071_v2 }
  0x51   : > { %1006 = vmatmul.mubr.msk.bf16.gmra.mrb[28].mxu0 %vm250_vm2, %v493_v11 }
  0x52   : > { %1009 = vmatprep.mubr.msk.bf16.mxu0 %vm1072_vm1, %v1071_v2 }
  0x53   : > { %1032 = vmatmul.mubr.msk.bf16.gmra.mrb[32].mxu1 %vm250_vm2, %v619_v14 }
  0x54   : > { %1035 = vmatprep.mubr.msk.bf16.mxu1 %vm1072_vm1, %v1071_v2 }
  0x59   : > { %1010 = vmatmul.mubr.msk.bf16.gmra.mrb[32].mxu0 %vm250_vm2, %v501_v17 }
  0x5a   : > { %1013 = vmatprep.mubr.msk.bf16.mxu0 %vm1072_vm1, %v1071_v2 }
  0x5b   : > { %1036 = vmatmul.mubr.msk.bf16.gmra.mrb[36].mxu1 %vm250_vm2, %v618_v10 }
  0x61   : > { %1014 = vmatmul.mubr.msk.bf16.gmra.mrb[36].mxu0 %vm250_vm2, %v504_v19 }
  0xe5   : > { %v391_v20 = vpop.f32.mrb[0].mxu1 }
  0xe6   : > { %v977_v21 = vpop.f32.mrb[1].mxu1 }
  0xe7   : > { %v394_v22 = vpop.f32.mrb[2].mxu1 }
  0xe8   : > { %v978_v23 = vpop.f32.mrb[3].mxu1 }
  0xec   : > { %v304_v24 = vpop.f32.mrb[0].mxu0 }
  0xed   : > { %v392_v25 = vadd.f32 %v391_v20, %v304_v24  ;;  %v955_v26 = vpop.f32.mrb[1].mxu0 }
  0xee   : > { %v307_v27 = vpop.f32.mrb[2].mxu0  ;;  %v399_v28 = vpop.f32.mrb[4].mxu1 }
  0xef   : > { %v395_v29 = vadd.f32 %v394_v22, %v307_v27  ;;  %v956_v30 = vpop.f32.mrb[3].mxu0  ;;  %v981_v31 = vpop.f32.mrb[5].mxu1 }
  0xf0   : > { %v402_v32 = vpop.f32.mrb[6].mxu1 }
  0xf1   : > { %v982_v33 = vpop.f32.mrb[7].mxu1 }
  0xf4   : > { %v312_v2 = vpop.f32.mrb[4].mxu0 }
  0xf5   : > { %v400_v34 = vadd.f32 %v399_v28, %v312_v2  ;;  %v959_v35 = vpop.f32.mrb[5].mxu0 }
  0xf6   : > { %v315_v36 = vpop.f32.mrb[6].mxu0  ;;  %v407_v37 = vpop.f32.mrb[8].mxu1 }
  0xf7   : > { %v1214_v38 = vadd.f32 %v402_v32, %v315_v36  ;;  %v960_v39 = vpop.f32.mrb[7].mxu0  ;;  %v985_v40 = vpop.f32.mrb[9].mxu1 }
  0xf8   : > { %v410_v41 = vpop.f32.mrb[10].mxu1 }
  0xf9   : > { %v986_v42 = vpop.f32.mrb[11].mxu1 }
  0xfc   : > { %v320_v43 = vpop.f32.mrb[8].mxu0 }
  0xfd   : > { %v1216_v44 = vadd.f32 %v407_v37, %v320_v43  ;;  %v963_v45 = vpop.f32.mrb[9].mxu0 }
  0xfe   : > { %v323_v46 = vpop.f32.mrb[10].mxu0  ;;  %v415_v47 = vpop.f32.mrb[12].mxu1 }
  0xff   : > { %v1218_v48 = vadd.f32 %v410_v41, %v323_v46  ;;  %v964_v49 = vpop.f32.mrb[11].mxu0  ;;  %v989_v50 = vpop.f32.mrb[13].mxu1 }
 0x100   : > { %v418_v51 = vpop.f32.mrb[14].mxu1 }
 0x101   : > { %v990_v52 = vpop.f32.mrb[15].mxu1 }
 0x104   : > { %v328_v53 = vpop.f32.mrb[12].mxu0 }
 0x105   : > { %v1220_v54 = vadd.f32 %v415_v47, %v328_v53  ;;  %v967_v55 = vpop.f32.mrb[13].mxu0 }
 0x106   : > { %v331_v56 = vpop.f32.mrb[14].mxu0  ;;  %v423_v57 = vpop.f32.mrb[16].mxu1 }
 0x107   : > { %v1222_v58 = vadd.f32 %v418_v51, %v331_v56  ;;  %v968_v59 = vpop.f32.mrb[15].mxu0  ;;  %v993_v60 = vpop.f32.mrb[17].mxu1 }
 0x108   : > { %v426_v61 = vpop.f32.mrb[18].mxu1 }
 0x109   : > { %v994_v62 = vpop.f32.mrb[19].mxu1 }
 0x10c   : > { %v336_v63 = vpop.f32.mrb[16].mxu0 }
 0x10d   : > { %v1224_v0 = vadd.f32 %v423_v57, %v336_v63  ;;  %v971_v1 = vpop.f32.mrb[17].mxu0 }
 0x10e   : > { %v339_v3 = vpop.f32.mrb[18].mxu0  ;;  %v672_v4 = vpop.f32.mrb[20].mxu1 }
 0x10f   : > { %v972_v5 = vpop.f32.mrb[19].mxu0  ;;  %v1021_v6 = vpop.f32.mrb[21].mxu1 }
 0x110   : > { %v675_v7 = vpop.f32.mrb[22].mxu1 }
 0x111   : > { %v1022_v8 = vpop.f32.mrb[23].mxu1 }
 0x114   : > { %v557_v9 = vpop.f32.mrb[20].mxu0 }
 0x115   : > { %v595_v10 = vadd.f32 %v557_v9, %v392_v25  ;;  %v999_v11 = vpop.f32.mrb[21].mxu0 }
 0x116   : > { %v560_v13 = vpop.f32.mrb[22].mxu0  ;;  %v680_v14 = vpop.f32.mrb[24].mxu1 }
 0x117   : > { %v710_v15 = vadd.f32 %v672_v4, %v595_v10  ;;  %v596_v16 = vadd.f32 %v560_v13, %v395_v29  ;;  %v1000_v17 = vpop.f32.mrb[23].mxu0  ;;  %v1025_v18 = vpop.f32.mrb[25].mxu1 }
 0x118   : > { %v683_v19 = vpop.f32.mrb[26].mxu1 }
 0x119   : > { %v726_v20 = vadd.f32 %v1229_v12, %v710_v15  ;;  %v711_v21 = vadd.f32 %v675_v7, %v596_v16  ;;  %v1026_v22 = vpop.f32.mrb[27].mxu1 }
 0x11b   : > { %vm735_vm5 = vcmp.ge.f32.partialorder %v726_v20, 0.0  ;;  %v744_v23 = vmul.f32 0.01, %v726_v20  ;;  %v727_v24 = vadd.f32 %v1229_v12, %v711_v21 }
 0x11c   : > { %v565_v25 = vpop.f32.mrb[24].mxu0 }
 0x11d   : > { %v753_v26 = vsel %vm735_vm5, %v726_v20, %v744_v23  ;;  %vm736_vm7 = vcmp.ge.f32.partialorder %v727_v24, 0.0  ;;  %v745_v27 = vmul.f32 0.01, %v727_v24  ;;  %v597_v28 = vadd.f32 %v565_v25, %v400_v34  ;;  %v1003_v29 = vpop.f32.mrb[25].mxu0 }
 0x11e   : > { %v918_v30 = vpack.c.bf16 %v753_v26, %v753_v26  ;;  %v568_v31 = vpop.f32.mrb[26].mxu0  ;;  %v688_v32 = vpop.f32.mrb[28].mxu1 }
 0x11f   : > { %v754_v33 = vsel %vm736_vm7, %v727_v24, %v745_v27  ;;  %v712_v2 = vadd.f32 %v680_v14, %v597_v28  ;;  %v598_v35 = vadd.f32 %v568_v31, %v1214_v38  ;;  %v1004_v36 = vpop.f32.mrb[27].mxu0  ;;  %v1029_v37 = vpop.f32.mrb[29].mxu1 }
 0x120   : > { %800 = vst.msk [vmem:[%s1237_s4] sm:$0xf] %vm799_vm6, %v918_v30  ;;  %v919_v39 = vpack.c.bf16 %v754_v33, %v754_v33  ;;  %v691_v40 = vpop.f32.mrb[30].mxu1 }
 0x121   : > { %v728_v41 = vadd.f32 %v1229_v12, %v712_v2  ;;  %v713_v42 = vadd.f32 %v683_v19, %v598_v35  ;;  %v1030_v43 = vpop.f32.mrb[31].mxu1 }
 0x122   : > { %801 = vst.msk [vmem:[%s1237_s4 + $0x4] sm:$0xf] %vm799_vm6, %v919_v39 }
 0x123   : > { %vm737_vm8 = vcmp.ge.f32.partialorder %v728_v41, 0.0  ;;  %v746_v34 = vmul.f32 0.01, %v728_v41  ;;  %v729_v45 = vadd.f32 %v1229_v12, %v713_v42 }
 0x124   : > { %v573_v46 = vpop.f32.mrb[28].mxu0 }
 0x125   : > { %v755_v47 = vsel %vm737_vm8, %v728_v41, %v746_v34  ;;  %vm738_vm9 = vcmp.ge.f32.partialorder %v729_v45, 0.0  ;;  %v747_v38 = vmul.f32 0.01, %v729_v45  ;;  %v599_v49 = vadd.f32 %v573_v46, %v1216_v44  ;;  %v1007_v50 = vpop.f32.mrb[29].mxu0 }
 0x126   : > { %v920_v51 = vpack.c.bf16 %v755_v47, %v755_v47  ;;  %v576_v52 = vpop.f32.mrb[30].mxu0  ;;  %v696_v53 = vpop.f32.mrb[32].mxu1 }
 0x127   : > { %v756_v55 = vsel %vm738_vm9, %v729_v45, %v747_v38  ;;  %v714_v56 = vadd.f32 %v688_v32, %v599_v49  ;;  %v600_v57 = vadd.f32 %v576_v52, %v1218_v48  ;;  %v1008_v59 = vpop.f32.mrb[31].mxu0  ;;  %v1033_v60 = vpop.f32.mrb[33].mxu1 }
 0x128   : > { %802 = vst.msk [vmem:[%s1237_s4 + $0x8] sm:$0xf] %vm799_vm6, %v920_v51  ;;  %v921_v61 = vpack.c.bf16 %v756_v55, %v756_v55  ;;  %v699_v62 = vpop.f32.mrb[34].mxu1 }
 0x129   : > { %v730_v63 = vadd.f32 %v1229_v12, %v714_v56  ;;  %v715_v1 = vadd.f32 %v691_v40, %v600_v57  ;;  %v1034_v3 = vpop.f32.mrb[35].mxu1 }
 0x12a   : > { %803 = vst.msk [vmem:[%s1237_s4 + $0xc] sm:$0xf] %vm799_vm6, %v921_v61 }
 0x12b   : > { %vm739_vm10 = vcmp.ge.f32.partialorder %v730_v63, 0.0  ;;  %v748_v44 = vmul.f32 0.01, %v730_v63  ;;  %v731_v4 = vadd.f32 %v1229_v12, %v715_v1 }
 0x12c   : > { %v581_v5 = vpop.f32.mrb[32].mxu0 }
 0x12d   : > { %v757_v6 = vsel %vm739_vm10, %v730_v63, %v748_v44  ;;  %vm740_vm11 = vcmp.ge.f32.partialorder %v731_v4, 0.0  ;;  %v749_v48 = vmul.f32 0.01, %v731_v4  ;;  %v601_v7 = vadd.f32 %v581_v5, %v1220_v54  ;;  %v1011_v8 = vpop.f32.mrb[33].mxu0 }
 0x12e   : > { %v922_v9 = vpack.c.bf16 %v757_v6, %v757_v6  ;;  %v584_v10 = vpop.f32.mrb[34].mxu0  ;;  %v704_v11 = vpop.f32.mrb[36].mxu1 }
 0x12f   : > { %v758_v13 = vsel %vm740_vm11, %v731_v4, %v749_v48  ;;  %v716_v14 = vadd.f32 %v696_v53, %v601_v7  ;;  %v602_v15 = vadd.f32 %v584_v10, %v1222_v58  ;;  %v1012_v16 = vpop.f32.mrb[35].mxu0  ;;  %v1037_v17 = vpop.f32.mrb[37].mxu1 }
 0x130   : > { %804 = vst.msk [vmem:[%s1237_s4 + $0x10] sm:$0xf] %vm799_vm6, %v922_v9  ;;  %v923_v18 = vpack.c.bf16 %v758_v13, %v758_v13  ;;  %v707_v19 = vpop.f32.mrb[38].mxu1 }
 0x131   : > { %v732_v20 = vadd.f32 %v1229_v12, %v716_v14  ;;  %v717_v21 = vadd.f32 %v699_v62, %v602_v15  ;;  %v1038_v22 = vpop.f32.mrb[39].mxu1 }
 0x132   : > { %805 = vst.msk [vmem:[%s1237_s4 + $0x14] sm:$0xf] %vm799_vm6, %v923_v18 }
 0x133   : > { %vm741_vm12 = vcmp.ge.f32.partialorder %v732_v20, 0.0  ;;  %v750_v54 = vmul.f32 0.01, %v732_v20  ;;  %v733_v23 = vadd.f32 %v1229_v12, %v717_v21 }
 0x134   : > { %v589_v24 = vpop.f32.mrb[36].mxu0 }
 0x135   : > { %v759_v58 = vsel %vm741_vm12, %v732_v20, %v750_v54  ;;  %vm742_vm13 = vcmp.ge.f32.partialorder %v733_v23, 0.0  ;;  %v751_v25 = vmul.f32 0.01, %v733_v23  ;;  %v603_v26 = vadd.f32 %v589_v24, %v1224_v0  ;;  %v1015_v27 = vpop.f32.mrb[37].mxu0 }
 0x136   : > { %v924_v28 = vpack.c.bf16 %v759_v58, %v759_v58  ;;  %v592_v29 = vpop.f32.mrb[38].mxu0 }
 0x137   : > { %v760_v30 = vsel %vm742_vm13, %v733_v23, %v751_v25  ;;  %v718_v31 = vadd.f32 %v704_v11, %v603_v26  ;;  %v1016_v32 = vpop.f32.mrb[39].mxu0 }
 0x138   : > { %806 = vst.msk [vmem:[%s1237_s4 + $0x18] sm:$0xf] %vm799_vm6, %v924_v28  ;;  %v925_v33 = vpack.c.bf16 %v760_v30, %v760_v30 }
 0x139   : > { %v734_v2 = vadd.f32 %v1229_v12, %v718_v31 }
 0x13a   : > { %807 = vst.msk [vmem:[%s1237_s4 + $0x1c] sm:$0xf] %vm799_vm6, %v925_v33 }
 0x13b   : > { %vm743_vm14 = vcmp.ge.f32.partialorder %v734_v2, 0.0  ;;  %v752_v35 = vmul.f32 0.01, %v734_v2 }
 0x13d   : > { %v761_v36 = vsel %vm743_vm14, %v734_v2, %v752_v35 }
 0x13e   : > { %v926_v37 = vpack.c.bf16 %v761_v36, %v761_v36 }
 0x140   : > { %808 = vst.msk [vmem:[%s1237_s4 + $0x20] sm:$0xf] %vm799_vm6, %v926_v37 }
 0x141 PF: > { %s13_s12 = sadd.s32 1, %s1069_s12  }
 0x142   : > { %p10_p4 = scmp.ge.s32.totalorder %s13_s12, 4  }
 0x144   :  { %12 = sbr.rel (!%p10_p4) target bundleno = 1 (0x1), region = 65 }

// kernel: beta_vae_forward.19
= control target key start
LH: loop header
LB: loop body
LE: loop exit
PB: predicated region body
PF: predicated region fallthrough
CT: control target
= control target key end

     0   :  { %s5029_s12 = smov 0   ;;  %s5989_s0 = inlined_call_operand.vmem [shape: bf16[2,342,8], index: 0, kind: input, shape index: {}]   ;;  %s5990_s1 = inlined_call_operand.vmem [shape: bf16[9,8,4], index: 1, kind: input, shape index: {}]   ;;  %s5991_s2 = inlined_call_operand.vmem [shape: f32[1,4], index: 2, kind: input, shape index: {}]   ;;  %s5992_s3 = inlined_call_operand.vmem [shape: f32[2,288,4], index: 3, kind: output, shape index: {}]  }
   0x1 LB: > { %s3791_s13 = sadd.s32 4294967295, %s5007_s12   ;;  %p3795_p0 = scmp.ge.s32.totalorder %s5007_s12, 1  ;;  %s5007_s12 = sphi %s5029_s12, %s13_s12  }
   0x2   : > { %p137_p1 = scmp.lt.s32.totalorder %s5007_s12, 3 }
   0x4   : > { %p138_p2 = pnand %p3795_p0, %p137_p1 }
   0x5   : > { %vm509_vm0 = vcmask (!%p138_p2), 1043456   ;;  %v3912_v0 = vld [vmem:[%s5990_s1 + $0x10] sm:$0xf] (!%p138_p2)  ;;  %v3798_v1 = vld [vmem:[%s5990_s1 + $0x4] sm:$0xf] (!%p138_p2)  ;;  %p161_p3 = scmp.lt.s32.totalorder (!%p138_p2), %s3791_s13, 1 }
   0x6   : > { %141 = sbr.rel (%p138_p2) target bundleno = 582 (0x246), region = 32  ;;  %4840 = vmatprep.subr.msk.bf16.mxu0 (!%p138_p2), %vm509_vm0, %v3912_v0  ;;  %4836 = vmatprep.subr.msk.bf16.mxu1 (!%p138_p2), %vm509_vm0, %v3798_v1  ;;  %v5046_v2 = vsel (!%p138_p2), %vm509_vm0, %v3912_v0, 0  ;;  %v511_v3 = vsel (!%p138_p2), %vm509_vm0, %v3798_v1, 0  ;;  %v3932_v4 = vld [vmem:[%s5990_s1 + $0x14] sm:$0xf] (!%p138_p2)  ;;  %vm454_vm2 = vcmask (!%p138_p2), 64512  }
   0x7   : > { %4357 = vmatpush3.bf16.msra.mxu0 (!%p138_p2), %v5046_v2  ;;  %4205 = vmatpush3.bf16.msra.mxu1 (!%p138_p2), %v511_v3  ;;  %v208_v5 = vld [vmem:[%s5990_s1] sm:$0xf] (!%p138_p2)  ;;  %vm305_vm1 = vsmask.f32 (!%p138_p2), 7424  ;;  %v5067_v6 = vsel (!%p138_p2), %vm509_vm0, %v3932_v4, 0  ;;  %vm2112_vm4 = vcmask (!%p138_p2), 1045504  }
   0x8   : > { %4842 = vmatprep.subr.msk.bf16.mxu0 (!%p138_p2), %vm509_vm0, %v3932_v4  ;;  %4837 = vmatprep.subr.msk.bf16.mxu1 (!%p138_p2), %vm509_vm0, %v208_v5  ;;  %vm1665_vm3 = vsmask.f32 (!%p138_p2), 6400  ;;  %v727_v12 = vsel (!%p138_p2), %vm509_vm0, %v208_v5, 0  ;;  %v5115_v39 = vld [vmem:[%s5990_s1 + $0x8] sm:$0xf] (!%p138_p2)  ;;  %vm912_vm5 = vcmask (!%p138_p2), 1046528  }
   0x9   : > { %v5149_v1 = vld [vmem:[%s5990_s1 + $0x18] sm:$0xf] (!%p138_p2)  ;;  %vm2865_vm6 = vsmask.f32 (!%p138_p2), 5376  ;;  %vm3312_vm7 = vcmask (!%p138_p2), 1044480   ;;  %vm3699_vm8 = vcmask (!%p138_p2), 31744  }
   0xd   : > { %s5994_s13 = smov (!%p161_p3, %s3791_s13), 1 }
   0xe   : > { %s4846_s22 = smul.u32 172, %s5994_s13 }
   0xf   : > { %s4847_s15 = smul.u32 288, %s5994_s13 }
  0x10   : > { %s5064_s25 = scalar_lea.vmem %s5989_s0, %s4846_s22 }
  0x11   : > { %v172_v7 = vld [vmem:[%s5064_s25] sm:$0xf]  ;;  %v5071_v8 = vld [vmem:[%s5064_s25 + $0x4] sm:$0xf]  ;;  %v5077_v10 = vld [vmem:[%s5064_s25 + $0x8] sm:$0xff]   ;;  %s5874_s18 = scalar_lea.vmem %s5992_s3, %s4847_s15 }
  0x12   : > { %v5074_v9 = vcombine.low %v172_v7, %v5071_v8  ;;  %v1220_v11 = vld [vmem:[%s5064_s25 + $0x8] sm:$0xe]  ;;  %v5082_v13 = vld [vmem:[%s5064_s25 + $0xc] sm:$0xf]  ;;  %v314_v16 = vshll.u32 %v5077_v10, 16  ;;  %v318_v17 = vshrl.u32 %v5077_v10, 16 }
  0x13   : > { %v5089_v18 = vld [vmem:[%s5064_s25 + $0x10] sm:$0xff]   ;;  %v5095_v20 = vcombine.low %v1220_v11, %v5082_v13  ;;  %v5103_v28 = vld [vmem:[%s5064_s25 + $0x18] sm:$0xff]   ;;  %v5109_v34 = vld [vmem:[%s5064_s25 + $0x20] sm:$0xff]  }
  0x14   : > { %v307_v14 = vshrl.u32 %v5074_v9, 16  ;;  %v309_v15 = vshll.u32 %v5074_v9, 16  ;;  %v5092_v19 = vld [vmem:[%s5064_s25 + $0x10] sm:$0xff]   ;;  %v316_v22 = vrot.slane %v314_v16, 1  ;;  %v1675_v23 = vshrl.u32 %v5089_v18, 16  ;;  %v5106_v33 = vld [vmem:[%s5064_s25 + $0x18] sm:$0xff]  }
  0x15   : > { %v1678_v24 = vshll.u32 %v5089_v18, 16  ;;  %v1667_v25 = vshrl.u32 %v5095_v20, 16  ;;  %v1670_v26 = vshll.u32 %v5095_v20, 16  ;;  %v322_v27 = vshll.u32 %v5092_v19, 16  ;;  %v5124_v48 = vld [vmem:[%s5064_s25 + $0x20] sm:$0xff]   ;;  %v5127_v49 = vld [vmem:[%s5064_s25 + $0x28] sm:$0xff]  }
  0x16   : > { %v311_v21 = vrot.slane %v309_v15, 1  ;;  %v320_v30 = vor.u32 %v318_v17, %v316_v22  ;;  %v1677_v31 = vrot.slane %v1675_v23, 1  ;;  %v1684_v38 = vshrl.u32 %v5103_v28, 16  ;;  %v5133_v54 = vld [vmem:[%s5064_s25 + $0x28] sm:$0xff]   ;;  %v5139_v59 = vld [vmem:[%s5064_s25 + $0x30] sm:$0xff]   ;;  %v5163_v23 = vld [vmem:[%s5064_s25 + $0x38] sm:$0xff]  }
  0x17   : > { %v1680_v32 = vrot.slane %v1678_v24, 2  ;;  %v1669_v35 = vrot.slane %v1667_v25, 1  ;;  %v1672_v36 = vrot.slane %v1670_v26, 2  ;;  %v324_v37 = vrot.slane %v322_v27, 1  ;;  %v5144_v0 = vld [vmem:[%s5064_s25 + $0x30] sm:$0xff]  }
  0x18   : > { %v312_v29 = vor.u32 %v311_v21, %v307_v14  ;;  %v1687_v42 = vshll.u32 %v5103_v28, 16  ;;  %v326_v43 = vshrl.u32 %v5092_v19, 16  ;;  %v1686_v46 = vrot.slane %v1684_v38, 1 }
  0x19   : > { %v1681_v41 = vor.u32 %v1680_v32, %v1677_v31  ;;  %v1673_v44 = vor.u32 %v1672_v36, %v1669_v35  ;;  %v325_v45 = vsel %vm305_vm1, %v320_v30, %v324_v37  ;;  %v330_v47 = vshll.u32 %v5106_v33, 16  ;;  %v5172_v35 = vld [vmem:[%s5064_s25 + $0x38] sm:$0xff]  }
  0x1a   : > { %v317_v40 = vsel %vm305_vm1, %v312_v29, %v316_v22  ;;  %v1689_v50 = vrot.slane %v1687_v42, 2  ;;  %v328_v51 = vor.u32 %v326_v43, %v324_v37  ;;  %v1693_v52 = vshrl.u32 %v5109_v34, 16 }
  0x1b   : > { %4206 = vmatprep.mubr.msk.bf16.mxu1 %vm454_vm2, %v317_v40  ;;  %v1696_v53 = vshll.u32 %v5109_v34, 16  ;;  %v1682_v55 = vsel %vm1665_vm3, %v1673_v44, %v1681_v41  ;;  %v332_v56 = vrot.slane %v330_v47, 1  ;;  %v334_v57 = vshrl.u32 %v5106_v33, 16  ;;  %v5183_v44 = vld [vmem:[%s5064_s25 + $0x40] sm:$0xff]  }
  0x1c   : > { %4207 = vmatmul.mubr.msk.bf16.vlgmr.msra.gmra.mrb[0].mxu1 %vm454_vm2, %v325_v45  ;;  %v338_v58 = vshll.u32 %v5124_v48, 16  ;;  %4358 = vmatprep.mubr.msk.bf16.mxu0 %vm454_vm2, %v1682_v55  ;;  %v1690_v60 = vor.u32 %v1689_v50, %v1686_v46  ;;  %v1695_v61 = vrot.slane %v1693_v52, 1  ;;  %v1702_v63 = vshrl.u32 %v5127_v49, 16 }
  0x1d   : > { %4243 = vmatpush3.bf16.msra.mxu1 %v727_v12  ;;  %v1698_v62 = vrot.slane %v1696_v53, 2  ;;  %v333_v3 = vsel %vm305_vm1, %v328_v51, %v332_v56  ;;  %v336_v4 = vor.u32 %v334_v57, %v332_v56  ;;  %v1705_v7 = vshll.u32 %v5127_v49, 16  ;;  %v5188_v51 = vld [vmem:[%s5064_s25 + $0x40] sm:$0xff]  }
  0x1e   : > { %4838 = vmatprep.subr.msk.bf16.mxu1 %vm509_vm0, %v5115_v39  ;;  %v340_v5 = vrot.slane %v338_v58, 1  ;;  %v1691_v11 = vsel %vm1665_vm3, %v1681_v41, %v1690_v60  ;;  %4210 = vmatprep.mubr.msk.bf16.mxu1 %vm454_vm2, %v333_v3  ;;  %v1704_v14 = vrot.slane %v1702_v63, 1  ;;  %v342_v15 = vshrl.u32 %v5124_v48, 16  ;;  %v5199_v63 = vld [vmem:[%s5064_s25 + $0x48] sm:$0xff]  }
  0x1f   : > { %v1699_v12 = vor.u32 %v1698_v62, %v1695_v61  ;;  %4359 = vmatmul.mubr.msk.bf16.vlgmr.msra.gmra.mrb[0].mxu0 %vm454_vm2, %v1691_v11  ;;  %v1707_v17 = vrot.slane %v1705_v7, 2  ;;  %v346_v21 = vshll.u32 %v5133_v54, 16  ;;  %v1711_v22 = vshrl.u32 %v5139_v59, 16  ;;  %v5196_v62 = vld [vmem:[%s5064_s25 + $0x48] sm:$0xff]  }
  0x20   : > { %v341_v16 = vsel %vm305_vm1, %v336_v4, %v340_v5  ;;  %4395 = vmatpush3.bf16.msra.mxu0 %v5067_v6  ;;  %v344_v25 = vor.u32 %v342_v15, %v340_v5  ;;  %v1714_v26 = vshll.u32 %v5139_v59, 16  ;;  %v350_v27 = vshrl.u32 %v5133_v54, 16 }
  0x21   : > { %v1700_v24 = vsel %vm1665_vm3, %v1690_v60, %v1699_v12  ;;  %v1708_v29 = vor.u32 %v1707_v17, %v1704_v14  ;;  %v348_v30 = vrot.slane %v346_v21, 1  ;;  %v1713_v31 = vrot.slane %v1711_v22, 1  ;;  %4843 = vmatprep.subr.msk.bf16.mxu0 %vm509_vm0, %v5149_v1  ;;  %v5208_v14 = vld [vmem:[%s5064_s25 + $0x50] sm:$0xff]  }
  0x22   : > { %4362 = vmatprep.mubr.msk.bf16.mxu0 %vm454_vm2, %v1700_v24  ;;  %v354_v32 = vshll.u32 %v5144_v0, 16  ;;  %v1716_v6 = vrot.slane %v1714_v26, 2  ;;  %v1720_v36 = vshrl.u32 %v5163_v23, 16  ;;  %v1723_v37 = vshll.u32 %v5163_v23, 16 }
  0x23   : > { %v358_v38 = vshrl.u32 %v5144_v0, 16  ;;  %v1709_v40 = vsel %vm1665_vm3, %v1699_v12, %v1708_v29  ;;  %v349_v41 = vsel %vm305_vm1, %v344_v25, %v348_v30  ;;  %v352_v42 = vor.u32 %v350_v27, %v348_v30  ;;  %v5216_v25 = vld [vmem:[%s5064_s25 + $0x50] sm:$0xff]  }
  0x24   : > { %4211 = vmatmul.mubr.msk.bf16.gmra.mrb[4].mxu1 %vm454_vm2, %v341_v16  ;;  %v356_v43 = vrot.slane %v354_v32, 1  ;;  %v1717_v45 = vor.u32 %v1716_v6, %v1713_v31  ;;  %v1722_v46 = vrot.slane %v1720_v36, 1  ;;  %v1725_v47 = vrot.slane %v1723_v37, 2 }
  0x25   : > { %4214 = vmatprep.mubr.msk.bf16.mxu1 %vm454_vm2, %v349_v41  ;;  %v362_v50 = vshll.u32 %v5172_v35, 16  ;;  %v1729_v55 = vshrl.u32 %v5183_v44, 16  ;;  %v1732_v56 = vshll.u32 %v5183_v44, 16  ;;  %v366_v61 = vshrl.u32 %v5172_v35, 16  ;;  %v5226_v41 = vld [vmem:[%s5064_s25 + $0x58] sm:$0xff]  }
  0x26   : > { %v357_v52 = vsel %vm305_vm1, %v352_v42, %v356_v43  ;;  %v360_v53 = vor.u32 %v358_v38, %v356_v43  ;;  %v1718_v57 = vsel %vm1665_vm3, %v1708_v29, %v1717_v45  ;;  %v1726_v58 = vor.u32 %v1725_v47, %v1722_v46  ;;  %v5221_v29 = vld [vmem:[%s5064_s25 + $0x58] sm:$0xff]  }
  0x27   : > { %v364_v60 = vrot.slane %v362_v50, 1  ;;  %4363 = vmatmul.mubr.msk.bf16.gmra.mrb[4].mxu0 %vm454_vm2, %v1709_v40  ;;  %v1731_v3 = vrot.slane %v1729_v55, 1  ;;  %v1734_v4 = vrot.slane %v1732_v56, 2  ;;  %v370_v5 = vshll.u32 %v5188_v51, 16 }
  0x28   : > { %v374_v7 = vshrl.u32 %v5188_v51, 16  ;;  %4366 = vmatprep.mubr.msk.bf16.mxu0 %vm454_vm2, %v1718_v57  ;;  %v1738_v12 = vshrl.u32 %v5196_v62, 16  ;;  %v1741_v16 = vshll.u32 %v5196_v62, 16  ;;  %v378_v17 = vshll.u32 %v5199_v63, 16  ;;  %v2106_v57 = vld [vmem:[%s5064_s25 + $0x8] sm:$0xc] }
  0x29   : > { %v365_v11 = vsel %vm305_vm1, %v360_v53, %v364_v60  ;;  %v1735_v15 = vor.u32 %v1734_v4, %v1731_v3  ;;  %v372_v21 = vrot.slane %v370_v5, 1  ;;  %v1747_v22 = vshrl.u32 %v5208_v14, 16 }
  0x2a   : > { %v1750_v24 = vshll.u32 %v5208_v14, 16  ;;  %v1727_v26 = vsel %vm1665_vm3, %v1717_v45, %v1726_v58  ;;  %v368_v27 = vor.u32 %v366_v61, %v364_v60  ;;  %v1740_v30 = vrot.slane %v1738_v12, 1 }
  0x2b   : > { %v1743_v31 = vrot.slane %v1741_v16, 2  ;;  %v376_v32 = vor.u32 %v374_v7, %v372_v21  ;;  %v380_v6 = vrot.slane %v378_v17, 1  ;;  %v1736_v36 = vsel %vm1665_vm3, %v1726_v58, %v1735_v15  ;;  %v5240_v58 = vld [vmem:[%s5064_s25 + $0x60] sm:$0xff]  }
  0x2c   : > { %4215 = vmatmul.mubr.msk.bf16.gmra.mrb[8].mxu1 %vm454_vm2, %v357_v52  ;;  %v1749_v37 = vrot.slane %v1747_v22, 1  ;;  %v1752_v38 = vrot.slane %v1750_v24, 2  ;;  %v386_v40 = vshll.u32 %v5216_v25, 16  ;;  %v373_v42 = vsel %vm305_vm1, %v368_v27, %v372_v21 }
  0x2d   : > { %4218 = vmatprep.mubr.msk.bf16.mxu1 %vm454_vm2, %v365_v11  ;;  %v382_v43 = vshrl.u32 %v5199_v63, 16  ;;  %v1756_v45 = vshrl.u32 %v5221_v29, 16  ;;  %v1759_v46 = vshll.u32 %v5221_v29, 16  ;;  %v1744_v47 = vor.u32 %v1743_v31, %v1740_v30  ;;  %v5245_v11 = vld [vmem:[%s5064_s25 + $0x68] sm:$0xff]  }
  0x2e   : > { %v381_v50 = vsel %vm305_vm1, %v376_v32, %v380_v6  ;;  %v390_v52 = vshrl.u32 %v5216_v25, 16  ;;  %v394_v53 = vshll.u32 %v5226_v41, 16  ;;  %v1753_v55 = vor.u32 %v1752_v38, %v1749_v37  ;;  %v5262_v32 = vld [vmem:[%s5064_s25 + $0x70] sm:$0xff]  }
  0x2f   : > { %4367 = vmatmul.mubr.msk.bf16.gmra.mrb[8].mxu0 %vm454_vm2, %v1727_v26  ;;  %v388_v56 = vrot.slane %v386_v40, 1  ;;  %v384_v60 = vor.u32 %v382_v43, %v380_v6  ;;  %v1758_v61 = vrot.slane %v1756_v45, 1  ;;  %v1761_v3 = vrot.slane %v1759_v46, 2  ;;  %v5268_v40 = vld [vmem:[%s5064_s25 + $0x78] sm:$0xff]  }
  0x30   : > { %4370 = vmatprep.mubr.msk.bf16.mxu0 %vm454_vm2, %v1736_v36  ;;  %v1745_v4 = vsel %vm1665_vm3, %v1735_v15, %v1744_v47  ;;  %v396_v7 = vrot.slane %v394_v53, 1  ;;  %v1754_v12 = vsel %vm1665_vm3, %v1744_v47, %v1753_v55  ;;  %v3933_v16 = vcombine.low %v2106_v57, %v5082_v13 }
  0x31   : > { %v392_v5 = vor.u32 %v390_v52, %v388_v56  ;;  %v402_v17 = vshll.u32 %v5240_v58, 16  ;;  %v389_v21 = vsel %vm305_vm1, %v384_v60, %v388_v56  ;;  %v398_v22 = vshrl.u32 %v5226_v41, 16  ;;  %v5283_v56 = vld [vmem:[%s5064_s25 + $0x80] sm:$0xff]  }
  0x32   : > { %v5254_v15 = vor.u32 %v1761_v3, %v1758_v61  ;;  %v406_v26 = vshrl.u32 %v5240_v58, 16  ;;  %v410_v27 = vshll.u32 %v5245_v11, 16  ;;  %v2113_v13 = vrot.slane %v3933_v16, 2 }
  0x33   : > { %v397_v24 = vsel %vm305_vm1, %v392_v5, %v396_v7  ;;  %v2114_v30 = vrot.slane %v5089_v18, 2  ;;  %v404_v31 = vrot.slane %v402_v17, 1  ;;  %v400_v6 = vor.u32 %v398_v22, %v396_v7 }
  0x34   : > { %4219 = vmatmul.mubr.msk.bf16.gmra.mrb[12].mxu1 %vm454_vm2, %v373_v42  ;;  %v1763_v36 = vsel %vm1665_vm3, %v1753_v55, %v5254_v15  ;;  %v412_v38 = vrot.slane %v410_v27, 1  ;;  %v418_v18 = vshll.u32 %v5262_v32, 16  ;;  %v2116_v45 = vrot.slane %v5103_v28, 2  ;;  %v5313_v27 = vld [vmem:[%s5064_s25 + $0x90] ss:$0 sps:$4 sm:$0x11]  }
  0x35   : > { %4222 = vmatprep.mubr.msk.bf16.mxu1 %vm454_vm2, %v381_v50  ;;  %v408_v37 = vor.u32 %v406_v26, %v404_v31  ;;  %v2115_v42 = vsel %vm2112_vm4, %v2113_v13, %v2114_v30  ;;  %v405_v43 = vsel %vm305_vm1, %v400_v6, %v404_v31  ;;  %v414_v46 = vshrl.u32 %v5245_v11, 16 }
  0x36   : > { %v422_v50 = vshrl.u32 %v5262_v32, 16  ;;  %v426_v52 = vshll.u32 %v5268_v40, 16  ;;  %v2118_v53 = vrot.slane %v5109_v34, 2  ;;  %v420_v55 = vrot.slane %v418_v18, 1  ;;  %v5296_v34 = vld [vmem:[%s5990_s1 + $0x1c] sm:$0xf] }
  0x37   : > { %4371 = vmatmul.mubr.msk.bf16.gmra.mrb[12].mxu0 %vm454_vm2, %v1745_v4  ;;  %v413_v47 = vsel %vm305_vm1, %v408_v37, %v412_v38  ;;  %v2644_v28 = vsel %vm509_vm0, %v5149_v1, 0  ;;  %v416_v57 = vor.u32 %v414_v46, %v412_v38  ;;  %v2117_v60 = vsel %vm2112_vm4, %v2114_v30, %v2116_v45  ;;  %v5290_v4 = vld [vmem:[%s5064_s25 + $0x88] sm:$0xff]  }
  0x38   : > { %4374 = vmatprep.mubr.msk.bf16.mxu0 %vm454_vm2, %v1754_v12  ;;  %v424_v61 = vor.u32 %v422_v50, %v420_v55  ;;  %v428_v3 = vrot.slane %v426_v52, 1  ;;  %v2119_v5 = vsel %vm2112_vm4, %v2116_v45, %v2118_v53  ;;  %v434_v7 = vshll.u32 %v5283_v56, 16 }
  0x39   : > { %v421_v1 = vsel %vm305_vm1, %v416_v57, %v420_v55  ;;  %v2120_v12 = vrot.slane %v5127_v49, 2  ;;  %v430_v16 = vshrl.u32 %v5268_v40, 16  ;;  %v442_v22 = vshll.u32 %v5290_v4, 16  ;;  %v5340_v55 = vld [vmem:[%s5064_s25 + $0x60] sm:$0xff]   ;;  %v5359_v57 = vld [vmem:[%s5064_s25 + $0x68] sm:$0xff]  }
  0x3a   : > { %v429_v17 = vsel %vm305_vm1, %v424_v61, %v428_v3  ;;  %v436_v26 = vrot.slane %v434_v7, 1  ;;  %v450_v37 = vshll.u32 %v5313_v27, 16  ;;  %v2124_v38 = vrot.slane %v5163_v23, 2  ;;  %v5377_v7 = vld [vmem:[%s5064_s25 + $0x78] sm:$0xff]  }
  0x3b   : > { %v432_v49 = vor.u32 %v430_v16, %v428_v3  ;;  %v2121_v13 = vsel %vm2112_vm4, %v2118_v53, %v2120_v12  ;;  %v444_v31 = vrot.slane %v442_v22, 1  ;;  %v2126_v18 = vrot.slane %v5183_v44, 2  ;;  %v5393_v22 = vld [vmem:[%s5064_s25 + $0x88] sm:$0xff]  }
  0x3c   : > { %4223 = vmatmul.mubr.msk.bf16.gmra.mrb[16].mxu1 %vm454_vm2, %v389_v21  ;;  %v438_v21 = vshrl.u32 %v5283_v56, 16  ;;  %v452_v45 = vrot.slane %v450_v37, 1  ;;  %v2128_v23 = vrot.slane %v5196_v62, 2  ;;  %v2130_v44 = vrot.slane %v5208_v14, 2 }
  0x3d   : > { %4226 = vmatprep.mubr.msk.bf16.mxu1 %vm454_vm2, %v397_v24  ;;  %v2122_v24 = vrot.slane %v5139_v59, 2  ;;  %v437_v59 = vsel %vm305_vm1, %v432_v49, %v436_v26  ;;  %v2132_v62 = vrot.slane %v5221_v29, 2  ;;  %v1005_v14 = vsel %vm509_vm0, %v5115_v39, 0 }
  0x3e   : > { %v440_v30 = vor.u32 %v438_v21, %v436_v26  ;;  %v2129_v52 = vsel %vm2112_vm4, %v2126_v18, %v2128_v23  ;;  %v2131_v53 = vsel %vm2112_vm4, %v2128_v23, %v2130_v44  ;;  %v2136_v61 = vrot.slane %v5359_v57, 2  ;;  %v5397_v26 = vld [vmem:[%s5064_s25 + $0x90] sm:$0xff]  }
  0x3f   : > { %4375 = vmatmul.mubr.msk.bf16.gmra.mrb[16].mxu0 %vm454_vm2, %v1763_v36  ;;  %v2123_v6 = vsel %vm2112_vm4, %v2120_v12, %v2122_v24  ;;  %v446_v36 = vshrl.u32 %v5290_v4, 16  ;;  %v2125_v46 = vsel %vm2112_vm4, %v2122_v24, %v2124_v38  ;;  %v2133_v29 = vsel %vm2112_vm4, %v2130_v44, %v2132_v62  ;;  %v5381_v12 = vld [vmem:[%s5064_s25 + $0x80] sm:$0xff]  }
  0x40   : > { %4396 = vmatprep.mubr.msk.bf16.mxu0 %vm454_vm2, %v2115_v42  ;;  %v445_v42 = vsel %vm305_vm1, %v440_v30, %v444_v31  ;;  %v2140_v16 = vrot.slane %v5377_v7, 2  ;;  %v2144_v49 = vrot.slane %v5393_v22, 2  ;;  %v2420_v30 = vld [vmem:[%s5064_s25 + $0x10] sm:$0xc] }
  0x44   : > { %4227 = vmatmul.mubr.msk.bf16.gmra.mrb[20].mxu1 %vm454_vm2, %v405_v43  ;;  %v448_v43 = vor.u32 %v446_v36, %v444_v31  ;;  %v5407_v31 = vld [vmem:[%s5064_s25 + $0x14] sm:$0xf] }
  0x45   : > { %4230 = vmatprep.mubr.msk.bf16.mxu1 %vm454_vm2, %v413_v47  ;;  %v2127_v47 = vsel %vm2112_vm4, %v2124_v38, %v2126_v18  ;;  %v5417_v37 = vcombine.low %v2420_v30, %v5407_v31  ;;  %v5420_v38 = vld [vmem:[%s5064_s25 + $0x18] sm:$0xff]  }
  0x46   : > { %v453_v50 = vsel %vm305_vm1, %v448_v43, %v452_v45  ;;  %v2553_v43 = vrot.slane %v5420_v38, 2 }
  0x47   : > { %4397 = vmatmul.mubr.msk.bf16.vlgmr.msra.gmra.mrb[0].mxu0 %vm454_vm2, %v2117_v60  ;;  %v5365_v60 = vld [vmem:[%s5064_s25 + $0x70] sm:$0xff]   ;;  %v2552_v18 = vrot.slane %v5417_v37, 2 }
  0x48   : > { %4433 = vmatpush3.bf16.msra.mxu0 %v2644_v28  ;;  %4400 = vmatprep.mubr.msk.bf16.mxu0 %vm454_vm2, %v2119_v5  ;;  %v2134_v28 = vrot.slane %v5340_v55, 2  ;;  %v2138_v3 = vrot.slane %v5365_v60, 2 }
  0x49   : > { %4844 = vmatprep.subr.msk.bf16.mxu0 %vm509_vm0, %v5296_v34 }
  0x4a   : > { %v2135_v39 = vsel %vm2112_vm4, %v2132_v62, %v2134_v28  ;;  %v2137_v5 = vsel %vm2112_vm4, %v2134_v28, %v2136_v61  ;;  %v2141_v21 = vsel %vm2112_vm4, %v2138_v3, %v2140_v16  ;;  %v3091_v62 = vsel %vm509_vm0, %v5296_v34, 0  ;;  %v5455_v28 = vld [vmem:[%s5064_s25 + $0x38] sm:$0xff]  }
  0x4c   : > { %4231 = vmatmul.mubr.msk.bf16.gmra.mrb[24].mxu1 %vm454_vm2, %v421_v1  ;;  %v2139_v1 = vsel %vm2112_vm4, %v2136_v61, %v2138_v3  ;;  %v2561_v61 = vrot.slane %v5455_v28, 2  ;;  %v5474_v3 = vld [vmem:[%s5064_s25 + $0x40] sm:$0xff]  }
  0x4d   : > { %4234 = vmatprep.mubr.msk.bf16.mxu1 %vm454_vm2, %v429_v17  ;;  %v2142_v17 = vrot.slane %v5381_v12, 2 }
  0x4f   : > { %4401 = vmatmul.mubr.msk.bf16.gmra.mrb[4].mxu0 %vm454_vm2, %v2121_v13  ;;  %v2143_v24 = vsel %vm2112_vm4, %v2140_v16, %v2142_v17  ;;  %v2146_v13 = vrot.slane %v5397_v26, 2  ;;  %v906_v16 = vld [vmem:[%s5064_s25] sm:$0xe] }
  0x50   : > { %4404 = vmatprep.mubr.msk.bf16.mxu0 %vm454_vm2, %v2123_v6  ;;  %v2145_v6 = vsel %vm2112_vm4, %v2142_v17, %v2144_v49  ;;  %v2563_v17 = vrot.slane %v5474_v3, 2 }
  0x51   : > { %v2147_v36 = vsel %vm2112_vm4, %v2144_v49, %v2146_v13 }
  0x52   : > { %v2564_v49 = vsel %vm2112_vm4, %v2561_v61, %v2563_v17 }
  0x54   : > { %4235 = vmatmul.mubr.msk.bf16.gmra.mrb[28].mxu1 %vm454_vm2, %v437_v59  ;;  %v5413_v59 = vld [vmem:[%s5064_s25 + $0x98] ss:$0 sps:$4 sm:$0x33]  }
  0x55   : > { %4238 = vmatprep.mubr.msk.bf16.mxu1 %vm454_vm2, %v445_v42  ;;  %v2148_v42 = vrot.slane %v5413_v59, 2 }
  0x57   : > { %4405 = vmatmul.mubr.msk.bf16.gmra.mrb[8].mxu0 %vm454_vm2, %v2125_v46  ;;  %v2149_v45 = vsel %vm2112_vm4, %v2146_v13, %v2148_v42  ;;  %v5433_v46 = vld [vmem:[%s5064_s25 + $0x20] sm:$0xff]   ;;  %v5492_v13 = vld [vmem:[%s5064_s25 + $0x50] sm:$0xff]  }
  0x58   : > { %4408 = vmatprep.mubr.msk.bf16.mxu0 %vm454_vm2, %v2127_v47  ;;  %v2554_v47 = vsel %vm2112_vm4, %v2552_v18, %v2553_v43  ;;  %v2555_v23 = vrot.slane %v5433_v46, 2  ;;  %v2567_v42 = vrot.slane %v5492_v13, 2 }
  0x5c   : > { %4239 = vmatmul.mubr.msk.bf16.gmra.mrb[32].mxu1 %vm454_vm2, %v453_v50  ;;  %v5437_v50 = vld [vmem:[%s5064_s25 + $0x28] sm:$0xff]  }
  0x5d   : > { %4244 = vmatprep.mubr.msk.bf16.mxu1 %vm454_vm2, %v5074_v9  ;;  %v5351_v9 = vld [vmem:[%s5990_s1 + $0xc] sm:$0xf]  ;;  %v2557_v44 = vrot.slane %v5437_v50, 2 }
  0x5f   : > { %4409 = vmatmul.mubr.msk.bf16.gmra.mrb[12].mxu0 %vm454_vm2, %v2129_v52  ;;  %v2556_v52 = vsel %vm2112_vm4, %v2553_v43, %v2555_v23 }
  0x60   : > { %4412 = vmatprep.mubr.msk.bf16.mxu0 %vm454_vm2, %v2131_v53  ;;  %v5449_v53 = vld [vmem:[%s5064_s25 + $0x30] sm:$0xff]  }
  0x64   : > { %4245 = vmatmul.mubr.msk.bf16.vlgmr.msra.gmra.mrb[0].mxu1 %vm454_vm2, %v5077_v10 }
  0x65   : > { %4248 = vmatprep.mubr.msk.bf16.mxu1 %vm454_vm2, %v5092_v19  ;;  %4281 = vmatpush3.bf16.msra.mxu1 %v1005_v14  ;;  %v2558_v14 = vsel %vm2112_vm4, %v2555_v23, %v2557_v44  ;;  %v918_v23 = vrot.slane %v5106_v33, 1 }
  0x66   : > { %4839 = vmatprep.subr.msk.bf16.mxu1 %vm509_vm0, %v5351_v9 }
  0x67   : > { %4413 = vmatmul.mubr.msk.bf16.gmra.mrb[16].mxu0 %vm454_vm2, %v2133_v29  ;;  %v5460_v29 = vld [vmem:[%s5990_s1 + $0x20] sm:$0xf] }
  0x68   : > { %4416 = vmatprep.mubr.msk.bf16.mxu0 %vm454_vm2, %v2135_v39  ;;  %v2559_v39 = vrot.slane %v5449_v53, 2 }
  0x6a   : > { %v2560_v34 = vsel %vm2112_vm4, %v2557_v44, %v2559_v39 }
  0x6c   : > { %4249 = vmatmul.mubr.msk.bf16.gmra.mrb[4].mxu1 %vm454_vm2, %v5106_v33 }
  0x6d   : > { %4252 = vmatprep.mubr.msk.bf16.mxu1 %vm454_vm2, %v5124_v48 }
  0x6f   : > { %4417 = vmatmul.mubr.msk.bf16.gmra.mrb[20].mxu0 %vm454_vm2, %v2137_v5  ;;  %v2562_v5 = vsel %vm2112_vm4, %v2559_v39, %v2561_v61  ;;  %v1444_v39 = vsel %vm509_vm0, %v5351_v9, 0  ;;  %v920_v61 = vrot.slane %v5124_v48, 1  ;;  %v4990_v9 = vld [vmem:[%s5990_s1 + $0x10] sm:$0xf] }
  0x70   : > { %4420 = vmatprep.mubr.msk.bf16.mxu0 %vm454_vm2, %v2139_v1  ;;  %v5478_v1 = vld [vmem:[%s5064_s25 + $0x48] sm:$0xff]  }
  0x71   : > { %v921_v48 = vsel %vm912_vm5, %v918_v23, %v920_v61 }
  0x74   : > { %4253 = vmatmul.mubr.msk.bf16.gmra.mrb[8].mxu1 %vm454_vm2, %v5133_v54 }
  0x75   : > { %4256 = vmatprep.mubr.msk.bf16.mxu1 %vm454_vm2, %v5144_v0 }
  0x77   : > { %4421 = vmatmul.mubr.msk.bf16.gmra.mrb[24].mxu0 %vm454_vm2, %v2141_v21  ;;  %v3855_v21 = vcombine.low %v906_v16, %v5071_v8  ;;  %v5497_v8 = vld [vmem:[%s5064_s25 + $0x58] sm:$0xff]   ;;  %v922_v16 = vrot.slane %v5133_v54, 1 }
  0x78   : > { %4424 = vmatprep.mubr.msk.bf16.mxu0 %vm454_vm2, %v2143_v24  ;;  %v2565_v24 = vrot.slane %v5478_v1, 2  ;;  %v2569_v43 = vrot.slane %v5497_v8, 2 }
  0x79   : > { %v913_v30 = vrot.slane %v3855_v21, 1  ;;  %v5539_v21 = vld [vmem:[%s5064_s25 + $0x78] sm:$0xff]   ;;  %v923_v54 = vsel %vm912_vm5, %v920_v61, %v922_v16 }
  0x7a   : > { %v2570_v44 = vsel %vm2112_vm4, %v2567_v42, %v2569_v43 }
  0x7c   : > { %4257 = vmatmul.mubr.msk.bf16.gmra.mrb[12].mxu1 %vm454_vm2, %v5172_v35 }
  0x7d   : > { %4260 = vmatprep.mubr.msk.bf16.mxu1 %vm454_vm2, %v5188_v51 }
  0x7f   : > { %4425 = vmatmul.mubr.msk.bf16.gmra.mrb[28].mxu0 %vm454_vm2, %v2145_v6  ;;  %v914_v6 = vrot.slane %v5077_v10, 1  ;;  %v916_v10 = vrot.slane %v5092_v19, 1 }
  0x80   : > { %4428 = vmatprep.mubr.msk.bf16.mxu0 %vm454_vm2, %v2147_v36  ;;  %v2566_v36 = vsel %vm2112_vm4, %v2563_v17, %v2565_v24 }
  0x81   : > { %v915_v18 = vsel %vm912_vm5, %v913_v30, %v914_v6  ;;  %v924_v30 = vrot.slane %v5144_v0, 1 }
  0x84   : > { %4261 = vmatmul.mubr.msk.bf16.gmra.mrb[16].mxu1 %vm454_vm2, %v5199_v63 }
  0x85   : > { %4264 = vmatprep.mubr.msk.bf16.mxu1 %vm454_vm2, %v5216_v25 }
  0x87   : > { %4429 = vmatmul.mubr.msk.bf16.gmra.mrb[32].mxu0 %vm454_vm2, %v2149_v45  ;;  %v2568_v45 = vsel %vm2112_vm4, %v2565_v24, %v2567_v42  ;;  %v926_v42 = vrot.slane %v5172_v35, 1  ;;  %v928_v35 = vrot.slane %v5188_v51, 1 }
  0x88   : > { %4434 = vmatprep.mubr.msk.bf16.mxu0 %vm454_vm2, %v2554_v47  ;;  %v5510_v47 = vld [vmem:[%s5064_s25 + $0x60] sm:$0xff]  }
  0x89   : > { %v2571_v19 = vrot.slane %v5510_v47, 2 }
  0x8c   : > { %4265 = vmatmul.mubr.msk.bf16.gmra.mrb[20].mxu1 %vm454_vm2, %v5226_v41 }
  0x8d   : > { %4268 = vmatprep.mubr.msk.bf16.mxu1 %vm454_vm2, %v5240_v58 }
  0x8f   : > { %4435 = vmatmul.mubr.msk.bf16.vlgmr.msra.gmra.mrb[0].mxu0 %vm454_vm2, %v2556_v52  ;;  %v5515_v52 = vld [vmem:[%s5064_s25 + $0x68] sm:$0xff]  }
  0x90   : > { %4471 = vmatpush3.bf16.msra.mxu0 %v3091_v62  ;;  %4438 = vmatprep.mubr.msk.bf16.mxu0 %vm454_vm2, %v2558_v14  ;;  %v917_v62 = vsel %vm912_vm5, %v914_v6, %v916_v10  ;;  %v919_v14 = vsel %vm912_vm5, %v916_v10, %v918_v23  ;;  %v2573_v33 = vrot.slane %v5515_v52, 2  ;;  %v925_v10 = vsel %vm912_vm5, %v922_v16, %v924_v30 }
  0x91   : > { %4845 = vmatprep.subr.msk.bf16.mxu0 %vm509_vm0, %v5460_v29  ;;  %v2867_v16 = vshrl.u32 %v5417_v37, 16 }
  0x92   : > { %v2574_v17 = vsel %vm2112_vm4, %v2571_v19, %v2573_v33 }
  0x94   : > { %4269 = vmatmul.mubr.msk.bf16.gmra.mrb[24].mxu1 %vm454_vm2, %v5245_v11 }
  0x95   : > { %4272 = vmatprep.mubr.msk.bf16.mxu1 %vm454_vm2, %v5262_v32 }
  0x97   : > { %4439 = vmatmul.mubr.msk.bf16.gmra.mrb[4].mxu0 %vm454_vm2, %v2560_v34  ;;  %v2572_v34 = vsel %vm2112_vm4, %v2569_v43, %v2571_v19  ;;  %v5557_v43 = vld [vmem:[%s5064_s25 + $0x88] sm:$0xff]   ;;  %v930_v19 = vrot.slane %v5199_v63, 1  ;;  %v2870_v63 = vshll.u32 %v5417_v37, 16 }
  0x98   : > { %4442 = vmatprep.mubr.msk.bf16.mxu0 %vm454_vm2, %v2562_v5  ;;  %v5530_v5 = vld [vmem:[%s5064_s25 + $0x70] sm:$0xff]   ;;  %v2581_v23 = vrot.slane %v5557_v43, 2 }
  0x99   : > { %v2575_v24 = vrot.slane %v5530_v5, 2  ;;  %v931_v51 = vsel %vm912_vm5, %v928_v35, %v930_v19 }
  0x9b   : > { %v2576_v6 = vsel %vm2112_vm4, %v2573_v33, %v2575_v24  ;;  %v929_v33 = vsel %vm912_vm5, %v926_v42, %v928_v35 }
  0x9c   : > { %4273 = vmatmul.mubr.msk.bf16.gmra.mrb[28].mxu1 %vm454_vm2, %v5268_v40 }
  0x9d   : > { %4276 = vmatprep.mubr.msk.bf16.mxu1 %vm454_vm2, %v5283_v56 }
  0x9f   : > { %4443 = vmatmul.mubr.msk.bf16.gmra.mrb[8].mxu0 %vm454_vm2, %v2564_v49  ;;  %v2577_v49 = vrot.slane %v5539_v21, 2 }
  0xa0   : > { %4446 = vmatprep.mubr.msk.bf16.mxu0 %vm454_vm2, %v2566_v36  ;;  %v5552_v36 = vld [vmem:[%s5064_s25 + $0x80] sm:$0xff]  }
  0xa1   : > { %v2579_v0 = vrot.slane %v5552_v36, 2 }
  0xa4   : > { %4277 = vmatmul.mubr.msk.bf16.gmra.mrb[32].mxu1 %vm454_vm2, %v5290_v4 }
  0xa5   : > { %4282 = vmatprep.mubr.msk.bf16.mxu1 %vm454_vm2, %v915_v18  ;;  %v2578_v18 = vsel %vm2112_vm4, %v2575_v24, %v2577_v49 }
  0xa7   : > { %4447 = vmatmul.mubr.msk.bf16.gmra.mrb[12].mxu0 %vm454_vm2, %v2568_v45  ;;  %v927_v45 = vsel %vm912_vm5, %v924_v30, %v926_v42  ;;  %v934_v30 = vrot.slane %v5226_v41, 1  ;;  %v2872_v42 = vrot.slane %v2870_v63, 3  ;;  %v2893_v41 = vshrl.u32 %v5437_v50, 16 }
  0xa8   : > { %4450 = vmatprep.mubr.msk.bf16.mxu0 %vm454_vm2, %v2570_v44  ;;  %v2580_v44 = vsel %vm2112_vm4, %v2577_v49, %v2579_v0  ;;  %v4914_v49 = vld [vmem:[%s5064_s25 + $0xa0] ss:$0 sps:$4 sm:$0x33]  }
  0xac   : > { %4283 = vmatmul.mubr.msk.bf16.vlgmr.msra.gmra.mrb[0].mxu1 %vm454_vm2, %v917_v62  ;;  %v5570_v62 = vld [vmem:[%s5064_s25 + $0x90] sm:$0xff]  }
  0xad   : > { %4286 = vmatprep.mubr.msk.bf16.mxu1 %vm454_vm2, %v919_v14  ;;  %4319 = vmatpush3.bf16.msra.mxu1 %v1444_v39  ;;  %v5574_v14 = vld [vmem:[%s5064_s25 + $0x98] sm:$0xff]   ;;  %v2582_v39 = vsel %vm2112_vm4, %v2579_v0, %v2581_v23  ;;  %v2583_v61 = vrot.slane %v5570_v62, 2  ;;  %v2587_v0 = vrot.slane %v4914_v49, 2 }
  0xae   : > { %4841 = vmatprep.subr.msk.bf16.mxu1 %vm509_vm0, %v4990_v9  ;;  %v2875_v9 = vshrl.u32 %v5420_v38, 16 }
  0xaf   : > { %4451 = vmatmul.mubr.msk.bf16.gmra.mrb[16].mxu0 %vm454_vm2, %v2572_v34  ;;  %v2585_v34 = vrot.slane %v5574_v14, 2  ;;  %v2584_v24 = vsel %vm2112_vm4, %v2581_v23, %v2583_v61  ;;  %v2887_v23 = vshll.u32 %v5433_v46, 16 }
  0xb0   : > { %4454 = vmatprep.mubr.msk.bf16.mxu0 %vm454_vm2, %v2574_v17  ;;  %v2878_v17 = vshll.u32 %v5420_v38, 16  ;;  %v2877_v37 = vrot.slane %v2875_v9, 2  ;;  %v2895_v9 = vrot.slane %v2893_v41, 2  ;;  %v2920_v41 = vshrl.u32 %v5474_v3, 16 }
  0xb4   : > { %4287 = vmatmul.mubr.msk.bf16.gmra.mrb[4].mxu1 %vm454_vm2, %v921_v48  ;;  %v932_v48 = vrot.slane %v5216_v25, 1 }
  0xb5   : > { %4290 = vmatprep.mubr.msk.bf16.mxu1 %vm454_vm2, %v923_v54  ;;  %v2586_v54 = vsel %vm2112_vm4, %v2583_v61, %v2585_v34 }
  0xb6   : > { %v935_v25 = vsel %vm912_vm5, %v932_v48, %v934_v30 }
  0xb7   : > { %4455 = vmatmul.mubr.msk.bf16.gmra.mrb[20].mxu0 %vm454_vm2, %v2576_v6  ;;  %v2869_v6 = vrot.slane %v2867_v16, 2  ;;  %v938_v16 = vrot.slane %v5245_v11, 1  ;;  %v2911_v11 = vshrl.u32 %v5455_v28, 16 }
  0xb8   : > { %4458 = vmatprep.mubr.msk.bf16.mxu0 %vm454_vm2, %v2578_v18  ;;  %v2880_v18 = vrot.slane %v2878_v17, 3 }
  0xb9   : > { %v2873_v35 = vor.u32 %v2872_v42, %v2869_v6  ;;  %v2914_v6 = vshll.u32 %v5455_v28, 16 }
  0xbc   : > { %4291 = vmatmul.mubr.msk.bf16.gmra.mrb[8].mxu1 %vm454_vm2, %v925_v10  ;;  %v933_v10 = vsel %vm912_vm5, %v930_v19, %v932_v48  ;;  %v936_v19 = vrot.slane %v5240_v58, 1  ;;  %v2902_v58 = vshrl.u32 %v5449_v53, 16 }
  0xbd   : > { %4294 = vmatprep.mubr.msk.bf16.mxu1 %vm454_vm2, %v927_v45  ;;  %v2884_v45 = vshrl.u32 %v5433_v46, 16 }
  0xbe   : > { %v937_v48 = vsel %vm912_vm5, %v934_v30, %v936_v19  ;;  %v940_v30 = vrot.slane %v5262_v32, 1  ;;  %v2923_v32 = vshll.u32 %v5474_v3, 16 }
  0xbf   : > { %4459 = vmatmul.mubr.msk.bf16.gmra.mrb[24].mxu0 %vm454_vm2, %v2580_v44  ;;  %v2881_v44 = vor.u32 %v2880_v18, %v2877_v37  ;;  %v2886_v61 = vrot.slane %v2884_v45, 2  ;;  %v2904_v37 = vrot.slane %v2902_v58, 2  ;;  %v2913_v45 = vrot.slane %v2911_v11, 2 }
  0xc0   : > { %4462 = vmatprep.mubr.msk.bf16.mxu0 %vm454_vm2, %v2582_v39  ;;  %v2896_v39 = vshll.u32 %v5437_v50, 16  ;;  %v2938_v58 = vshrl.u32 %v5492_v13, 16  ;;  %v2950_v11 = vshll.u32 %v5497_v8, 16 }
  0xc1   : > { %v2882_v63 = vsel %vm2865_vm6, %v2873_v35, %v2881_v44  ;;  %v941_v35 = vsel %vm912_vm5, %v938_v16, %v940_v30 }
  0xc2   : > { %v2898_v17 = vrot.slane %v2896_v39, 3 }
  0xc4   : > { %4295 = vmatmul.mubr.msk.bf16.gmra.mrb[12].mxu1 %vm454_vm2, %v929_v33  ;;  %v2588_v33 = vsel %vm2112_vm4, %v2585_v34, %v2587_v0  ;;  %v2905_v34 = vshll.u32 %v5449_v53, 16  ;;  %v2899_v49 = vor.u32 %v2898_v17, %v2895_v9  ;;  %v3405_v0 = vsel %vm509_vm0, %v5460_v29, 0 }
  0xc5   : > { %4298 = vmatprep.mubr.msk.bf16.mxu1 %vm454_vm2, %v931_v51  ;;  %v2889_v51 = vrot.slane %v2887_v23, 3  ;;  %v2916_v23 = vrot.slane %v2914_v6, 3  ;;  %v2929_v29 = vshrl.u32 %v5478_v1, 16 }
  0xc6   : > { %v2907_v18 = vrot.slane %v2905_v34, 3  ;;  %v2941_v34 = vshll.u32 %v5492_v13, 16 }
  0xc7   : > { %4463 = vmatmul.mubr.msk.bf16.gmra.mrb[28].mxu0 %vm454_vm2, %v2584_v24  ;;  %v2890_v24 = vor.u32 %v2889_v51, %v2886_v61  ;;  %v2917_v39 = vor.u32 %v2916_v23, %v2913_v45  ;;  %v2922_v61 = vrot.slane %v2920_v41, 2  ;;  %v2925_v51 = vrot.slane %v2923_v32, 3 }
  0xc8   : > { %4466 = vmatprep.mubr.msk.bf16.mxu0 %vm454_vm2, %v2586_v54  ;;  %v939_v54 = vsel %vm912_vm5, %v936_v19, %v938_v16  ;;  %v2932_v19 = vshll.u32 %v5478_v1, 16  ;;  %v2931_v17 = vrot.slane %v2929_v29, 2  ;;  %v2952_v23 = vrot.slane %v2950_v11, 3  ;;  %v4992_v29 = vld [vmem:[%s5064_s25 + $0x18] sm:$0xff]  }
  0xc9   : > { %v2891_v42 = vsel %vm2865_vm6, %v2881_v44, %v2890_v24  ;;  %v2908_v44 = vor.u32 %v2907_v18, %v2904_v37  ;;  %v2943_v37 = vrot.slane %v2941_v34, 3  ;;  %v1352_v18 = vrot.slane %v5095_v20, 1 }
  0xca   : > { %v2956_v32 = vshrl.u32 %v5510_v47, 16  ;;  %v2959_v20 = vshll.u32 %v5510_v47, 16  ;;  %v2977_v34 = vshll.u32 %v5530_v5, 16  ;;  %v2986_v11 = vshll.u32 %v5539_v21, 16 }
  0xcb   : > { %v2909_v16 = vsel %vm2865_vm6, %v2899_v49, %v2908_v44  ;;  %v2918_v9 = vsel %vm2865_vm6, %v2908_v44, %v2917_v39 }
  0xcc   : > { %4299 = vmatmul.mubr.msk.bf16.gmra.mrb[16].mxu1 %vm454_vm2, %v933_v10  ;;  %v942_v10 = vrot.slane %v5268_v40, 1 }
  0xcd   : > { %4302 = vmatprep.mubr.msk.bf16.mxu1 %vm454_vm2, %v935_v25  ;;  %v2900_v25 = vsel %vm2865_vm6, %v2890_v24, %v2899_v49 }
  0xce   : > { %v943_v40 = vsel %vm912_vm5, %v940_v30, %v942_v10  ;;  %v948_v30 = vrot.slane %v5313_v27, 1 }
  0xcf   : > { %4467 = vmatmul.mubr.msk.bf16.gmra.mrb[32].mxu0 %vm454_vm2, %v2588_v33  ;;  %v944_v33 = vrot.slane %v5283_v56, 1 }
  0xd0   : > { %4472 = vmatprep.mubr.msk.bf16.mxu0 %vm454_vm2, %v2882_v63  ;;  %v946_v63 = vrot.slane %v5290_v4, 1  ;;  %v2947_v4 = vshrl.u32 %v5497_v8, 16 }
  0xd1   : > { %v945_v24 = vsel %vm912_vm5, %v942_v10, %v944_v33  ;;  %v4991_v10 = vld [vmem:[%s5064_s25 + $0x10] sm:$0xff]  }
  0xd2   : > { %v947_v56 = vsel %vm912_vm5, %v944_v33, %v946_v63  ;;  %v2949_v45 = vrot.slane %v2947_v4, 2  ;;  %v2983_v4 = vshrl.u32 %v5539_v21, 16 }
  0xd4   : > { %4303 = vmatmul.mubr.msk.bf16.gmra.mrb[20].mxu1 %vm454_vm2, %v937_v48  ;;  %v2934_v48 = vrot.slane %v2932_v19, 3  ;;  %v2953_v44 = vor.u32 %v2952_v23, %v2949_v45  ;;  %v1355_v19 = vrot.slane %v4992_v29, 1  ;;  %v2985_v45 = vrot.slane %v2983_v4, 2 }
  0xd5   : > { %4306 = vmatprep.mubr.msk.bf16.mxu1 %vm454_vm2, %v939_v54  ;;  %v2926_v54 = vor.u32 %v2925_v51, %v2922_v61  ;;  %v2958_v61 = vrot.slane %v2956_v32, 2  ;;  %v2961_v51 = vrot.slane %v2959_v20, 3  ;;  %v2988_v23 = vrot.slane %v2986_v11, 3  ;;  %v4998_v11 = vld [vmem:[%s5064_s25 + $0x48] sm:$0xff]  }
  0xd6   : > { %v2935_v49 = vor.u32 %v2934_v48, %v2931_v17  ;;  %v2995_v32 = vshll.u32 %v5552_v36, 16  ;;  %v3022_v4 = vshll.u32 %v5574_v14, 16 }
  0xd7   : > { %4473 = vmatmul.mubr.msk.bf16.vlgmr.msra.gmra.mrb[0].mxu0 %vm454_vm2, %v2891_v42  ;;  %v2927_v6 = vsel %vm2865_vm6, %v2917_v39, %v2926_v54  ;;  %v2940_v42 = vrot.slane %v2938_v58, 2  ;;  %v2968_v39 = vshll.u32 %v5515_v52, 16  ;;  %v2974_v58 = vshrl.u32 %v5530_v5, 16 }
  0xd8   : > { %4509 = vmatpush3.bf16.msra.mxu0 %v3405_v0  ;;  %4476 = vmatprep.mubr.msk.bf16.mxu0 %vm454_vm2, %v2900_v25  ;;  %v1353_v0 = vrot.slane %v4991_v10, 1  ;;  %v2936_v25 = vsel %vm2865_vm6, %v2926_v54, %v2935_v49  ;;  %v2962_v54 = vor.u32 %v2961_v51, %v2958_v61  ;;  %v4995_v10 = vld [vmem:[%s5064_s25 + $0x30] sm:$0xff]   ;;  %v2989_v20 = vor.u32 %v2988_v23, %v2985_v45  ;;  %v4997_v51 = vld [vmem:[%s5064_s25 + $0x40] sm:$0xff]  }
  0xd9   : > { %v2944_v41 = vor.u32 %v2943_v37, %v2940_v42  ;;  %v2970_v48 = vrot.slane %v2968_v39, 3  ;;  %v2976_v37 = vrot.slane %v2974_v58, 2  ;;  %v4996_v39 = vld [vmem:[%s5064_s25 + $0x38] sm:$0xff]   ;;  %v2997_v61 = vrot.slane %v2995_v32, 3 }
  0xda   : > { %v1354_v27 = vsel %vm912_vm5, %v1352_v18, %v1353_v0  ;;  %v2963_v42 = vsel %vm2865_vm6, %v2953_v44, %v2962_v54  ;;  %v2979_v18 = vrot.slane %v2977_v34, 3  ;;  %v1363_v29 = vrot.slane %v4996_v39, 1 }
  0xdb   : > { %v2945_v33 = vsel %vm2865_vm6, %v2935_v49, %v2944_v41  ;;  %v3013_v58 = vshll.u32 %v5570_v62, 16  ;;  %v3024_v23 = vrot.slane %v3022_v4, 3  ;;  %v3318_v4 = vrot.slane %v5437_v50, 3 }
  0xdc   : > { %4307 = vmatmul.mubr.msk.bf16.gmra.mrb[24].mxu1 %vm454_vm2, %v941_v35  ;;  %v949_v35 = vsel %vm912_vm5, %v946_v63, %v948_v30  ;;  %v3320_v50 = vrot.slane %v5449_v53, 3 }
  0xdd   : > { %4310 = vmatprep.mubr.msk.bf16.mxu1 %vm454_vm2, %v943_v40  ;;  %v2965_v40 = vshrl.u32 %v5515_v52, 16 }
  0xdf   : > { %4477 = vmatmul.mubr.msk.bf16.gmra.mrb[4].mxu0 %vm454_vm2, %v2909_v16  ;;  %v4993_v16 = vld [vmem:[%s5064_s25 + $0x20] sm:$0xff]   ;;  %v2967_v17 = vrot.slane %v2965_v40, 2  ;;  %v3004_v40 = vshll.u32 %v5557_v43, 16 }
  0xe0   : > { %4480 = vmatprep.mubr.msk.bf16.mxu0 %vm454_vm2, %v2918_v9  ;;  %v1357_v63 = vrot.slane %v4993_v16, 1  ;;  %v2954_v9 = vsel %vm2865_vm6, %v2944_v41, %v2953_v44  ;;  %v2980_v41 = vor.u32 %v2979_v18, %v2976_v37  ;;  %v3001_v44 = vshrl.u32 %v5557_v43, 16  ;;  %v4999_v18 = vld [vmem:[%s5064_s25 + $0x50] sm:$0xff]  }
  0xe1   : > { %v2971_v49 = vor.u32 %v2970_v48, %v2967_v17  ;;  %v1365_v16 = vrot.slane %v4997_v51, 1  ;;  %v3006_v17 = vrot.slane %v3004_v40, 3  ;;  %v3015_v37 = vrot.slane %v3013_v58, 3  ;;  %v5000_v40 = vld [vmem:[%s5064_s25 + $0x58] sm:$0xff]  }
  0xe2   : > { %v1371_v39 = vrot.slane %v5000_v40, 1  ;;  %v1774_v40 = vshrl.u32 %v5359_v57, 16 }
  0xe4   : > { %4311 = vmatmul.mubr.msk.bf16.gmra.mrb[28].mxu1 %vm454_vm2, %v945_v24  ;;  %v1356_v24 = vsel %vm912_vm5, %v1353_v0, %v1355_v19  ;;  %v1361_v0 = vrot.slane %v4995_v10, 1  ;;  %v1369_v10 = vrot.slane %v4999_v18, 1  ;;  %v3322_v18 = vrot.slane %v5455_v28, 3 }
  0xe5   : > { %4314 = vmatprep.mubr.msk.bf16.mxu1 %vm454_vm2, %v947_v56  ;;  %v1358_v56 = vsel %vm912_vm5, %v1355_v19, %v1357_v63  ;;  %v2981_v19 = vsel %vm2865_vm6, %v2971_v49, %v2980_v41 }
  0xe6   : > { %v1364_v48 = vsel %vm912_vm5, %v1361_v0, %v1363_v29  ;;  %v3323_v53 = vsel %vm3312_vm7, %v3320_v50, %v3322_v18 }
  0xe7   : > { %4481 = vmatmul.mubr.msk.bf16.gmra.mrb[8].mxu0 %vm454_vm2, %v2927_v6  ;;  %v4994_v6 = vld [vmem:[%s5064_s25 + $0x28] sm:$0xff]  }
  0xe8   : > { %4484 = vmatprep.mubr.msk.bf16.mxu0 %vm454_vm2, %v2936_v25  ;;  %v1359_v30 = vrot.slane %v4994_v6, 1  ;;  %v2972_v25 = vsel %vm2865_vm6, %v2962_v54, %v2971_v49  ;;  %v1366_v54 = vsel %vm912_vm5, %v1363_v29, %v1365_v16  ;;  %v3019_v49 = vshrl.u32 %v5574_v14, 16 }
  0xe9   : > { %v1367_v6 = vrot.slane %v4998_v11, 1  ;;  %v1379_v11 = vrot.slane %v5377_v7, 1 }
  0xea   : > { %v3021_v45 = vrot.slane %v3019_v49, 2 }
  0xec   : > { %4315 = vmatmul.mubr.msk.bf16.gmra.mrb[32].mxu1 %vm454_vm2, %v949_v35  ;;  %v1360_v35 = vsel %vm912_vm5, %v1357_v63, %v1359_v30  ;;  %v2990_v63 = vsel %vm2865_vm6, %v2980_v41, %v2989_v20 }
  0xed   : > { %4320 = vmatprep.mubr.msk.bf16.mxu1 %vm454_vm2, %v1354_v27  ;;  %v2992_v27 = vshrl.u32 %v5552_v36, 16 }
  0xef   : > { %4485 = vmatmul.mubr.msk.bf16.gmra.mrb[12].mxu0 %vm454_vm2, %v2945_v33  ;;  %v2994_v33 = vrot.slane %v2992_v27, 2 }
  0xf0   : > { %4488 = vmatprep.mubr.msk.bf16.mxu0 %vm454_vm2, %v2954_v9  ;;  %v3003_v9 = vrot.slane %v3001_v44, 2  ;;  %v3306_v44 = vld [vmem:[%s5064_s25 + $0x10] sm:$0x8] }
  0xf2   : > { %v3007_v34 = vor.u32 %v3006_v17, %v3003_v9 }
  0xf4   : > { %4321 = vmatmul.mubr.msk.bf16.vlgmr.msra.gmra.mrb[0].mxu1 %vm454_vm2, %v1356_v24  ;;  %v2998_v24 = vor.u32 %v2997_v61, %v2994_v33  ;;  %v1373_v61 = vrot.slane %v5340_v55, 1 }
  0xf5   : > { %4324 = vmatprep.mubr.msk.bf16.mxu1 %vm454_vm2, %v1358_v56  ;;  %4547 = vmatpush3.bf16.msra.mxu1 %v5046_v2  ;;  %v1362_v2 = vsel %vm912_vm5, %v1359_v30, %v1361_v0  ;;  %v3010_v56 = vshrl.u32 %v5570_v62, 16  ;;  %v5710_v0 = vld [vmem:[%s5064_s25 + $0xa0] ss:$0 sps:$4 sm:$0x77]  }
  0xf6   : > { %v2999_v30 = vsel %vm2865_vm6, %v2989_v20, %v2998_v24  ;;  %v3028_v27 = vshrl.u32 %v5710_v0, 16  ;;  %v3031_v32 = vshll.u32 %v5710_v0, 16  ;;  %v3025_v20 = vor.u32 %v3024_v23, %v3021_v45 }
  0xf7   : > { %4489 = vmatmul.mubr.msk.bf16.gmra.mrb[16].mxu0 %vm454_vm2, %v2963_v42  ;;  %v3012_v42 = vrot.slane %v3010_v56, 2  ;;  %v1374_v17 = vsel %vm912_vm5, %v1371_v39, %v1373_v61  ;;  %v1377_v56 = vrot.slane %v5365_v60, 1  ;;  %v1385_v45 = vrot.slane %v5397_v26, 1 }
  0xf8   : > { %4492 = vmatprep.mubr.msk.bf16.mxu0 %vm454_vm2, %v2972_v25  ;;  %v3008_v25 = vsel %vm2865_vm6, %v2998_v24, %v3007_v34  ;;  %v3033_v33 = vrot.slane %v3031_v32, 3  ;;  %v3314_v24 = vrot.slane %v5420_v38, 3  ;;  %v3316_v38 = vrot.slane %v5433_v46, 3 }
  0xf9   : > { %v3016_v41 = vor.u32 %v3015_v37, %v3012_v42  ;;  %v1380_v46 = vsel %vm912_vm5, %v1377_v56, %v1379_v11  ;;  %v1765_v23 = vshrl.u32 %v5340_v55, 16 }
  0xfa   : > { %v3319_v42 = vsel %vm3312_vm7, %v3316_v38, %v3318_v4 }
  0xfb   : > { %v3017_v29 = vsel %vm2865_vm6, %v3007_v34, %v3016_v41  ;;  %v3026_v51 = vsel %vm2865_vm6, %v3016_v41, %v3025_v20  ;;  %v4917_v41 = vld [vmem:[%s5064_s25 + $0x98] ss:$0 sps:$4 sm:$0x11]   ;;  %v1767_v32 = vrot.slane %v1765_v23, 1 }
  0xfc   : > { %4325 = vmatmul.mubr.msk.bf16.gmra.mrb[4].mxu1 %vm454_vm2, %v1360_v35  ;;  %v1368_v35 = vsel %vm912_vm5, %v1365_v16, %v1367_v6  ;;  %v4011_v16 = vcombine.low %v3306_v44, %v5407_v31  ;;  %v3326_v44 = vrot.slane %v5478_v1, 3 }
  0xfd   : > { %4328 = vmatprep.mubr.msk.bf16.mxu1 %vm454_vm2, %v1362_v2  ;;  %v1370_v2 = vsel %vm912_vm5, %v1367_v6, %v1369_v10  ;;  %v3317_v6 = vsel %vm3312_vm7, %v3314_v24, %v3316_v38 }
  0xff   : > { %4493 = vmatmul.mubr.msk.bf16.gmra.mrb[20].mxu0 %vm454_vm2, %v2981_v19  ;;  %v3030_v19 = vrot.slane %v3028_v27, 2 }
 0x100   : > { %4496 = vmatprep.mubr.msk.bf16.mxu0 %vm454_vm2, %v2990_v63  ;;  %v1372_v63 = vsel %vm912_vm5, %v1369_v10, %v1371_v39  ;;  %v1383_v10 = vrot.slane %v5393_v22, 1  ;;  %v1777_v39 = vshll.u32 %v5359_v57, 16 }
 0x101   : > { %v3034_v9 = vor.u32 %v3033_v33, %v3030_v19  ;;  %v1786_v33 = vshll.u32 %v5365_v60, 16 }
 0x102   : > { %v1386_v27 = vsel %vm912_vm5, %v1383_v10, %v1385_v45 }
 0x103   : > { %v3035_v31 = vsel %vm2865_vm6, %v3025_v20, %v3034_v9 }
 0x104   : > { %4329 = vmatmul.mubr.msk.bf16.gmra.mrb[8].mxu1 %vm454_vm2, %v1364_v48  ;;  %v3313_v48 = vrot.slane %v4011_v16, 3  ;;  %v1779_v16 = vrot.slane %v1777_v39, 2 }
 0x105   : > { %4332 = vmatprep.mubr.msk.bf16.mxu1 %vm454_vm2, %v1366_v54  ;;  %v1375_v54 = vrot.slane %v5359_v57, 1 }
 0x106   : > { %v3315_v58 = vsel %vm3312_vm7, %v3313_v48, %v3314_v24  ;;  %v3330_v48 = vrot.slane %v5497_v8, 3  ;;  %v1792_v24 = vshrl.u32 %v5377_v7, 16 }
 0x107   : > { %4497 = vmatmul.mubr.msk.bf16.gmra.mrb[24].mxu0 %vm454_vm2, %v2999_v30  ;;  %v1376_v34 = vsel %vm912_vm5, %v1373_v61, %v1375_v54  ;;  %v1378_v49 = vsel %vm912_vm5, %v1375_v54, %v1377_v56  ;;  %v1381_v30 = vrot.slane %v5381_v12, 1  ;;  %v1795_v54 = vshll.u32 %v5377_v7, 16 }
 0x108   : > { %4500 = vmatprep.mubr.msk.bf16.mxu0 %vm454_vm2, %v3008_v25  ;;  %v3321_v25 = vsel %vm3312_vm7, %v3318_v4, %v3320_v50 }
 0x109   : > { %v1382_v37 = vsel %vm912_vm5, %v1379_v11, %v1381_v30  ;;  %v1384_v28 = vsel %vm912_vm5, %v1381_v30, %v1383_v10  ;;  %v1797_v38 = vrot.slane %v1795_v54, 2  ;;  %v1810_v30 = vshrl.u32 %v5393_v22, 16 }
 0x10b   : > { %v1812_v10 = vrot.slane %v1810_v30, 1 }
 0x10c   : > { %4333 = vmatmul.mubr.msk.bf16.gmra.mrb[12].mxu1 %vm454_vm2, %v1368_v35  ;;  %v1768_v35 = vshll.u32 %v5340_v55, 16  ;;  %v1387_v55 = vrot.slane %v4917_v41, 1  ;;  %v1831_v41 = vshll.u32 %v5413_v59, 16 }
 0x10d   : > { %4336 = vmatprep.mubr.msk.bf16.mxu1 %vm454_vm2, %v1370_v2  ;;  %v3324_v2 = vrot.slane %v5474_v3, 3  ;;  %v1783_v3 = vshrl.u32 %v5365_v60, 16 }
 0x10e   : > { %v1770_v20 = vrot.slane %v1768_v35, 2  ;;  %v1388_v1 = vsel %vm912_vm5, %v1385_v45, %v1387_v55  ;;  %v3336_v45 = vrot.slane %v5530_v5, 3 }
 0x10f   : > { %4501 = vmatmul.mubr.msk.bf16.gmra.mrb[28].mxu0 %vm454_vm2, %v3017_v29  ;;  %v3325_v29 = vsel %vm3312_vm7, %v3322_v18, %v3324_v2  ;;  %v3327_v61 = vsel %vm3312_vm7, %v3324_v2, %v3326_v44  ;;  %v1785_v9 = vrot.slane %v1783_v3, 1  ;;  %v3346_v3 = vrot.slane %v5574_v14, 3 }
 0x110   : > { %4504 = vmatprep.mubr.msk.bf16.mxu0 %vm454_vm2, %v3026_v51  ;;  %v1771_v19 = vor.u32 %v1770_v20, %v1767_v32  ;;  %v1776_v51 = vrot.slane %v1774_v40, 1  ;;  %v3342_v40 = vrot.slane %v5557_v43, 3 }
 0x112   : > { %v1772_v57 = vsel %vm1665_vm3, %v5254_v15, %v1771_v19  ;;  %v1780_v60 = vor.u32 %v1779_v16, %v1776_v51  ;;  %v1804_v15 = vshll.u32 %v5381_v12, 16 }
 0x114   : > { %4337 = vmatmul.mubr.msk.bf16.gmra.mrb[16].mxu1 %vm454_vm2, %v1372_v63  ;;  %v3328_v63 = vrot.slane %v5492_v13, 3  ;;  %v1801_v13 = vshrl.u32 %v5381_v12, 16  ;;  %v1781_v8 = vsel %vm1665_vm3, %v1771_v19, %v1780_v60  ;;  %v1806_v11 = vrot.slane %v1804_v15, 2 }
 0x115   : > { %4340 = vmatprep.mubr.msk.bf16.mxu1 %vm454_vm2, %v1374_v17  ;;  %v1788_v17 = vrot.slane %v1786_v33, 2 }
 0x116   : > { %v1803_v4 = vrot.slane %v1801_v13, 1 }
 0x117   : > { %4505 = vmatmul.mubr.msk.bf16.gmra.mrb[32].mxu0 %vm454_vm2, %v3035_v31  ;;  %v3329_v31 = vsel %vm3312_vm7, %v3326_v44, %v3328_v63  ;;  %v1789_v56 = vor.u32 %v1788_v17, %v1785_v9  ;;  %v3340_v44 = vrot.slane %v5552_v36, 3  ;;  %v3344_v36 = vrot.slane %v5570_v62, 3 }
 0x118   : > { %4510 = vmatprep.mubr.msk.bf16.mxu0 %vm454_vm2, %v3315_v58  ;;  %v3331_v58 = vsel %vm3312_vm7, %v3328_v63, %v3330_v48  ;;  %v1807_v50 = vor.u32 %v1806_v11, %v1803_v4 }
 0x119   : > { %v1790_v7 = vsel %vm1665_vm3, %v1780_v60, %v1789_v56  ;;  %v3345_v43 = vsel %vm3312_vm7, %v3342_v40, %v3344_v36  ;;  %v3347_v33 = vsel %vm3312_vm7, %v3344_v36, %v3346_v3 }
 0x11c   : > { %4341 = vmatmul.mubr.msk.bf16.gmra.mrb[20].mxu1 %vm454_vm2, %v1376_v34  ;;  %v1794_v34 = vrot.slane %v1792_v24, 1 }
 0x11d   : > { %4344 = vmatprep.mubr.msk.bf16.mxu1 %vm454_vm2, %v1378_v49  ;;  %v3332_v49 = vrot.slane %v5510_v47, 3  ;;  %v1819_v47 = vshrl.u32 %v5397_v26, 16 }
 0x11e   : > { %v1798_v12 = vor.u32 %v1797_v38, %v1794_v34 }
 0x11f   : > { %4511 = vmatmul.mubr.msk.bf16.vlgmr.msra.gmra.mrb[0].mxu0 %vm454_vm2, %v3317_v6  ;;  %v3334_v6 = vrot.slane %v5515_v52, 3  ;;  %v1821_v23 = vrot.slane %v1819_v47, 1 }
 0x120   : > { %4514 = vmatprep.mubr.msk.bf16.mxu0 %vm454_vm2, %v3319_v42  ;;  %v1813_v42 = vshll.u32 %v5393_v22, 16  ;;  %v1799_v52 = vsel %vm1665_vm3, %v1789_v56, %v1798_v12  ;;  %v1808_v22 = vsel %vm1665_vm3, %v1798_v12, %v1807_v50 }
 0x121   : > { %v3335_v18 = vsel %vm3312_vm7, %v3332_v49, %v3334_v6  ;;  %v3337_v2 = vsel %vm3312_vm7, %v3334_v6, %v3336_v45 }
 0x124   : > { %4345 = vmatmul.mubr.msk.bf16.gmra.mrb[24].mxu1 %vm454_vm2, %v1380_v46  ;;  %v3333_v46 = vsel %vm3312_vm7, %v3330_v48, %v3332_v49  ;;  %v5862_v49 = vld [vmem:[%s5991_s2] ss:$0 sm:$0xff] }
 0x125   : > { %4348 = vmatprep.mubr.msk.bf16.mxu1 %vm454_vm2, %v1382_v37  ;;  %v1822_v37 = vshll.u32 %v5397_v26, 16 }
 0x127   : > { %4515 = vmatmul.mubr.msk.bf16.gmra.mrb[4].mxu0 %vm454_vm2, %v3321_v25  ;;  %v1815_v25 = vrot.slane %v1813_v42, 2  ;;  %v1824_v35 = vrot.slane %v1822_v37, 2 }
 0x128   : > { %4518 = vmatprep.mubr.msk.bf16.mxu0 %vm454_vm2, %v3323_v53  ;;  %v3338_v53 = vrot.slane %v5539_v21, 3  ;;  %v1833_v21 = vrot.slane %v1831_v41, 2 }
 0x129   : > { %v1816_v26 = vor.u32 %v1815_v25, %v1812_v10 }
 0x12a   : > { %v3339_v5 = vsel %vm3312_vm7, %v3336_v45, %v3338_v53  ;;  %v3341_v39 = vsel %vm3312_vm7, %v3338_v53, %v3340_v44 }
 0x12b   : > { %v1817_v32 = vsel %vm1665_vm3, %v1807_v50, %v1816_v26 }
 0x12c   : > { %4349 = vmatmul.mubr.msk.bf16.gmra.mrb[28].mxu1 %vm454_vm2, %v1384_v28  ;;  %v1828_v28 = vshrl.u32 %v5413_v59, 16 }
 0x12d   : > { %4352 = vmatprep.mubr.msk.bf16.mxu1 %vm454_vm2, %v1386_v27  ;;  %v1825_v27 = vor.u32 %v1824_v35, %v1821_v23 }
 0x12e   : > { %v1830_v20 = vrot.slane %v1828_v28, 1 }
 0x12f   : > { %4519 = vmatmul.mubr.msk.bf16.gmra.mrb[8].mxu0 %vm454_vm2, %v3325_v29  ;;  %v1826_v55 = vsel %vm1665_vm3, %v1816_v26, %v1825_v27  ;;  %v3343_v29 = vsel %vm3312_vm7, %v3340_v44, %v3342_v40 }
 0x130   : > { %4522 = vmatprep.mubr.msk.bf16.mxu0 %vm454_vm2, %v3327_v61  ;;  %v1834_v59 = vor.u32 %v1833_v21, %v1830_v20  ;;  %v3348_v61 = vrot.slane %v5710_v0, 3 }
 0x132   : > { %v1835_v19 = vsel %vm1665_vm3, %v1825_v27, %v1834_v59 }
 0x134   : > { %4353 = vmatmul.mubr.msk.bf16.gmra.mrb[32].mxu1 %vm454_vm2, %v1388_v1  ;;  %v3349_v1 = vsel %vm3312_vm7, %v3346_v3, %v3348_v61 }
 0x135   : > { %4378 = vmatprep.mubr.msk.bf16.mxu1 %vm454_vm2, %v1772_v57 }
 0x137   : > { %4523 = vmatmul.mubr.msk.bf16.gmra.mrb[12].mxu0 %vm454_vm2, %v3329_v31 }
 0x138   : > { %4526 = vmatprep.mubr.msk.bf16.mxu0 %vm454_vm2, %v3331_v58 }
 0x13c   : > { %4379 = vmatmul.mubr.msk.bf16.vlgmr.msra.gmra.mrb[20].mxu1 %vm454_vm2, %v1781_v8 }
 0x13d   : > { %4382 = vmatprep.mubr.msk.bf16.mxu1 %vm454_vm2, %v1790_v7 }
 0x13f   : > { %4527 = vmatmul.mubr.msk.bf16.gmra.mrb[16].mxu0 %vm454_vm2, %v3333_v46 }
 0x140   : > { %4530 = vmatprep.mubr.msk.bf16.mxu0 %vm454_vm2, %v3335_v18 }
 0x144   : > { %4383 = vmatmul.mubr.msk.bf16.gmra.mrb[24].mxu1 %vm454_vm2, %v1799_v52 }
 0x145   : > { %4386 = vmatprep.mubr.msk.bf16.mxu1 %vm454_vm2, %v1808_v22 }
 0x147   : > { %4531 = vmatmul.mubr.msk.bf16.gmra.mrb[20].mxu0 %vm454_vm2, %v3337_v2 }
 0x148   : > { %4534 = vmatprep.mubr.msk.bf16.mxu0 %vm454_vm2, %v3339_v5 }
 0x14c   : > { %4387 = vmatmul.mubr.msk.bf16.gmra.mrb[28].mxu1 %vm454_vm2, %v1817_v32 }
 0x14d   : > { %4390 = vmatprep.mubr.msk.bf16.mxu1 %vm454_vm2, %v1826_v55 }
 0x14f   : > { %4535 = vmatmul.mubr.msk.bf16.gmra.mrb[24].mxu0 %vm454_vm2, %v3341_v39 }
 0x150   : > { %4538 = vmatprep.mubr.msk.bf16.mxu0 %vm454_vm2, %v3343_v29 }
 0x154   : > { %4391 = vmatmul.mubr.msk.bf16.gmra.mrb[32].mxu1 %vm454_vm2, %v1835_v19 }
 0x157   : > { %4539 = vmatmul.mubr.msk.bf16.gmra.mrb[28].mxu0 %vm454_vm2, %v3345_v43 }
 0x158   : > { %4542 = vmatprep.mubr.msk.bf16.mxu0 %vm454_vm2, %v3347_v33 }
 0x15f   : > { %4543 = vmatmul.mubr.msk.bf16.gmra.mrb[32].mxu0 %vm454_vm2, %v3349_v1 }
 0x1c7   : > { %v4322_v51 = vpop.f32.mrb[0].mxu1 }
 0x1c8   : > { %v1480_v62 = vpop.f32.mrb[1].mxu1 }
 0x1c9   : > { %v4323_v16 = vpop.f32.mrb[2].mxu1 }
 0x1ca   : > { %v1483_v14 = vpop.f32.mrb[3].mxu1 }
 0x1cf   : > { %v4326_v63 = vpop.f32.mrb[4].mxu1 }
 0x1d0   : > { %v1496_v57 = vpop.f32.mrb[5].mxu1 }
 0x1d1   : > { %v4327_v9 = vpop.f32.mrb[6].mxu1 }
 0x1d2   : > { %v1499_v17 = vpop.f32.mrb[7].mxu1 }
 0x1d7   : > { %v4330_v48 = vpop.f32.mrb[8].mxu1 }
 0x1d8   : > { %v1512_v60 = vpop.f32.mrb[9].mxu1 }
 0x1d9   : > { %v4331_v24 = vpop.f32.mrb[10].mxu1 }
 0x1da   : > { %v1515_v54 = vpop.f32.mrb[11].mxu1 }
 0x1df   : > { %v5843_v31 = vpop.f32.mrb[12].mxu1 }
 0x1e0   : > { %v5845_v56 = vpop.f32.mrb[13].mxu1 }
 0x1e1   : > { %v5847_v0 = vpop.f32.mrb[14].mxu1 }
 0x1e2   : > { %v5849_v13 = vpop.f32.mrb[15].mxu1 }
 0x1e7   : > { %v5851_v15 = vpop.f32.mrb[16].mxu1 }
 0x1e8   : > { %v5853_v58 = vpop.f32.mrb[17].mxu1 }
 0x1e9   : > { %v5855_v8 = vpop.f32.mrb[18].mxu1 }
 0x1ea   : > { %v5857_v34 = vpop.f32.mrb[19].mxu1 }
 0x1f2   : > { %v4512_v38 = vpop.f32.mrb[0].mxu0 }
 0x1f3   : > { %v4548_v7 = vadd.f32 %v4512_v38, %v4322_v51  ;;  %v3441_v4 = vpop.f32.mrb[1].mxu0 }
 0x1f4   : > { %v4549_v11 = vadd.f32 %v3441_v4, %v1480_v62  ;;  %v4513_v6 = vpop.f32.mrb[2].mxu0 }
 0x1f5   : > { %v3629_v12 = vadd.f32 %v4548_v7, %v5862_v49  ;;  %v4550_v30 = vadd.f32 %v4513_v6, %v4323_v16  ;;  %v3444_v42 = vpop.f32.mrb[3].mxu0 }
 0x1f6   : > { %v3627_v46 = vadd.f32 %v4549_v11, %v5862_v49  ;;  %v4551_v50 = vadd.f32 %v3444_v42, %v1483_v14 }
 0x1f7   : > { %4918 = vtanh.f32 %v3629_v12  ;;  %v3630_v47 = vadd.f32 %v4550_v30, %v5862_v49 }
 0x1f8   : > { %4920 = vtanh.f32 %v3627_v46  ;;  %v3628_v37 = vadd.f32 %v4551_v50, %v5862_v49 }
 0x1f9   : > { %4922 = vtanh.f32 %v3630_v47 }
 0x1fa   : > { %4924 = vtanh.f32 %v3628_v37  ;;  %v4516_v18 = vpop.f32.mrb[4].mxu0 }
 0x1fb   : > { %v4552_v52 = vadd.f32 %v4516_v18, %v4326_v63  ;;  %v3457_v10 = vpop.f32.mrb[5].mxu0 }
 0x1fc   : > { %v4553_v25 = vadd.f32 %v3457_v10, %v1496_v57  ;;  %v4517_v45 = vpop.f32.mrb[6].mxu0 }
 0x1fd   : > { %v3633_v22 = vadd.f32 %v4552_v52, %v5862_v49  ;;  %v4554_v23 = vadd.f32 %v4517_v45, %v4327_v9  ;;  %v3460_v35 = vpop.f32.mrb[7].mxu0 }
 0x1fe   : > { %v3631_v53 = vadd.f32 %v4553_v25, %v5862_v49  ;;  %v4555_v26 = vadd.f32 %v3460_v35, %v1499_v17 }
 0x1ff   : > { %4926 = vtanh.f32 %v3633_v22  ;;  %v3634_v28 = vadd.f32 %v4554_v23, %v5862_v49 }
 0x200   : > { %4928 = vtanh.f32 %v3631_v53  ;;  %v3632_v41 = vadd.f32 %v4555_v26, %v5862_v49 }
 0x201   : > { %v4919_v2 = vpop.eup %4918  ;;  %4930 = vtanh.f32 %v3634_v28 }
 0x202   : > { %v4921_v27 = vpop.eup %4920  ;;  %3702 = vst.msk [vmem:[%s5874_s18 + $0x10] sm:$0xff] %vm3699_vm8, %v4919_v2  ;;  %4932 = vtanh.f32 %v3632_v41  ;;  %v4520_v5 = vpop.f32.mrb[8].mxu0 }
 0x203   : > { %v4923_v32 = vpop.eup %4922  ;;  %3700 = vst.msk [vmem:[%s5874_s18] sm:$0xff] %vm3699_vm8, %v4921_v27  ;;  %v4556_v20 = vadd.f32 %v4520_v5, %v4330_v48  ;;  %v3473_v21 = vpop.f32.mrb[9].mxu0 }
 0x204   : > { %v4925_v44 = vpop.eup %4924  ;;  %3703 = vst.msk [vmem:[%s5874_s18 + $0x18] sm:$0xff] %vm3699_vm8, %v4923_v32  ;;  %v4557_v55 = vadd.f32 %v3473_v21, %v1512_v60  ;;  %v4521_v40 = vpop.f32.mrb[10].mxu0 }
 0x205   : > { %3701 = vst.msk [vmem:[%s5874_s18 + $0x8] sm:$0xff] %vm3699_vm8, %v4925_v44  ;;  %v3637_v59 = vadd.f32 %v4556_v20, %v5862_v49  ;;  %v4558_v39 = vadd.f32 %v4521_v40, %v4331_v24  ;;  %v3476_v29 = vpop.f32.mrb[11].mxu0 }
 0x206   : > { %v3635_v19 = vadd.f32 %v4557_v55, %v5862_v49  ;;  %v4559_v36 = vadd.f32 %v3476_v29, %v1515_v54 }
 0x207   : > { %4934 = vtanh.f32 %v3637_v59  ;;  %v3638_v3 = vadd.f32 %v4558_v39, %v5862_v49 }
 0x208   : > { %4936 = vtanh.f32 %v3635_v19  ;;  %v3636_v43 = vadd.f32 %v4559_v36, %v5862_v49 }
 0x209   : > { %v4927_v33 = vpop.eup %4926  ;;  %4938 = vtanh.f32 %v3638_v3 }
 0x20a   : > { %v4929_v61 = vpop.eup %4928  ;;  %3706 = vst.msk [vmem:[%s5874_s18 + $0x30] sm:$0xff] %vm3699_vm8, %v4927_v33  ;;  %4940 = vtanh.f32 %v3636_v43  ;;  %v4524_v1 = vpop.f32.mrb[12].mxu0 }
 0x20b   : > { %v4931_v51 = vpop.eup %4930  ;;  %3704 = vst.msk [vmem:[%s5874_s18 + $0x20] sm:$0xff] %vm3699_vm8, %v4929_v61  ;;  %v4560_v62 = vadd.f32 %v4524_v1, %v5843_v31  ;;  %v3489_v16 = vpop.f32.mrb[13].mxu0 }
 0x20c   : > { %v4933_v14 = vpop.eup %4932  ;;  %3707 = vst.msk [vmem:[%s5874_s18 + $0x38] sm:$0xff] %vm3699_vm8, %v4931_v51  ;;  %v4561_v63 = vadd.f32 %v3489_v16, %v5845_v56  ;;  %v4525_v57 = vpop.f32.mrb[14].mxu0 }
 0x20d   : > { %3705 = vst.msk [vmem:[%s5874_s18 + $0x28] sm:$0xff] %vm3699_vm8, %v4933_v14  ;;  %v3641_v9 = vadd.f32 %v4560_v62, %v5862_v49  ;;  %v4562_v17 = vadd.f32 %v4525_v57, %v5847_v0  ;;  %v3492_v48 = vpop.f32.mrb[15].mxu0 }
 0x20e   : > { %v3639_v24 = vadd.f32 %v4561_v63, %v5862_v49  ;;  %v4563_v54 = vadd.f32 %v3492_v48, %v5849_v13 }
 0x20f   : > { %v4380_v60 = vpop.f32.mrb[20].mxu1  ;;  %4942 = vtanh.f32 %v3641_v9  ;;  %v3642_v38 = vadd.f32 %v4562_v17, %v5862_v49 }
 0x210   : > { %v2007_v31 = vpop.f32.mrb[21].mxu1  ;;  %4944 = vtanh.f32 %v3639_v24  ;;  %v3640_v7 = vadd.f32 %v4563_v54, %v5862_v49 }
 0x211   : > { %v4381_v56 = vpop.f32.mrb[22].mxu1  ;;  %v4935_v11 = vpop.eup %4934  ;;  %4946 = vtanh.f32 %v3642_v38 }
 0x212   : > { %v2010_v4 = vpop.f32.mrb[23].mxu1  ;;  %v4937_v0 = vpop.eup %4936  ;;  %3710 = vst.msk [vmem:[%s5874_s18 + $0x50] sm:$0xff] %vm3699_vm8, %v4935_v11  ;;  %4948 = vtanh.f32 %v3640_v7 }
 0x213   : > { %v4528_v6 = vpop.f32.mrb[16].mxu0  ;;  %v4939_v12 = vpop.eup %4938  ;;  %3708 = vst.msk [vmem:[%s5874_s18 + $0x40] sm:$0xff] %vm3699_vm8, %v4937_v0 }
 0x214   : > { %v4564_v13 = vadd.f32 %v4528_v6, %v5851_v15  ;;  %v3505_v30 = vpop.f32.mrb[17].mxu0  ;;  %v4941_v42 = vpop.eup %4940  ;;  %3711 = vst.msk [vmem:[%s5874_s18 + $0x58] sm:$0xff] %vm3699_vm8, %v4939_v12 }
 0x215   : > { %v4565_v46 = vadd.f32 %v3505_v30, %v5853_v58  ;;  %v4529_v50 = vpop.f32.mrb[18].mxu0  ;;  %3709 = vst.msk [vmem:[%s5874_s18 + $0x48] sm:$0xff] %vm3699_vm8, %v4941_v42 }
 0x216   : > { %v3645_v47 = vadd.f32 %v4564_v13, %v5862_v49  ;;  %v4566_v37 = vadd.f32 %v4529_v50, %v5855_v8  ;;  %v3508_v18 = vpop.f32.mrb[19].mxu0 }
 0x217   : > { %v4384_v52 = vpop.f32.mrb[24].mxu1  ;;  %v3643_v10 = vadd.f32 %v4565_v46, %v5862_v49  ;;  %v4567_v15 = vadd.f32 %v3508_v18, %v5857_v34 }
 0x218   : > { %v2023_v25 = vpop.f32.mrb[25].mxu1  ;;  %4950 = vtanh.f32 %v3645_v47  ;;  %v3646_v45 = vadd.f32 %v4566_v37, %v5862_v49 }
 0x219   : > { %v4385_v58 = vpop.f32.mrb[26].mxu1  ;;  %4952 = vtanh.f32 %v3643_v10  ;;  %v3644_v22 = vadd.f32 %v4567_v15, %v5862_v49  ;;  %v4943_v35 = vpop.eup %4942 }
 0x21a   : > { %v2026_v23 = vpop.f32.mrb[27].mxu1  ;;  %4954 = vtanh.f32 %v3646_v45  ;;  %v4945_v8 = vpop.eup %4944  ;;  %3714 = vst.msk [vmem:[%s5874_s18 + $0x70] sm:$0xff] %vm3699_vm8, %v4943_v35 }
 0x21b   : > { %4956 = vtanh.f32 %v3644_v22  ;;  %v4532_v53 = vpop.f32.mrb[20].mxu0  ;;  %v4947_v26 = vpop.eup %4946  ;;  %3712 = vst.msk [vmem:[%s5874_s18 + $0x60] sm:$0xff] %vm3699_vm8, %v4945_v8 }
 0x21c   : > { %v4568_v34 = vadd.f32 %v4532_v53, %v4380_v60  ;;  %v3521_v28 = vpop.f32.mrb[21].mxu0  ;;  %v4949_v41 = vpop.eup %4948  ;;  %3715 = vst.msk [vmem:[%s5874_s18 + $0x78] sm:$0xff] %vm3699_vm8, %v4947_v26 }
 0x21d   : > { %v4569_v2 = vadd.f32 %v3521_v28, %v2007_v31  ;;  %v4533_v27 = vpop.f32.mrb[22].mxu0  ;;  %3713 = vst.msk [vmem:[%s5874_s18 + $0x68] sm:$0xff] %vm3699_vm8, %v4949_v41 }
 0x21e   : > { %v3649_v5 = vadd.f32 %v4568_v34, %v5862_v49  ;;  %v4570_v32 = vadd.f32 %v4533_v27, %v4381_v56  ;;  %v3524_v20 = vpop.f32.mrb[23].mxu0 }
 0x21f   : > { %v4388_v21 = vpop.f32.mrb[28].mxu1  ;;  %v3647_v44 = vadd.f32 %v4569_v2, %v5862_v49  ;;  %v4571_v55 = vadd.f32 %v3524_v20, %v2010_v4 }
 0x220   : > { %v2039_v40 = vpop.f32.mrb[29].mxu1  ;;  %4958 = vtanh.f32 %v3649_v5  ;;  %v3650_v59 = vadd.f32 %v4570_v32, %v5862_v49 }
 0x221   : > { %v4389_v39 = vpop.f32.mrb[30].mxu1  ;;  %4960 = vtanh.f32 %v3647_v44  ;;  %v3648_v29 = vadd.f32 %v4571_v55, %v5862_v49 }
 0x222   : > { %v2042_v19 = vpop.f32.mrb[31].mxu1  ;;  %v4951_v36 = vpop.eup %4950  ;;  %4962 = vtanh.f32 %v3650_v59 }
 0x223   : > { %v4953_v3 = vpop.eup %4952  ;;  %3718 = vst.msk [vmem:[%s5874_s18 + $0x90] sm:$0xff] %vm3699_vm8, %v4951_v36  ;;  %4964 = vtanh.f32 %v3648_v29  ;;  %v4536_v43 = vpop.f32.mrb[24].mxu0 }
 0x224   : > { %v4955_v33 = vpop.eup %4954  ;;  %3716 = vst.msk [vmem:[%s5874_s18 + $0x80] sm:$0xff] %vm3699_vm8, %v4953_v3  ;;  %v4572_v61 = vadd.f32 %v4536_v43, %v4384_v52  ;;  %v3537_v1 = vpop.f32.mrb[25].mxu0 }
 0x225   : > { %v4957_v51 = vpop.eup %4956  ;;  %3719 = vst.msk [vmem:[%s5874_s18 + $0x98] sm:$0xff] %vm3699_vm8, %v4955_v33  ;;  %v4573_v62 = vadd.f32 %v3537_v1, %v2023_v25  ;;  %v4537_v16 = vpop.f32.mrb[26].mxu0 }
 0x226   : > { %3717 = vst.msk [vmem:[%s5874_s18 + $0x88] sm:$0xff] %vm3699_vm8, %v4957_v51  ;;  %v3653_v14 = vadd.f32 %v4572_v61, %v5862_v49  ;;  %v4574_v63 = vadd.f32 %v4537_v16, %v4385_v58  ;;  %v3540_v57 = vpop.f32.mrb[27].mxu0 }
 0x227   : > { %v4392_v9 = vpop.f32.mrb[32].mxu1  ;;  %v3651_v17 = vadd.f32 %v4573_v62, %v5862_v49  ;;  %v4575_v48 = vadd.f32 %v3540_v57, %v2026_v23 }
 0x228   : > { %v2055_v60 = vpop.f32.mrb[33].mxu1  ;;  %4966 = vtanh.f32 %v3653_v14  ;;  %v3654_v24 = vadd.f32 %v4574_v63, %v5862_v49 }
 0x229   : > { %v4393_v54 = vpop.f32.mrb[34].mxu1  ;;  %4968 = vtanh.f32 %v3651_v17  ;;  %v3652_v31 = vadd.f32 %v4575_v48, %v5862_v49 }
 0x22a   : > { %v2058_v38 = vpop.f32.mrb[35].mxu1  ;;  %v4959_v56 = vpop.eup %4958  ;;  %4970 = vtanh.f32 %v3654_v24 }
 0x22b   : > { %v4961_v7 = vpop.eup %4960  ;;  %3722 = vst.msk [vmem:[%s5874_s18 + $0xb0] sm:$0xff] %vm3699_vm8, %v4959_v56  ;;  %4972 = vtanh.f32 %v3652_v31  ;;  %v4540_v4 = vpop.f32.mrb[28].mxu0 }
 0x22c   : > { %v4963_v11 = vpop.eup %4962  ;;  %3720 = vst.msk [vmem:[%s5874_s18 + $0xa0] sm:$0xff] %vm3699_vm8, %v4961_v7  ;;  %v4576_v0 = vadd.f32 %v4540_v4, %v4388_v21  ;;  %v3553_v6 = vpop.f32.mrb[29].mxu0 }
 0x22d   : > { %v4965_v12 = vpop.eup %4964  ;;  %3723 = vst.msk [vmem:[%s5874_s18 + $0xb8] sm:$0xff] %vm3699_vm8, %v4963_v11  ;;  %v4577_v13 = vadd.f32 %v3553_v6, %v2039_v40  ;;  %v4541_v30 = vpop.f32.mrb[30].mxu0 }
 0x22e   : > { %3721 = vst.msk [vmem:[%s5874_s18 + $0xa8] sm:$0xff] %vm3699_vm8, %v4965_v12  ;;  %v3657_v42 = vadd.f32 %v4576_v0, %v5862_v49  ;;  %v4578_v46 = vadd.f32 %v4541_v30, %v4389_v39  ;;  %v3556_v50 = vpop.f32.mrb[31].mxu0 }
 0x22f   : > { %v3655_v47 = vadd.f32 %v4577_v13, %v5862_v49  ;;  %v4579_v37 = vadd.f32 %v3556_v50, %v2042_v19 }
 0x230   : > { %4974 = vtanh.f32 %v3657_v42  ;;  %v3658_v18 = vadd.f32 %v4578_v46, %v5862_v49 }
 0x231   : > { %4976 = vtanh.f32 %v3655_v47  ;;  %v3656_v52 = vadd.f32 %v4579_v37, %v5862_v49 }
 0x232   : > { %v4967_v10 = vpop.eup %4966  ;;  %4978 = vtanh.f32 %v3658_v18  ;;  %v4544_v25 = vpop.f32.mrb[32].mxu0 }
 0x233   : > { %v4969_v15 = vpop.eup %4968  ;;  %3726 = vst.msk [vmem:[%s5874_s18 + $0xd0] sm:$0xff] %vm3699_vm8, %v4967_v10  ;;  %4980 = vtanh.f32 %v3656_v52  ;;  %v4580_v58 = vadd.f32 %v4544_v25, %v4392_v9  ;;  %v3569_v22 = vpop.f32.mrb[33].mxu0 }
 0x234   : > { %v4971_v45 = vpop.eup %4970  ;;  %3724 = vst.msk [vmem:[%s5874_s18 + $0xc0] sm:$0xff] %vm3699_vm8, %v4969_v15  ;;  %v4581_v35 = vadd.f32 %v3569_v22, %v2055_v60  ;;  %v4545_v8 = vpop.f32.mrb[34].mxu0 }
 0x235   : > { %v4973_v23 = vpop.eup %4972  ;;  %3727 = vst.msk [vmem:[%s5874_s18 + $0xd8] sm:$0xff] %vm3699_vm8, %v4971_v45  ;;  %v3661_v53 = vadd.f32 %v4580_v58, %v5862_v49  ;;  %v4582_v26 = vadd.f32 %v4545_v8, %v4393_v54  ;;  %v3572_v34 = vpop.f32.mrb[35].mxu0 }
 0x236   : > { %3725 = vst.msk [vmem:[%s5874_s18 + $0xc8] sm:$0xff] %vm3699_vm8, %v4973_v23  ;;  %v3659_v28 = vadd.f32 %v4581_v35, %v5862_v49  ;;  %v4583_v41 = vadd.f32 %v3572_v34, %v2058_v38 }
 0x237   : > { %4982 = vtanh.f32 %v3661_v53  ;;  %v3662_v2 = vadd.f32 %v4582_v26, %v5862_v49 }
 0x238   : > { %4984 = vtanh.f32 %v3659_v28  ;;  %v3660_v27 = vadd.f32 %v4583_v41, %v5862_v49 }
 0x239   : > { %4986 = vtanh.f32 %v3662_v2 }
 0x23a   : > { %v4975_v5 = vpop.eup %4974  ;;  %4988 = vtanh.f32 %v3660_v27 }
 0x23b   : > { %v4977_v32 = vpop.eup %4976  ;;  %3730 = vst.msk [vmem:[%s5874_s18 + $0xf0] sm:$0xff] %vm3699_vm8, %v4975_v5 }
 0x23c   : > { %v4979_v20 = vpop.eup %4978  ;;  %3728 = vst.msk [vmem:[%s5874_s18 + $0xe0] sm:$0xff] %vm3699_vm8, %v4977_v32 }
 0x23d   : > { %v4981_v21 = vpop.eup %4980  ;;  %3731 = vst.msk [vmem:[%s5874_s18 + $0xf8] sm:$0xff] %vm3699_vm8, %v4979_v20 }
 0x23e   : > { %3729 = vst.msk [vmem:[%s5874_s18 + $0xe8] sm:$0xff] %vm3699_vm8, %v4981_v21 }
 0x241   : > { %v4983_v44 = vpop.eup %4982 }
 0x242   : > { %v4985_v55 = vpop.eup %4984  ;;  %3734 = vst.msk [vmem:[%s5874_s18 + $0x110] sm:$0xff] %vm3699_vm8, %v4983_v44 }
 0x243   : > { %v4987_v49 = vpop.eup %4986  ;;  %3732 = vst.msk [vmem:[%s5874_s18 + $0x100] sm:$0xff] %vm3699_vm8, %v4985_v55 }
 0x244   : > { %v4989_v40 = vpop.eup %4988  ;;  %3735 = vst.msk [vmem:[%s5874_s18 + $0x118] sm:$0xff] %vm3699_vm8, %v4987_v49 }
 0x245   : > { %3733 = vst.msk [vmem:[%s5874_s18 + $0x108] sm:$0xff] %vm3699_vm8, %v4989_v40 }
 0x246 PF: > { %s13_s12 = sadd.s32 1, %s5007_s12  }
 0x247   : > { %p10_p4 = scmp.ge.s32.totalorder %s13_s12, 4  }
 0x249   :  { %12 = sbr.rel (!%p10_p4) target bundleno = 1 (0x1), region = 70 }

</bundles_post_ra>
